<compile_context>
chip_gen: v7x
topology: tpu7x:2x2x1
jax: 0.10.0
libtpu: 0.0.40
codegen_flags: <defaults>
</compile_context>

<pallas_src>
import functools
import math

import numpy as np
import jax
import jax.numpy as jnp
from jax.experimental import pallas as pl
from jax.experimental.pallas import tpu as pltpu


# ----------------------------- in-kernel helpers -----------------------------

def _mm(x, w, b=None):
    """x (f32 value) @ w (bf16 value) with f32 accumulation (+ optional bias)."""
    y = jnp.dot(x.astype(jnp.bfloat16), w, preferred_element_type=jnp.float32)
    if b is not None:
        y = y + b
    return y


def _layer_norm(x, ln, eps):
    """LayerNorm over last dim; ln is (2, D): row0 = gamma, row1 = beta."""
    g = ln[0:1, :]
    b = ln[1:2, :]
    mu = jnp.mean(x, axis=-1, keepdims=True)
    xc = x - mu
    var = jnp.mean(xc * xc, axis=-1, keepdims=True)
    return xc * jax.lax.rsqrt(var + eps) * g + b


def _mha_packed(q, k, v, add_mask, kv_mask, nhead, scale):
    """Head-packed multi-head attention.

    q:(Sq,D), k,v:(Sk,D) f32.  kv_mask:(nhead*Sk, D) is the 0/1 head
    block-diagonal mask; add_mask:(Sq, nhead*Sk) is the additive causal+batch
    mask already tiled per head.  All heads' Q@K^T is ONE MXU call with a full
    D=128 contraction; P @ [V_pack | kv_mask] yields the lane-dense
    concat-of-heads output and the per-head softmax denominators in one call.
    """
    D = q.shape[-1]
    k_pack = (jnp.tile(k, (nhead, 1)) * kv_mask).astype(jnp.bfloat16)
    v_pack = (jnp.tile(v, (nhead, 1)) * kv_mask).astype(jnp.bfloat16)
    s = jax.lax.dot_general(q.astype(jnp.bfloat16), k_pack,
                            (((1,), (1,)), ((), ())),
                            preferred_element_type=jnp.float32)      # (Sq, nhead*Sk)
    s = s * scale + add_mask
    s = s - jnp.max(s, axis=-1, keepdims=True)     # row max: valid per head segment
    p = jnp.exp(s).astype(jnp.bfloat16)
    vm = jnp.concatenate([v_pack, kv_mask.astype(jnp.bfloat16)], axis=-1)  # (nhead*Sk, 2D)
    ow = jnp.dot(p, vm, preferred_element_type=jnp.float32)                # (Sq, 2D)
    num = ow[:, :D]
    den = jnp.maximum(ow[:, D:], 1e-30)            # guard against underflow
    return num * pl.reciprocal(den, approx=True)   # (Sq, D) lane-dense


# ----------------------------- fused decoder stack ---------------------------

_STACKED_NAMES = ("qkv_w", "qkv_b", "so_w", "so_b", "ln1",
                  "cq_w", "cq_b", "ckv_w", "ckv_b", "co_w", "co_b", "ln2",
                  "ff1_w", "ff1_b", "ff2_w", "ff2_b", "ln3")


def _decoder_stack_kernel(
        tgt0_ref, mem_ref, smask_ref, cmask_ref, skvm_ref, ckvm_ref,
        qkv_w_ref, qkv_b_ref, so_w_ref, so_b_ref, ln1_ref,
        cq_w_ref, cq_b_ref, ckv_w_ref, ckv_b_ref, co_w_ref, co_b_ref, ln2_ref,
        ff1_w_ref, ff1_b_ref, ff2_w_ref, ff2_b_ref, ln3_ref,
        fc_w_ref, fc_b_ref,
        out_ref, tgt_scr, *, nhead, eps):
    l = pl.program_id(1)
    n_layers = pl.num_programs(1)

    @pl.when(l == 0)
    def _():                                       # load embedded targets once
        tgt_scr[...] = tgt0_ref[...]

    tgt = tgt_scr[...]                             # (R, D)  f32, VMEM-carried
    mem = mem_ref[...]                             # (Rm, D) f32, VMEM-resident
    D = tgt.shape[-1]
    scale = 1.0 / math.sqrt(D // nhead)

    # --- self-attention (fused QKV projection) + residual + LN1 ---
    qkv = _mm(tgt, qkv_w_ref[0], qkv_b_ref[0])                    # (R, 3D)
    sa = _mha_packed(qkv[:, :D], qkv[:, D:2 * D], qkv[:, 2 * D:],
                     smask_ref[...], skvm_ref[...], nhead, scale)
    sa = _mm(sa, so_w_ref[0], so_b_ref[0])
    tgt = _layer_norm(tgt + sa, ln1_ref[0], eps)

    # --- cross-attention (fused KV projection; module passes no memory mask) ---
    qc = _mm(tgt, cq_w_ref[0], cq_b_ref[0])                        # (R, D)
    kv = _mm(mem, ckv_w_ref[0], ckv_b_ref[0])                      # (Rm, 2D)
    ca = _mha_packed(qc, kv[:, :D], kv[:, D:],
                     cmask_ref[...], ckvm_ref[...], nhead, scale)
    ca = _mm(ca, co_w_ref[0], co_b_ref[0])
    tgt = _layer_norm(tgt + ca, ln2_ref[0], eps)

    # --- feed-forward (hidden never leaves VMEM) + residual + LN3 ---
    h = jnp.maximum(_mm(tgt, ff1_w_ref[0], ff1_b_ref[0]), 0.0)
    ff = _mm(h, ff2_w_ref[0], ff2_b_ref[0])
    tgt = _layer_norm(tgt + ff, ln3_ref[0], eps)

    tgt_scr[...] = tgt

    # --- final FC head fused into the last-layer epilogue ---
    @pl.when(l == n_layers - 1)
    def _():
        out_ref[...] = _mm(tgt, fc_w_ref[...], fc_b_ref[...]).astype(out_ref.dtype)


def fused_decoder_stack(tgt0, mem, smask, cmask, skvm, ckvm, stacked,
                        fc_w, fc_b, *, nhead, row_blocks=1, eps=1e-5):
    """Full TransformerDecoder stack (+ fc head) in ONE pallas_call.

    grid = (row_blocks, L): row blocks of the flattened (B*Sy, D) targets are a
    "parallel" axis (2 on v7x, 1 on single-TC chips); layers are an "arbitrary"
    axis whose stacked weights are streamed while tgt is carried in VMEM.
    """
    R, D = tgt0.shape
    Rm = mem.shape[0]
    L = stacked["qkv_w"].shape[0]
    C = fc_w.shape[1]
    assert R % row_blocks == 0 and Rm % row_blocks == 0
    rpb = R // row_blocks
    mrb = Rm // row_blocks
    assert rpb % 8 == 0 and mrb % 8 == 0, "row blocks must be sublane aligned"

    weights = [stacked[n] for n in _STACKED_NAMES]

    def rows_spec(rows, cols):
        return pl.BlockSpec((rows, cols), lambda rb, l: (rb, 0))

    def const_spec(a):
        nd = a.ndim
        return pl.BlockSpec(tuple(a.shape), lambda rb, l: (0,) * nd)

    def layer_spec(a):
        nd = a.ndim
        return pl.BlockSpec((1,) + tuple(a.shape[1:]),
                            lambda rb, l: (l,) + (0,) * (nd - 1))

    return pl.pallas_call(
        functools.partial(_decoder_stack_kernel, nhead=nhead, eps=eps),
        out_shape=jax.ShapeDtypeStruct((R, C), jnp.float32),
        grid=(row_blocks, L),
        in_specs=([rows_spec(rpb, D), rows_spec(mrb, D),
                   const_spec(smask), const_spec(cmask),
                   const_spec(skvm), const_spec(ckvm)]
                  + [layer_spec(w) for w in weights]
                  + [const_spec(fc_w), const_spec(fc_b)]),
        out_specs=pl.BlockSpec((rpb, C), lambda rb, l: (rb, 0)),
        scratch_shapes=[pltpu.VMEM((rpb, D), jnp.float32)],
        compiler_params=pltpu.CompilerParams(
            dimension_semantics=("parallel", "arbitrary")),
    )(tgt0, mem, smask, cmask, skvm, ckvm, *weights, fc_w, fc_b)


# ----------------------------- CNN encoder kernel ----------------------------

def _cnn_encoder_kernel(x_ref, w1_ref, b1_ref, w2_ref, b2_ref, pe_ref, o_ref,
                        *, scale):
    h = jnp.maximum(_mm(x_ref[...], w1_ref[...], b1_ref[...]), 0.0)
    y = _mm(h, w2_ref[...], b2_ref[...])
    o_ref[...] = (y * scale + pe_ref[...]).astype(o_ref.dtype)


def cnn_encode(x2d, w1, b1, w2, b2, pe_flat, *, scale):
    """(M, K) window rows -> (M, D) memory rows = MLP(x)*sqrt(D) + PE.
    Single full-array invocation (M = B*Sx is tiny here).
    # TODO(synk): tile over rows / fuse window extraction for realistic line widths.
    """
    M, _ = x2d.shape
    D = w2.shape[1]
    return pl.pallas_call(
        functools.partial(_cnn_encoder_kernel, scale=scale),
        out_shape=jax.ShapeDtypeStruct((M, D), jnp.float32),
    )(x2d, w1, b1, w2, b2, pe_flat)


# ----------------------------- host-side constants / glue --------------------

_NEG = -1e9   # large finite negative instead of -inf (NaN-safe)


def positional_encoding_np(length, d_model):
    position = np.arange(length, dtype=np.float32)[:, None]
    div_term = np.exp(np.arange(0, d_model, 2, dtype=np.float32)
                      * (-math.log(10000.0) / d_model))
    pe = np.zeros((length, d_model), np.float32)
    pe[:, 0::2] = np.sin(position * div_term)
    pe[:, 1::2] = np.cos(position * div_term)
    return pe


def self_mask_block_np(nb, sy):
    """(nb*sy, nb*sy): causal within each batch, -1e9 across batches."""
    idx = np.arange(nb * sy)
    qb, qt = idx // sy, idx % sy
    allowed = (qb[:, None] == qb[None, :]) & (qt[:, None] >= qt[None, :])
    return np.where(allowed, 0.0, _NEG).astype(np.float32)


def cross_mask_block_np(nb, sy, sx):
    """(nb*sy, nb*sx): 0 for same-batch memory rows, -1e9 otherwise."""
    qb = (np.arange(nb * sy) // sy)[:, None]
    kb = (np.arange(nb * sx) // sx)[None, :]
    return np.where(qb == kb, 0.0, _NEG).astype(np.float32)


def head_kv_mask_np(sk, d_model, nhead):
    """(nhead*sk, d_model) 0/1 head block-diagonal mask for packed attention."""
    hd = d_model // nhead
    r = np.arange(nhead * sk)[:, None] // sk
    c = np.arange(d_model)[None, :] // hd
    return (r == c).astype(np.float32)


def extract_windows(x, ww, ws):
    """x:(B,H,W) -> (B, Sx, H*ww) full-height sliding windows along width."""
    B, H, W = x.shape
    Sx = (W - ww) // ws + 1
    idx = jnp.arange(Sx)[:, None] * ws + jnp.arange(ww)[None, :]      # (Sx, ww)
    win = x[:, :, idx]                                                # (B, H, Sx, ww)
    return win.transpose(0, 2, 1, 3).reshape(B, Sx, H * ww)


def forward(params, x_img, y_tokens, *, nhead, window_width, window_stride,
            num_classes, row_blocks=1):
    """x_img:(B,H,W) float32, y_tokens:(B,Sy) int32 -> logits (B, C, Sy)."""
    D = params["emb"].shape[1]
    sqrt_d = math.sqrt(D)
    B, H, W = x_img.shape
    Sy = y_tokens.shape[1]
    Sx = (W - window_width) // window_stride + 1
    assert B % row_blocks == 0
    nb = B // row_blocks

    # trace-time numpy constants (nothing recomputed at runtime)
    pe_x = positional_encoding_np(Sx, D)
    pe_y = positional_encoding_np(Sy, D)
    pe_x_flat = jnp.asarray(np.tile(pe_x, (B, 1)))                 # (B*Sx, D)
    pe_y_b = jnp.asarray(pe_y)[None]                               # (1, Sy, D)

    smask = jnp.asarray(np.tile(self_mask_block_np(nb, Sy), (1, nhead)))
    cmask = jnp.asarray(np.tile(cross_mask_block_np(nb, Sy, Sx), (1, nhead)))
    skvm = jnp.asarray(head_kv_mask_np(nb * Sy, D, nhead))
    ckvm = jnp.asarray(head_kv_mask_np(nb * Sx, D, nhead))

    # ---- LineCNN (simplified window-MLP), fused with *sqrt(D) + PE add ----
    windows = extract_windows(x_img, window_width, window_stride)   # (B,Sx,H*ww)
    mem = cnn_encode(windows.reshape(B * Sx, -1),
                     params["cnn_w1"], params["cnn_b1"],
                     params["cnn_w2"], params["cnn_b2"],
                     pe_x_flat, scale=sqrt_d)                        # (B*Sx, D)

    # ---- target embedding + scale + PE, flattened batch-major (B*Sy, D) ----
    tgt0 = (jnp.take(params["emb"], y_tokens, axis=0) * sqrt_d + pe_y_b
            ).reshape(B * Sy, D)

    # ---- whole decoder stack + fc head in a single pallas_call ----
    logits = fused_decoder_stack(tgt0, mem, smask, cmask, skvm, ckvm,
                                 params["stacked"],
                                 params["fc_w"], params["fc_b"],
                                 nhead=nhead, row_blocks=row_blocks)  # (B*Sy, Cpad)

    out = logits[:, :num_classes].reshape(B, Sy, num_classes)
    return out.transpose(0, 2, 1)                                    # (B, C, Sy)


# ----------------------------- parameter init / conversion -------------------

def init_params_torch_layout(key, *, dim, num_layers, num_classes,
                             cnn_in, cnn_hidden):
    """Random params in the PyTorch module's native layouts."""
    keys = iter(jax.random.split(key, 8 + 8 * num_layers))

    def u(shape, scale=0.1):
        return jax.random.uniform(next(keys), shape, jnp.float32, -scale, scale)

    raw = {
        # simplified LineCNN
        "cnn_w1": u((cnn_in, cnn_hidden), 0.1),
        "cnn_b1": jnp.zeros((cnn_hidden,), jnp.float32),
        "cnn_w2": u((cnn_hidden, dim), 0.1),
        "cnn_b2": jnp.zeros((dim,), jnp.float32),
        # embedding / fc (module init_weights: uniform(-0.1, 0.1), fc bias zero)
        "emb": u((num_classes, dim), 0.1),
        "fc_w": u((num_classes, dim), 0.1),      # nn.Linear (out, in)
        "fc_b": jnp.zeros((num_classes,), jnp.float32),
        "layers": [],
    }
    for _ in range(num_layers):
        raw["layers"].append({
            "sa_in_w": u((3 * dim, dim), 0.05),  # nn.MultiheadAttention in_proj
            "sa_in_b": jnp.zeros((3 * dim,), jnp.float32),
            "sa_out_w": u((dim, dim), 0.05),
            "sa_out_b": jnp.zeros((dim,), jnp.float32),
            "ca_in_w": u((3 * dim, dim), 0.05),
            "ca_in_b": jnp.zeros((3 * dim,), jnp.float32),
            "ca_out_w": u((dim, dim), 0.05),
            "ca_out_b": jnp.zeros((dim,), jnp.float32),
            "ff_w1": u((dim, dim), 0.05),        # dim_feedforward == dim
            "ff_b1": jnp.zeros((dim,), jnp.float32),
            "ff_w2": u((dim, dim), 0.05),
            "ff_b2": jnp.zeros((dim,), jnp.float32),
            "ln1_g": jnp.ones((dim,), jnp.float32),
            "ln1_b": jnp.zeros((dim,), jnp.float32),
            "ln2_g": jnp.ones((dim,), jnp.float32),
            "ln2_b": jnp.zeros((dim,), jnp.float32),
            "ln3_g": jnp.ones((dim,), jnp.float32),
            "ln3_b": jnp.zeros((dim,), jnp.float32),
        })
    return raw


def prepare_params(raw, *, num_classes):
    """Convert PyTorch-layout params to kernel layout: transposed bf16 weights,
    packed LN params, fused QKV / KV, per-layer weights stacked along a leading
    L axis, lane-padded FC."""
    dim = raw["emb"].shape[1]
    c_pad = max(128, ((num_classes + 127) // 128) * 128)
    fc_w = jnp.zeros((dim, c_pad), jnp.float32).at[:, :num_classes].set(raw["fc_w"].T)
    fc_b = jnp.zeros((1, c_pad), jnp.float32).at[:, :num_classes].set(raw["fc_b"])

    layers = raw["layers"]

    def stack(fn, bf16=False):
        s = jnp.stack([fn(l) for l in layers], axis=0)
        return s.astype(jnp.bfloat16) if bf16 else s

    stacked = {
        "qkv_w": stack(lambda l: l["sa_in_w"].T, True),             # (L, D, 3D)
        "qkv_b": stack(lambda l: l["sa_in_b"].reshape(1, -1)),      # (L, 1, 3D)
        "so_w": stack(lambda l: l["sa_out_w"].T, True),
        "so_b": stack(lambda l: l["sa_out_b"].reshape(1, -1)),
        "ln1": stack(lambda l: jnp.stack([l["ln1_g"], l["ln1_b"]])),  # (L, 2, D)
        "cq_w": stack(lambda l: l["ca_in_w"][:dim].T, True),        # (L, D, D)
        "cq_b": stack(lambda l: l["ca_in_b"][:dim].reshape(1, -1)),
        "ckv_w": stack(lambda l: l["ca_in_w"][dim:].T, True),       # (L, D, 2D)
        "ckv_b": stack(lambda l: l["ca_in_b"][dim:].reshape(1, -1)),
        "co_w": stack(lambda l: l["ca_out_w"].T, True),
        "co_b": stack(lambda l: l["ca_out_b"].reshape(1, -1)),
        "ln2": stack(lambda l: jnp.stack([l["ln2_g"], l["ln2_b"]])),
        "ff1_w": stack(lambda l: l["ff_w1"].T, True),
        "ff1_b": stack(lambda l: l["ff_b1"].reshape(1, -1)),
        "ff2_w": stack(lambda l: l["ff_w2"].T, True),
        "ff2_b": stack(lambda l: l["ff_b2"].reshape(1, -1)),
        "ln3": stack(lambda l: jnp.stack([l["ln3_g"], l["ln3_b"]])),
    }

    return {
        "emb": raw["emb"],
        "cnn_w1": raw["cnn_w1"].astype(jnp.bfloat16),
        "cnn_b1": raw["cnn_b1"].reshape(1, -1),
        "cnn_w2": raw["cnn_w2"].astype(jnp.bfloat16),
        "cnn_b2": raw["cnn_b2"].reshape(1, -1),
        "fc_w": fc_w.astype(jnp.bfloat16),
        "fc_b": fc_b,
        "stacked": stacked,
    }


def pick_row_blocks(batch):
    """2 row blocks (one per TensorCore) on v7x; 1 full-batch block otherwise."""
    try:
        kind = jax.devices()[0].device_kind.lower()
    except Exception:
        kind = ""
    if "v7" in kind and batch % 2 == 0:
        return 2
    return 1


# ----------------------------- main -------------------------------------------

if __name__ == "__main__":
    TRANSFORMER_DIM = 128
    TRANSFORMER_LAYERS = 4
    TRANSFORMER_NHEAD = 4

    B, H, W = 2, 16, 32          # (B, H, W) image
    num_classes = 20             # len(mapping), includes <S>/<P>/<E>
    Sy = 8                       # max_output_length
    ww, ws = 4, 4                # CNN window width / stride -> Sx = 8
    cnn_in = H * ww
    cnn_hidden = 64

    key = jax.random.PRNGKey(0)
    k_params, k_x, k_y = jax.random.split(key, 3)

    raw = init_params_torch_layout(
        k_params, dim=TRANSFORMER_DIM, num_layers=TRANSFORMER_LAYERS,
        num_classes=num_classes, cnn_in=cnn_in, cnn_hidden=cnn_hidden)
    params = prepare_params(raw, num_classes=num_classes)

    x = jax.random.normal(k_x, (B, H, W), jnp.float32)
    y = jax.random.randint(k_y, (B, Sy), 0, num_classes, dtype=jnp.int32)

    row_blocks = pick_row_blocks(B)

    fwd = jax.jit(functools.partial(
        forward, nhead=TRANSFORMER_NHEAD, window_width=ww, window_stride=ws,
        num_classes=num_classes, row_blocks=row_blocks))

    logits = jax.block_until_ready(fwd(params, x, y))

    assert logits.shape == (B, num_classes, Sy), logits.shape
    assert bool(jnp.all(jnp.isfinite(logits)))
    print("KERNEL_OK")
</pallas_src>

<mosaic_0001>
module attributes {stable_mosaic.version = 11 : i64} {
  func.func @_cnn_encoder_kernel(%arg0: memref<16x64xf32, #tpu.memory_space<vmem>>, %arg1: memref<64x64xbf16, #tpu.memory_space<vmem>>, %arg2: memref<1x64xf32, #tpu.memory_space<vmem>>, %arg3: memref<64x128xbf16, #tpu.memory_space<vmem>>, %arg4: memref<1x128xf32, #tpu.memory_space<vmem>>, %arg5: memref<16x128xf32, #tpu.memory_space<vmem>>, %arg6: memref<16x128xf32, #tpu.memory_space<vmem>>) attributes {dimension_semantics = [], scalar_prefetch = 0 : i64, scratch_operands = 0 : i64, tpu.core_type = #tpu.core_type<tc>} {
    %c0 = arith.constant 0 : index
    %c0_0 = arith.constant 0 : index
    %0 = vector.load %arg0[%c0, %c0_0] : memref<16x64xf32, #tpu.memory_space<vmem>>, vector<16x64xf32>
    %c0_1 = arith.constant 0 : index
    %c0_2 = arith.constant 0 : index
    %1 = vector.load %arg1[%c0_1, %c0_2] : memref<64x64xbf16, #tpu.memory_space<vmem>>, vector<64x64xbf16>
    %c0_3 = arith.constant 0 : index
    %c0_4 = arith.constant 0 : index
    %2 = vector.load %arg2[%c0_3, %c0_4] : memref<1x64xf32, #tpu.memory_space<vmem>>, vector<1x64xf32>
    %3 = arith.truncf %0 : vector<16x64xf32> to vector<16x64xbf16>
    %cst = arith.constant dense<0.000000e+00> : vector<16x64xf32>
    %4 = tpu.matmul %3, %1, %cst {dimension_numbers = #tpu.dot_dimension_numbers<[1], [0], [0], [1], [0, 0, 1, 1], [], []>} : vector<16x64xbf16>, vector<64x64xbf16>, vector<16x64xf32> -> vector<16x64xf32>
    %5 = vector.broadcast %2 : vector<1x64xf32> to vector<16x64xf32>
    %6 = arith.addf %4, %5 : vector<16x64xf32>
    %cst_5 = arith.constant 0.000000e+00 : f32
    %7 = vector.broadcast %cst_5 : f32 to vector<16x64xf32>
    %8 = arith.maximumf %6, %7 : vector<16x64xf32>
    %c0_6 = arith.constant 0 : index
    %c0_7 = arith.constant 0 : index
    %9 = vector.load %arg3[%c0_6, %c0_7] : memref<64x128xbf16, #tpu.memory_space<vmem>>, vector<64x128xbf16>
    %c0_8 = arith.constant 0 : index
    %c0_9 = arith.constant 0 : index
    %10 = vector.load %arg4[%c0_8, %c0_9] : memref<1x128xf32, #tpu.memory_space<vmem>>, vector<1x128xf32>
    %11 = arith.truncf %8 : vector<16x64xf32> to vector<16x64xbf16>
    %cst_10 = arith.constant dense<0.000000e+00> : vector<16x128xf32>
    %12 = tpu.matmul %11, %9, %cst_10 {dimension_numbers = #tpu.dot_dimension_numbers<[1], [0], [0], [1], [0, 0, 1, 1], [], []>} : vector<16x64xbf16>, vector<64x128xbf16>, vector<16x128xf32> -> vector<16x128xf32>
    %13 = vector.broadcast %10 : vector<1x128xf32> to vector<16x128xf32>
    %14 = arith.addf %12, %13 : vector<16x128xf32>
    %cst_11 = arith.constant 11.3137083 : f32
    %15 = vector.broadcast %cst_11 : f32 to vector<16x128xf32>
    %16 = arith.mulf %14, %15 : vector<16x128xf32>
    %c0_12 = arith.constant 0 : index
    %c0_13 = arith.constant 0 : index
    %17 = vector.load %arg5[%c0_12, %c0_13] : memref<16x128xf32, #tpu.memory_space<vmem>>, vector<16x128xf32>
    %18 = arith.addf %16, %17 : vector<16x128xf32>
    %c0_14 = arith.constant 0 : index
    %c0_15 = arith.constant 0 : index
    %19 = vector.load %arg6[%c0_14, %c0_15] : memref<16x128xf32, #tpu.memory_space<vmem>>, vector<16x128xf32>
    tpu.vector_store %arg6[%c0_14, %c0_15], %18 {strides = array<i32>} : memref<16x128xf32, #tpu.memory_space<vmem>>, vector<16x128xf32>,
    return
  }
}

module attributes {stable_mosaic.version = 11 : i64} {
  func.func @_decoder_stack_kernel(%arg0: i32, %arg1: i32, %arg2: memref<16x128xf32, #tpu.memory_space<vmem>>, %arg3: memref<16x128xf32, #tpu.memory_space<vmem>>, %arg4: memref<16x64xf32, #tpu.memory_space<vmem>>, %arg5: memref<16x64xf32, #tpu.memory_space<vmem>>, %arg6: memref<64x128xf32, #tpu.memory_space<vmem>>, %arg7: memref<64x128xf32, #tpu.memory_space<vmem>>, %arg8: memref<1x128x384xbf16, #tpu.memory_space<vmem>>, %arg9: memref<1x1x384xf32, #tpu.memory_space<vmem>>, %arg10: memref<1x128x128xbf16, #tpu.memory_space<vmem>>, %arg11: memref<1x1x128xf32, #tpu.memory_space<vmem>>, %arg12: memref<1x2x128xf32, #tpu.memory_space<vmem>>, %arg13: memref<1x128x128xbf16, #tpu.memory_space<vmem>>, %arg14: memref<1x1x128xf32, #tpu.memory_space<vmem>>, %arg15: memref<1x128x256xbf16, #tpu.memory_space<vmem>>, %arg16: memref<1x1x256xf32, #tpu.memory_space<vmem>>, %arg17: memref<1x128x128xbf16, #tpu.memory_space<vmem>>, %arg18: memref<1x1x128xf32, #tpu.memory_space<vmem>>, %arg19: memref<1x2x128xf32, #tpu.memory_space<vmem>>, %arg20: memref<1x128x128xbf16, #tpu.memory_space<vmem>>, %arg21: memref<1x1x128xf32, #tpu.memory_space<vmem>>, %arg22: memref<1x128x128xbf16, #tpu.memory_space<vmem>>, %arg23: memref<1x1x128xf32, #tpu.memory_space<vmem>>, %arg24: memref<1x2x128xf32, #tpu.memory_space<vmem>>, %arg25: memref<128x128xbf16, #tpu.memory_space<vmem>>, %arg26: memref<1x128xf32, #tpu.memory_space<vmem>>, %arg27: memref<16x128xf32, #tpu.memory_space<vmem>>, %arg28: memref<16x128xf32, #tpu.memory_space<vmem>>) attributes {dimension_semantics = [#tpu.dimension_semantics<parallel>, #tpu.dimension_semantics<arbitrary>], iteration_bounds = array<i64: 1, 4>, scalar_prefetch = 0 : i64, scratch_operands = 1 : i64, tpu.core_type = #tpu.core_type<tc>, window_params = [{transform_indices = @transform_0, window_bounds = array<i64: 16, 128>}, {transform_indices = @transform_1, window_bounds = array<i64: 16, 128>}, {pipeline_mode = #tpu.pipeline_mode<synchronous>, transform_indices = @transform_2, window_bounds = array<i64: 16, 64>}, {pipeline_mode = #tpu.pipeline_mode<synchronous>, transform_indices = @transform_3, window_bounds = array<i64: 16, 64>}, {pipeline_mode = #tpu.pipeline_mode<synchronous>, transform_indices = @transform_4, window_bounds = array<i64: 64, 128>}, {pipeline_mode = #tpu.pipeline_mode<synchronous>, transform_indices = @transform_5, window_bounds = array<i64: 64, 128>}, {transform_indices = @transform_6, window_bounds = array<i64: 1, 128, 384>}, {transform_indices = @transform_7, window_bounds = array<i64: 1, 1, 384>}, {transform_indices = @transform_8, window_bounds = array<i64: 1, 128, 128>}, {transform_indices = @transform_9, window_bounds = array<i64: 1, 1, 128>}, {transform_indices = @transform_10, window_bounds = array<i64: 1, 2, 128>}, {transform_indices = @transform_11, window_bounds = array<i64: 1, 128, 128>}, {transform_indices = @transform_12, window_bounds = array<i64: 1, 1, 128>}, {transform_indices = @transform_13, window_bounds = array<i64: 1, 128, 256>}, {transform_indices = @transform_14, window_bounds = array<i64: 1, 1, 256>}, {transform_indices = @transform_15, window_bounds = array<i64: 1, 128, 128>}, {transform_indices = @transform_16, window_bounds = array<i64: 1, 1, 128>}, {transform_indices = @transform_17, window_bounds = array<i64: 1, 2, 128>}, {transform_indices = @transform_18, window_bounds = array<i64: 1, 128, 128>}, {transform_indices = @transform_19, window_bounds = array<i64: 1, 1, 128>}, {transform_indices = @transform_20, window_bounds = array<i64: 1, 128, 128>}, {transform_indices = @transform_21, window_bounds = array<i64: 1, 1, 128>}, {transform_indices = @transform_22, window_bounds = array<i64: 1, 2, 128>}, {pipeline_mode = #tpu.pipeline_mode<synchronous>, transform_indices = @transform_23, window_bounds = array<i64: 128, 128>}, {pipeline_mode = #tpu.pipeline_mode<synchronous>, transform_indices = @transform_24, window_bounds = array<i64: 1, 128>}, {transform_indices = @transform_25, window_bounds = array<i64: 16, 128>}]} {
    %c0_i32 = arith.constant 0 : i32
    %0 = arith.cmpi eq, %arg1, %c0_i32 : i32
    %1 = arith.extui %0 : i1 to i32
    %c0_i32_0 = arith.constant 0 : i32
    %2 = arith.cmpi ne, %1, %c0_i32_0 : i32
    scf.if %2 {
      %c0_98 = arith.constant 0 : index
      %c0_99 = arith.constant 0 : index
      %203 = vector.load %arg2[%c0_98, %c0_99] : memref<16x128xf32, #tpu.memory_space<vmem>>, vector<16x128xf32>
      %c0_100 = arith.constant 0 : index
      %c0_101 = arith.constant 0 : index
      %204 = vector.load %arg28[%c0_100, %c0_101] : memref<16x128xf32, #tpu.memory_space<vmem>>, vector<16x128xf32>
      tpu.vector_store %arg28[%c0_100, %c0_101], %203 {strides = array<i32>} : memref<16x128xf32, #tpu.memory_space<vmem>>, vector<16x128xf32>,
    } else {
    }
    %c0 = arith.constant 0 : index
    %c0_1 = arith.constant 0 : index
    %3 = vector.load %arg28[%c0, %c0_1] : memref<16x128xf32, #tpu.memory_space<vmem>>, vector<16x128xf32>
    %c0_2 = arith.constant 0 : index
    %c0_3 = arith.constant 0 : index
    %4 = vector.load %arg3[%c0_2, %c0_3] : memref<16x128xf32, #tpu.memory_space<vmem>>, vector<16x128xf32>
    %c0_4 = arith.constant 0 : index
    %c0_5 = arith.constant 0 : index
    %c0_6 = arith.constant 0 : index
    %5 = vector.load %arg8[%c0_4, %c0_5, %c0_6] : memref<1x128x384xbf16, #tpu.memory_space<vmem>>, vector<1x128x384xbf16>
    %6 = vector.shape_cast %5 : vector<1x128x384xbf16> to vector<128x384xbf16>
    %c0_7 = arith.constant 0 : index
    %c0_8 = arith.constant 0 : index
    %c0_9 = arith.constant 0 : index
    %7 = vector.load %arg9[%c0_7, %c0_8, %c0_9] : memref<1x1x384xf32, #tpu.memory_space<vmem>>, vector<1x1x384xf32>
    %8 = vector.shape_cast %7 : vector<1x1x384xf32> to vector<1x384xf32>
    %9 = arith.truncf %3 : vector<16x128xf32> to vector<16x128xbf16>
    %cst = arith.constant dense<0.000000e+00> : vector<16x384xf32>
    %10 = tpu.matmul %9, %6, %cst {dimension_numbers = #tpu.dot_dimension_numbers<[1], [0], [0], [1], [0, 0, 1, 1], [], []>} : vector<16x128xbf16>, vector<128x384xbf16>, vector<16x384xf32> -> vector<16x384xf32>
    %11 = vector.broadcast %8 : vector<1x384xf32> to vector<16x384xf32>
    %12 = arith.addf %10, %11 : vector<16x384xf32>
    %13 = vector.extract_strided_slice %12 {offsets = [0, 0], sizes = [16, 128], strides = [1, 1]} : vector<16x384xf32> to vector<16x128xf32>
    %14 = vector.extract_strided_slice %12 {offsets = [0, 128], sizes = [16, 128], strides = [1, 1]} : vector<16x384xf32> to vector<16x128xf32>
    %15 = vector.extract_strided_slice %12 {offsets = [0, 256], sizes = [16, 128], strides = [1, 1]} : vector<16x384xf32> to vector<16x128xf32>
    %c0_10 = arith.constant 0 : index
    %c0_11 = arith.constant 0 : index
    %16 = vector.load %arg4[%c0_10, %c0_11] : memref<16x64xf32, #tpu.memory_space<vmem>>, vector<16x64xf32>
    %c0_12 = arith.constant 0 : index
    %c0_13 = arith.constant 0 : index
    %17 = vector.load %arg6[%c0_12, %c0_13] : memref<64x128xf32, #tpu.memory_space<vmem>>, vector<64x128xf32>
    %18 = tpu.concatenate %14, %14, %14, %14 in 0 : vector<16x128xf32>, vector<16x128xf32>, vector<16x128xf32>, vector<16x128xf32> -> vector<64x128xf32>
    %19 = arith.mulf %18, %17 : vector<64x128xf32>
    %20 = arith.truncf %19 : vector<64x128xf32> to vector<64x128xbf16>
    %21 = tpu.concatenate %15, %15, %15, %15 in 0 : vector<16x128xf32>, vector<16x128xf32>, vector<16x128xf32>, vector<16x128xf32> -> vector<64x128xf32>
    %22 = arith.mulf %21, %17 : vector<64x128xf32>
    %23 = arith.truncf %22 : vector<64x128xf32> to vector<64x128xbf16>
    %24 = arith.truncf %13 : vector<16x128xf32> to vector<16x128xbf16>
    %cst_14 = arith.constant dense<0.000000e+00> : vector<16x64xf32>
    %25 = tpu.matmul %24, %20, %cst_14 {dimension_numbers = #tpu.dot_dimension_numbers<[1], [1], [0], [0], [0, 0, 1, 0], [], []>} : vector<16x128xbf16>, vector<64x128xbf16>, vector<16x64xf32> -> vector<16x64xf32>
    %cst_15 = arith.constant 0.176776692 : f32
    %26 = vector.broadcast %cst_15 : f32 to vector<16x64xf32>
    %27 = arith.mulf %25, %26 : vector<16x64xf32>
    %28 = arith.addf %27, %16 : vector<16x64xf32>
    %cst_16 = arith.constant dense<0xFF800000> : vector<16xf32>
    %29 = vector.multi_reduction <maximumf>, %28, %cst_16 [1] : vector<16x64xf32> to vector<16xf32>
    %30 = vector.shape_cast %29 : vector<16xf32> to vector<16x1xf32>
    %31 = vector.broadcast %30 : vector<16x1xf32> to vector<16x64xf32>
    %32 = arith.subf %28, %31 : vector<16x64xf32>
    %33 = math.exp %32 : vector<16x64xf32>
    %34 = arith.truncf %33 : vector<16x64xf32> to vector<16x64xbf16>
    %35 = arith.truncf %17 : vector<64x128xf32> to vector<64x128xbf16>
    %36 = tpu.concatenate %23, %35 in 1 : vector<64x128xbf16>, vector<64x128xbf16> -> vector<64x256xbf16>
    %cst_17 = arith.constant dense<0.000000e+00> : vector<16x256xf32>
    %37 = tpu.matmul %34, %36, %cst_17 {dimension_numbers = #tpu.dot_dimension_numbers<[1], [0], [0], [1], [0, 0, 1, 1], [], []>} : vector<16x64xbf16>, vector<64x256xbf16>, vector<16x256xf32> -> vector<16x256xf32>
    %38 = vector.extract_strided_slice %37 {offsets = [0, 0], sizes = [16, 128], strides = [1, 1]} : vector<16x256xf32> to vector<16x128xf32>
    %39 = vector.extract_strided_slice %37 {offsets = [0, 128], sizes = [16, 128], strides = [1, 1]} : vector<16x256xf32> to vector<16x128xf32>
    %cst_18 = arith.constant 1.000000e-30 : f32
    %40 = vector.broadcast %cst_18 : f32 to vector<16x128xf32>
    %41 = arith.maximumf %39, %40 : vector<16x128xf32>
    %42 = tpu.reciprocal %41 {approx = true} : vector<16x128xf32> -> vector<16x128xf32>
    %43 = arith.mulf %38, %42 : vector<16x128xf32>
    %c0_19 = arith.constant 0 : index
    %c0_20 = arith.constant 0 : index
    %c0_21 = arith.constant 0 : index
    %44 = vector.load %arg10[%c0_19, %c0_20, %c0_21] : memref<1x128x128xbf16, #tpu.memory_space<vmem>>, vector<1x128x128xbf16>
    %45 = vector.shape_cast %44 : vector<1x128x128xbf16> to vector<128x128xbf16>
    %c0_22 = arith.constant 0 : index
    %c0_23 = arith.constant 0 : index
    %c0_24 = arith.constant 0 : index
    %46 = vector.load %arg11[%c0_22, %c0_23, %c0_24] : memref<1x1x128xf32, #tpu.memory_space<vmem>>, vector<1x1x128xf32>
    %47 = vector.shape_cast %46 : vector<1x1x128xf32> to vector<1x128xf32>
    %48 = arith.truncf %43 : vector<16x128xf32> to vector<16x128xbf16>
    %cst_25 = arith.constant dense<0.000000e+00> : vector<16x128xf32>
    %49 = tpu.matmul %48, %45, %cst_25 {dimension_numbers = #tpu.dot_dimension_numbers<[1], [0], [0], [1], [0, 0, 1, 1], [], []>} : vector<16x128xbf16>, vector<128x128xbf16>, vector<16x128xf32> -> vector<16x128xf32>
    %50 = vector.broadcast %47 : vector<1x128xf32> to vector<16x128xf32>
    %51 = arith.addf %49, %50 : vector<16x128xf32>
    %52 = arith.addf %3, %51 : vector<16x128xf32>
    %c0_26 = arith.constant 0 : index
    %c0_27 = arith.constant 0 : index
    %c0_28 = arith.constant 0 : index
    %53 = vector.load %arg12[%c0_26, %c0_27, %c0_28] : memref<1x2x128xf32, #tpu.memory_space<vmem>>, vector<1x2x128xf32>
    %54 = vector.shape_cast %53 : vector<1x2x128xf32> to vector<2x128xf32>
    %55 = vector.extract_strided_slice %54 {offsets = [0, 0], sizes = [1, 128], strides = [1, 1]} : vector<2x128xf32> to vector<1x128xf32>
    %56 = vector.extract_strided_slice %54 {offsets = [1, 0], sizes = [1, 128], strides = [1, 1]} : vector<2x128xf32> to vector<1x128xf32>
    %cst_29 = arith.constant dense<0.000000e+00> : vector<16xf32>
    %57 = vector.multi_reduction <add>, %52, %cst_29 [1] : vector<16x128xf32> to vector<16xf32>
    %58 = vector.shape_cast %57 : vector<16xf32> to vector<16x1xf32>
    %cst_30 = arith.constant 1.280000e+02 : f32
    %59 = vector.broadcast %cst_30 : f32 to vector<16x1xf32>
    %60 = arith.divf %58, %59 : vector<16x1xf32>
    %61 = vector.broadcast %60 : vector<16x1xf32> to vector<16x128xf32>
    %62 = arith.subf %52, %61 : vector<16x128xf32>
    %63 = arith.mulf %62, %62 : vector<16x128xf32>
    %cst_31 = arith.constant dense<0.000000e+00> : vector<16xf32>
    %64 = vector.multi_reduction <add>, %63, %cst_31 [1] : vector<16x128xf32> to vector<16xf32>
    %65 = vector.shape_cast %64 : vector<16xf32> to vector<16x1xf32>
    %cst_32 = arith.constant 1.280000e+02 : f32
    %66 = vector.broadcast %cst_32 : f32 to vector<16x1xf32>
    %67 = arith.divf %65, %66 : vector<16x1xf32>
    %cst_33 = arith.constant 9.99999974E-6 : f32
    %68 = vector.broadcast %cst_33 : f32 to vector<16x1xf32>
    %69 = arith.addf %67, %68 : vector<16x1xf32>
    %70 = math.rsqrt %69 : vector<16x1xf32>
    %71 = vector.broadcast %70 : vector<16x1xf32> to vector<16x128xf32>
    %72 = arith.mulf %62, %71 : vector<16x128xf32>
    %73 = vector.broadcast %55 : vector<1x128xf32> to vector<16x128xf32>
    %74 = arith.mulf %72, %73 : vector<16x128xf32>
    %75 = vector.broadcast %56 : vector<1x128xf32> to vector<16x128xf32>
    %76 = arith.addf %74, %75 : vector<16x128xf32>
    %c0_34 = arith.constant 0 : index
    %c0_35 = arith.constant 0 : index
    %c0_36 = arith.constant 0 : index
    %77 = vector.load %arg13[%c0_34, %c0_35, %c0_36] : memref<1x128x128xbf16, #tpu.memory_space<vmem>>, vector<1x128x128xbf16>
    %78 = vector.shape_cast %77 : vector<1x128x128xbf16> to vector<128x128xbf16>
    %c0_37 = arith.constant 0 : index
    %c0_38 = arith.constant 0 : index
    %c0_39 = arith.constant 0 : index
    %79 = vector.load %arg14[%c0_37, %c0_38, %c0_39] : memref<1x1x128xf32, #tpu.memory_space<vmem>>, vector<1x1x128xf32>
    %80 = vector.shape_cast %79 : vector<1x1x128xf32> to vector<1x128xf32>
    %81 = arith.truncf %76 : vector<16x128xf32> to vector<16x128xbf16>
    %cst_40 = arith.constant dense<0.000000e+00> : vector<16x128xf32>
    %82 = tpu.matmul %81, %78, %cst_40 {dimension_numbers = #tpu.dot_dimension_numbers<[1], [0], [0], [1], [0, 0, 1, 1], [], []>} : vector<16x128xbf16>, vector<128x128xbf16>, vector<16x128xf32> -> vector<16x128xf32>
    %83 = vector.broadcast %80 : vector<1x128xf32> to vector<16x128xf32>
    %84 = arith.addf %82, %83 : vector<16x128xf32>
    %c0_41 = arith.constant 0 : index
    %c0_42 = arith.constant 0 : index
    %c0_43 = arith.constant 0 : index
    %85 = vector.load %arg15[%c0_41, %c0_42, %c0_43] : memref<1x128x256xbf16, #tpu.memory_space<vmem>>, vector<1x128x256xbf16>
    %86 = vector.shape_cast %85 : vector<1x128x256xbf16> to vector<128x256xbf16>
    %c0_44 = arith.constant 0 : index
    %c0_45 = arith.constant 0 : index
    %c0_46 = arith.constant 0 : index
    %87 = vector.load %arg16[%c0_44, %c0_45, %c0_46] : memref<1x1x256xf32, #tpu.memory_space<vmem>>, vector<1x1x256xf32>
    %88 = vector.shape_cast %87 : vector<1x1x256xf32> to vector<1x256xf32>
    %89 = arith.truncf %4 : vector<16x128xf32> to vector<16x128xbf16>
    %cst_47 = arith.constant dense<0.000000e+00> : vector<16x256xf32>
    %90 = tpu.matmul %89, %86, %cst_47 {dimension_numbers = #tpu.dot_dimension_numbers<[1], [0], [0], [1], [0, 0, 1, 1], [], []>} : vector<16x128xbf16>, vector<128x256xbf16>, vector<16x256xf32> -> vector<16x256xf32>
    %91 = vector.broadcast %88 : vector<1x256xf32> to vector<16x256xf32>
    %92 = arith.addf %90, %91 : vector<16x256xf32>
    %93 = vector.extract_strided_slice %92 {offsets = [0, 0], sizes = [16, 128], strides = [1, 1]} : vector<16x256xf32> to vector<16x128xf32>
    %94 = vector.extract_strided_slice %92 {offsets = [0, 128], sizes = [16, 128], strides = [1, 1]} : vector<16x256xf32> to vector<16x128xf32>
    %c0_48 = arith.constant 0 : index
    %c0_49 = arith.constant 0 : index
    %95 = vector.load %arg5[%c0_48, %c0_49] : memref<16x64xf32, #tpu.memory_space<vmem>>, vector<16x64xf32>
    %c0_50 = arith.constant 0 : index
    %c0_51 = arith.constant 0 : index
    %96 = vector.load %arg7[%c0_50, %c0_51] : memref<64x128xf32, #tpu.memory_space<vmem>>, vector<64x128xf32>
    %97 = tpu.concatenate %93, %93, %93, %93 in 0 : vector<16x128xf32>, vector<16x128xf32>, vector<16x128xf32>, vector<16x128xf32> -> vector<64x128xf32>
    %98 = arith.mulf %97, %96 : vector<64x128xf32>
    %99 = arith.truncf %98 : vector<64x128xf32> to vector<64x128xbf16>
    %100 = tpu.concatenate %94, %94, %94, %94 in 0 : vector<16x128xf32>, vector<16x128xf32>, vector<16x128xf32>, vector<16x128xf32> -> vector<64x128xf32>
    %101 = arith.mulf %100, %96 : vector<64x128xf32>
    %102 = arith.truncf %101 : vector<64x128xf32> to vector<64x128xbf16>
    %103 = arith.truncf %84 : vector<16x128xf32> to vector<16x128xbf16>
    %cst_52 = arith.constant dense<0.000000e+00> : vector<16x64xf32>
    %104 = tpu.matmul %103, %99, %cst_52 {dimension_numbers = #tpu.dot_dimension_numbers<[1], [1], [0], [0], [0, 0, 1, 0], [], []>} : vector<16x128xbf16>, vector<64x128xbf16>, vector<16x64xf32> -> vector<16x64xf32>
    %cst_53 = arith.constant 0.176776692 : f32
    %105 = vector.broadcast %cst_53 : f32 to vector<16x64xf32>
    %106 = arith.mulf %104, %105 : vector<16x64xf32>
    %107 = arith.addf %106, %95 : vector<16x64xf32>
    %cst_54 = arith.constant dense<0xFF800000> : vector<16xf32>
    %108 = vector.multi_reduction <maximumf>, %107, %cst_54 [1] : vector<16x64xf32> to vector<16xf32>
    %109 = vector.shape_cast %108 : vector<16xf32> to vector<16x1xf32>
    %110 = vector.broadcast %109 : vector<16x1xf32> to vector<16x64xf32>
    %111 = arith.subf %107, %110 : vector<16x64xf32>
    %112 = math.exp %111 : vector<16x64xf32>
    %113 = arith.truncf %112 : vector<16x64xf32> to vector<16x64xbf16>
    %114 = arith.truncf %96 : vector<64x128xf32> to vector<64x128xbf16>
    %115 = tpu.concatenate %102, %114 in 1 : vector<64x128xbf16>, vector<64x128xbf16> -> vector<64x256xbf16>
    %cst_55 = arith.constant dense<0.000000e+00> : vector<16x256xf32>
    %116 = tpu.matmul %113, %115, %cst_55 {dimension_numbers = #tpu.dot_dimension_numbers<[1], [0], [0], [1], [0, 0, 1, 1], [], []>} : vector<16x64xbf16>, vector<64x256xbf16>, vector<16x256xf32> -> vector<16x256xf32>
    %117 = vector.extract_strided_slice %116 {offsets = [0, 0], sizes = [16, 128], strides = [1, 1]} : vector<16x256xf32> to vector<16x128xf32>
    %118 = vector.extract_strided_slice %116 {offsets = [0, 128], sizes = [16, 128], strides = [1, 1]} : vector<16x256xf32> to vector<16x128xf32>
    %cst_56 = arith.constant 1.000000e-30 : f32
    %119 = vector.broadcast %cst_56 : f32 to vector<16x128xf32>
    %120 = arith.maximumf %118, %119 : vector<16x128xf32>
    %121 = tpu.reciprocal %120 {approx = true} : vector<16x128xf32> -> vector<16x128xf32>
    %122 = arith.mulf %117, %121 : vector<16x128xf32>
    %c0_57 = arith.constant 0 : index
    %c0_58 = arith.constant 0 : index
    %c0_59 = arith.constant 0 : index
    %123 = vector.load %arg17[%c0_57, %c0_58, %c0_59] : memref<1x128x128xbf16, #tpu.memory_space<vmem>>, vector<1x128x128xbf16>
    %124 = vector.shape_cast %123 : vector<1x128x128xbf16> to vector<128x128xbf16>
    %c0_60 = arith.constant 0 : index
    %c0_61 = arith.constant 0 : index
    %c0_62 = arith.constant 0 : index
    %125 = vector.load %arg18[%c0_60, %c0_61, %c0_62] : memref<1x1x128xf32, #tpu.memory_space<vmem>>, vector<1x1x128xf32>
    %126 = vector.shape_cast %125 : vector<1x1x128xf32> to vector<1x128xf32>
    %127 = arith.truncf %122 : vector<16x128xf32> to vector<16x128xbf16>
    %cst_63 = arith.constant dense<0.000000e+00> : vector<16x128xf32>
    %128 = tpu.matmul %127, %124, %cst_63 {dimension_numbers = #tpu.dot_dimension_numbers<[1], [0], [0], [1], [0, 0, 1, 1], [], []>} : vector<16x128xbf16>, vector<128x128xbf16>, vector<16x128xf32> -> vector<16x128xf32>
    %129 = vector.broadcast %126 : vector<1x128xf32> to vector<16x128xf32>
    %130 = arith.addf %128, %129 : vector<16x128xf32>
    %131 = arith.addf %76, %130 : vector<16x128xf32>
    %c0_64 = arith.constant 0 : index
    %c0_65 = arith.constant 0 : index
    %c0_66 = arith.constant 0 : index
    %132 = vector.load %arg19[%c0_64, %c0_65, %c0_66] : memref<1x2x128xf32, #tpu.memory_space<vmem>>, vector<1x2x128xf32>
    %133 = vector.shape_cast %132 : vector<1x2x128xf32> to vector<2x128xf32>
    %134 = vector.extract_strided_slice %133 {offsets = [0, 0], sizes = [1, 128], strides = [1, 1]} : vector<2x128xf32> to vector<1x128xf32>
    %135 = vector.extract_strided_slice %133 {offsets = [1, 0], sizes = [1, 128], strides = [1, 1]} : vector<2x128xf32> to vector<1x128xf32>
    %cst_67 = arith.constant dense<0.000000e+00> : vector<16xf32>
    %136 = vector.multi_reduction <add>, %131, %cst_67 [1] : vector<16x128xf32> to vector<16xf32>
    %137 = vector.shape_cast %136 : vector<16xf32> to vector<16x1xf32>
    %cst_68 = arith.constant 1.280000e+02 : f32
    %138 = vector.broadcast %cst_68 : f32 to vector<16x1xf32>
    %139 = arith.divf %137, %138 : vector<16x1xf32>
    %140 = vector.broadcast %139 : vector<16x1xf32> to vector<16x128xf32>
    %141 = arith.subf %131, %140 : vector<16x128xf32>
    %142 = arith.mulf %141, %141 : vector<16x128xf32>
    %cst_69 = arith.constant dense<0.000000e+00> : vector<16xf32>
    %143 = vector.multi_reduction <add>, %142, %cst_69 [1] : vector<16x128xf32> to vector<16xf32>
    %144 = vector.shape_cast %143 : vector<16xf32> to vector<16x1xf32>
    %cst_70 = arith.constant 1.280000e+02 : f32
    %145 = vector.broadcast %cst_70 : f32 to vector<16x1xf32>
    %146 = arith.divf %144, %145 : vector<16x1xf32>
    %cst_71 = arith.constant 9.99999974E-6 : f32
    %147 = vector.broadcast %cst_71 : f32 to vector<16x1xf32>
    %148 = arith.addf %146, %147 : vector<16x1xf32>
    %149 = math.rsqrt %148 : vector<16x1xf32>
    %150 = vector.broadcast %149 : vector<16x1xf32> to vector<16x128xf32>
    %151 = arith.mulf %141, %150 : vector<16x128xf32>
    %152 = vector.broadcast %134 : vector<1x128xf32> to vector<16x128xf32>
    %153 = arith.mulf %151, %152 : vector<16x128xf32>
    %154 = vector.broadcast %135 : vector<1x128xf32> to vector<16x128xf32>
    %155 = arith.addf %153, %154 : vector<16x128xf32>
    %c0_72 = arith.constant 0 : index
    %c0_73 = arith.constant 0 : index
    %c0_74 = arith.constant 0 : index
    %156 = vector.load %arg20[%c0_72, %c0_73, %c0_74] : memref<1x128x128xbf16, #tpu.memory_space<vmem>>, vector<1x128x128xbf16>
    %157 = vector.shape_cast %156 : vector<1x128x128xbf16> to vector<128x128xbf16>
    %c0_75 = arith.constant 0 : index
    %c0_76 = arith.constant 0 : index
    %c0_77 = arith.constant 0 : index
    %158 = vector.load %arg21[%c0_75, %c0_76, %c0_77] : memref<1x1x128xf32, #tpu.memory_space<vmem>>, vector<1x1x128xf32>
    %159 = vector.shape_cast %158 : vector<1x1x128xf32> to vector<1x128xf32>
    %160 = arith.truncf %155 : vector<16x128xf32> to vector<16x128xbf16>
    %cst_78 = arith.constant dense<0.000000e+00> : vector<16x128xf32>
    %161 = tpu.matmul %160, %157, %cst_78 {dimension_numbers = #tpu.dot_dimension_numbers<[1], [0], [0], [1], [0, 0, 1, 1], [], []>} : vector<16x128xbf16>, vector<128x128xbf16>, vector<16x128xf32> -> vector<16x128xf32>
    %162 = vector.broadcast %159 : vector<1x128xf32> to vector<16x128xf32>
    %163 = arith.addf %161, %162 : vector<16x128xf32>
    %cst_79 = arith.constant 0.000000e+00 : f32
    %164 = vector.broadcast %cst_79 : f32 to vector<16x128xf32>
    %165 = arith.maximumf %163, %164 : vector<16x128xf32>
    %c0_80 = arith.constant 0 : index
    %c0_81 = arith.constant 0 : index
    %c0_82 = arith.constant 0 : index
    %166 = vector.load %arg22[%c0_80, %c0_81, %c0_82] : memref<1x128x128xbf16, #tpu.memory_space<vmem>>, vector<1x128x128xbf16>
    %167 = vector.shape_cast %166 : vector<1x128x128xbf16> to vector<128x128xbf16>
    %c0_83 = arith.constant 0 : index
    %c0_84 = arith.constant 0 : index
    %c0_85 = arith.constant 0 : index
    %168 = vector.load %arg23[%c0_83, %c0_84, %c0_85] : memref<1x1x128xf32, #tpu.memory_space<vmem>>, vector<1x1x128xf32>
    %169 = vector.shape_cast %168 : vector<1x1x128xf32> to vector<1x128xf32>
    %170 = arith.truncf %165 : vector<16x128xf32> to vector<16x128xbf16>
    %cst_86 = arith.constant dense<0.000000e+00> : vector<16x128xf32>
    %171 = tpu.matmul %170, %167, %cst_86 {dimension_numbers = #tpu.dot_dimension_numbers<[1], [0], [0], [1], [0, 0, 1, 1], [], []>} : vector<16x128xbf16>, vector<128x128xbf16>, vector<16x128xf32> -> vector<16x128xf32>
    %172 = vector.broadcast %169 : vector<1x128xf32> to vector<16x128xf32>
    %173 = arith.addf %171, %172 : vector<16x128xf32>
    %174 = arith.addf %155, %173 : vector<16x128xf32>
    %c0_87 = arith.constant 0 : index
    %c0_88 = arith.constant 0 : index
    %c0_89 = arith.constant 0 : index
    %175 = vector.load %arg24[%c0_87, %c0_88, %c0_89] : memref<1x2x128xf32, #tpu.memory_space<vmem>>, vector<1x2x128xf32>
    %176 = vector.shape_cast %175 : vector<1x2x128xf32> to vector<2x128xf32>
    %177 = vector.extract_strided_slice %176 {offsets = [0, 0], sizes = [1, 128], strides = [1, 1]} : vector<2x128xf32> to vector<1x128xf32>
    %178 = vector.extract_strided_slice %176 {offsets = [1, 0], sizes = [1, 128], strides = [1, 1]} : vector<2x128xf32> to vector<1x128xf32>
    %cst_90 = arith.constant dense<0.000000e+00> : vector<16xf32>
    %179 = vector.multi_reduction <add>, %174, %cst_90 [1] : vector<16x128xf32> to vector<16xf32>
    %180 = vector.shape_cast %179 : vector<16xf32> to vector<16x1xf32>
    %cst_91 = arith.constant 1.280000e+02 : f32
    %181 = vector.broadcast %cst_91 : f32 to vector<16x1xf32>
    %182 = arith.divf %180, %181 : vector<16x1xf32>
    %183 = vector.broadcast %182 : vector<16x1xf32> to vector<16x128xf32>
    %184 = arith.subf %174, %183 : vector<16x128xf32>
    %185 = arith.mulf %184, %184 : vector<16x128xf32>
    %cst_92 = arith.constant dense<0.000000e+00> : vector<16xf32>
    %186 = vector.multi_reduction <add>, %185, %cst_92 [1] : vector<16x128xf32> to vector<16xf32>
    %187 = vector.shape_cast %186 : vector<16xf32> to vector<16x1xf32>
    %cst_93 = arith.constant 1.280000e+02 : f32
    %188 = vector.broadcast %cst_93 : f32 to vector<16x1xf32>
    %189 = arith.divf %187, %188 : vector<16x1xf32>
    %cst_94 = arith.constant 9.99999974E-6 : f32
    %190 = vector.broadcast %cst_94 : f32 to vector<16x1xf32>
    %191 = arith.addf %189, %190 : vector<16x1xf32>
    %192 = math.rsqrt %191 : vector<16x1xf32>
    %193 = vector.broadcast %192 : vector<16x1xf32> to vector<16x128xf32>
    %194 = arith.mulf %184, %193 : vector<16x128xf32>
    %195 = vector.broadcast %177 : vector<1x128xf32> to vector<16x128xf32>
    %196 = arith.mulf %194, %195 : vector<16x128xf32>
    %197 = vector.broadcast %178 : vector<1x128xf32> to vector<16x128xf32>
    %198 = arith.addf %196, %197 : vector<16x128xf32>
    %c0_95 = arith.constant 0 : index
    %c0_96 = arith.constant 0 : index
    %199 = vector.load %arg28[%c0_95, %c0_96] : memref<16x128xf32, #tpu.memory_space<vmem>>, vector<16x128xf32>
    tpu.vector_store %arg28[%c0_95, %c0_96], %198 {strides = array<i32>} : memref<16x128xf32, #tpu.memory_space<vmem>>, vector<16x128xf32>,
    %c3_i32 = arith.constant 3 : i32
    %200 = arith.cmpi eq, %arg1, %c3_i32 : i32
    %201 = arith.extui %200 : i1 to i32
    %c0_i32_97 = arith.constant 0 : i32
    %202 = arith.cmpi ne, %201, %c0_i32_97 : i32
    scf.if %202 {
      %c0_98 = arith.constant 0 : index
      %c0_99 = arith.constant 0 : index
      %203 = vector.load %arg25[%c0_98, %c0_99] : memref<128x128xbf16, #tpu.memory_space<vmem>>, vector<128x128xbf16>
      %c0_100 = arith.constant 0 : index
      %c0_101 = arith.constant 0 : index
      %204 = vector.load %arg26[%c0_100, %c0_101] : memref<1x128xf32, #tpu.memory_space<vmem>>, vector<1x128xf32>
      %205 = arith.truncf %198 : vector<16x128xf32> to vector<16x128xbf16>
      %cst_102 = arith.constant dense<0.000000e+00> : vector<16x128xf32>
      %206 = tpu.matmul %205, %203, %cst_102 {dimension_numbers = #tpu.dot_dimension_numbers<[1], [0], [0], [1], [0, 0, 1, 1], [], []>} : vector<16x128xbf16>, vector<128x128xbf16>, vector<16x128xf32> -> vector<16x128xf32>
      %207 = vector.broadcast %204 : vector<1x128xf32> to vector<16x128xf32>
      %208 = arith.addf %206, %207 : vector<16x128xf32>
      %c0_103 = arith.constant 0 : index
      %c0_104 = arith.constant 0 : index
      %209 = vector.load %arg27[%c0_103, %c0_104] : memref<16x128xf32, #tpu.memory_space<vmem>>, vector<16x128xf32>
      tpu.vector_store %arg27[%c0_103, %c0_104], %208 {strides = array<i32>} : memref<16x128xf32, #tpu.memory_space<vmem>>, vector<16x128xf32>,
    } else {
    }
    return
  }
  func.func @transform_0(%arg0: i32, %arg1: i32) -> (i32, i32) {
    %c0_i32 = arith.constant 0 : i32
    %c0_i32_0 = arith.constant 0 : i32
    return %arg0, %c0_i32 : i32, i32
  }
  func.func @transform_1(%arg0: i32, %arg1: i32) -> (i32, i32) {
    %c0_i32 = arith.constant 0 : i32
    %c0_i32_0 = arith.constant 0 : i32
    return %arg0, %c0_i32 : i32, i32
  }
  func.func @transform_2(%arg0: i32, %arg1: i32) -> (i32, i32) {
    %c0_i32 = arith.constant 0 : i32
    %c0_i32_0 = arith.constant 0 : i32
    %c0_i32_1 = arith.constant 0 : i32
    return %c0_i32, %c0_i32_0 : i32, i32
  }
  func.func @transform_3(%arg0: i32, %arg1: i32) -> (i32, i32) {
    %c0_i32 = arith.constant 0 : i32
    %c0_i32_0 = arith.constant 0 : i32
    %c0_i32_1 = arith.constant 0 : i32
    return %c0_i32, %c0_i32_0 : i32, i32
  }
  func.func @transform_4(%arg0: i32, %arg1: i32) -> (i32, i32) {
    %c0_i32 = arith.constant 0 : i32
    %c0_i32_0 = arith.constant 0 : i32
    %c0_i32_1 = arith.constant 0 : i32
    return %c0_i32, %c0_i32_0 : i32, i32
  }
  func.func @transform_5(%arg0: i32, %arg1: i32) -> (i32, i32) {
    %c0_i32 = arith.constant 0 : i32
    %c0_i32_0 = arith.constant 0 : i32
    %c0_i32_1 = arith.constant 0 : i32
    return %c0_i32, %c0_i32_0 : i32, i32
  }
  func.func @transform_6(%arg0: i32, %arg1: i32) -> (i32, i32, i32) {
    %c0_i32 = arith.constant 0 : i32
    %c0_i32_0 = arith.constant 0 : i32
    %c0_i32_1 = arith.constant 0 : i32
    return %arg1, %c0_i32, %c0_i32_0 : i32, i32, i32
  }
  func.func @transform_7(%arg0: i32, %arg1: i32) -> (i32, i32, i32) {
    %c0_i32 = arith.constant 0 : i32
    %c0_i32_0 = arith.constant 0 : i32
    %c0_i32_1 = arith.constant 0 : i32
    return %arg1, %c0_i32, %c0_i32_0 : i32, i32, i32
  }
  func.func @transform_8(%arg0: i32, %arg1: i32) -> (i32, i32, i32) {
    %c0_i32 = arith.constant 0 : i32
    %c0_i32_0 = arith.constant 0 : i32
    %c0_i32_1 = arith.constant 0 : i32
    return %arg1, %c0_i32, %c0_i32_0 : i32, i32, i32
  }
  func.func @transform_9(%arg0: i32, %arg1: i32) -> (i32, i32, i32) {
    %c0_i32 = arith.constant 0 : i32
    %c0_i32_0 = arith.constant 0 : i32
    %c0_i32_1 = arith.constant 0 : i32
    return %arg1, %c0_i32, %c0_i32_0 : i32, i32, i32
  }
  func.func @transform_10(%arg0: i32, %arg1: i32) -> (i32, i32, i32) {
    %c0_i32 = arith.constant 0 : i32
    %c0_i32_0 = arith.constant 0 : i32
    %c0_i32_1 = arith.constant 0 : i32
    return %arg1, %c0_i32, %c0_i32_0 : i32, i32, i32
  }
  func.func @transform_11(%arg0: i32, %arg1: i32) -> (i32, i32, i32) {
    %c0_i32 = arith.constant 0 : i32
    %c0_i32_0 = arith.constant 0 : i32
    %c0_i32_1 = arith.constant 0 : i32
    return %arg1, %c0_i32, %c0_i32_0 : i32, i32, i32
  }
  func.func @transform_12(%arg0: i32, %arg1: i32) -> (i32, i32, i32) {
    %c0_i32 = arith.constant 0 : i32
    %c0_i32_0 = arith.constant 0 : i32
    %c0_i32_1 = arith.constant 0 : i32
    return %arg1, %c0_i32, %c0_i32_0 : i32, i32, i32
  }
  func.func @transform_13(%arg0: i32, %arg1: i32) -> (i32, i32, i32) {
    %c0_i32 = arith.constant 0 : i32
    %c0_i32_0 = arith.constant 0 : i32
    %c0_i32_1 = arith.constant 0 : i32
    return %arg1, %c0_i32, %c0_i32_0 : i32, i32, i32
  }
  func.func @transform_14(%arg0: i32, %arg1: i32) -> (i32, i32, i32) {
    %c0_i32 = arith.constant 0 : i32
    %c0_i32_0 = arith.constant 0 : i32
    %c0_i32_1 = arith.constant 0 : i32
    return %arg1, %c0_i32, %c0_i32_0 : i32, i32, i32
  }
  func.func @transform_15(%arg0: i32, %arg1: i32) -> (i32, i32, i32) {
    %c0_i32 = arith.constant 0 : i32
    %c0_i32_0 = arith.constant 0 : i32
    %c0_i32_1 = arith.constant 0 : i32
    return %arg1, %c0_i32, %c0_i32_0 : i32, i32, i32
  }
  func.func @transform_16(%arg0: i32, %arg1: i32) -> (i32, i32, i32) {
    %c0_i32 = arith.constant 0 : i32
    %c0_i32_0 = arith.constant 0 : i32
    %c0_i32_1 = arith.constant 0 : i32
    return %arg1, %c0_i32, %c0_i32_0 : i32, i32, i32
  }
  func.func @transform_17(%arg0: i32, %arg1: i32) -> (i32, i32, i32) {
    %c0_i32 = arith.constant 0 : i32
    %c0_i32_0 = arith.constant 0 : i32
    %c0_i32_1 = arith.constant 0 : i32
    return %arg1, %c0_i32, %c0_i32_0 : i32, i32, i32
  }
  func.func @transform_18(%arg0: i32, %arg1: i32) -> (i32, i32, i32) {
    %c0_i32 = arith.constant 0 : i32
    %c0_i32_0 = arith.constant 0 : i32
    %c0_i32_1 = arith.constant 0 : i32
    return %arg1, %c0_i32, %c0_i32_0 : i32, i32, i32
  }
  func.func @transform_19(%arg0: i32, %arg1: i32) -> (i32, i32, i32) {
    %c0_i32 = arith.constant 0 : i32
    %c0_i32_0 = arith.constant 0 : i32
    %c0_i32_1 = arith.constant 0 : i32
    return %arg1, %c0_i32, %c0_i32_0 : i32, i32, i32
  }
  func.func @transform_20(%arg0: i32, %arg1: i32) -> (i32, i32, i32) {
    %c0_i32 = arith.constant 0 : i32
    %c0_i32_0 = arith.constant 0 : i32
    %c0_i32_1 = arith.constant 0 : i32
    return %arg1, %c0_i32, %c0_i32_0 : i32, i32, i32
  }
  func.func @transform_21(%arg0: i32, %arg1: i32) -> (i32, i32, i32) {
    %c0_i32 = arith.constant 0 : i32
    %c0_i32_0 = arith.constant 0 : i32
    %c0_i32_1 = arith.constant 0 : i32
    return %arg1, %c0_i32, %c0_i32_0 : i32, i32, i32
  }
  func.func @transform_22(%arg0: i32, %arg1: i32) -> (i32, i32, i32) {
    %c0_i32 = arith.constant 0 : i32
    %c0_i32_0 = arith.constant 0 : i32
    %c0_i32_1 = arith.constant 0 : i32
    return %arg1, %c0_i32, %c0_i32_0 : i32, i32, i32
  }
  func.func @transform_23(%arg0: i32, %arg1: i32) -> (i32, i32) {
    %c0_i32 = arith.constant 0 : i32
    %c0_i32_0 = arith.constant 0 : i32
    %c0_i32_1 = arith.constant 0 : i32
    return %c0_i32, %c0_i32_0 : i32, i32
  }
  func.func @transform_24(%arg0: i32, %arg1: i32) -> (i32, i32) {
    %c0_i32 = arith.constant 0 : i32
    %c0_i32_0 = arith.constant 0 : i32
    %c0_i32_1 = arith.constant 0 : i32
    return %c0_i32, %c0_i32_0 : i32, i32
  }
  func.func @transform_25(%arg0: i32, %arg1: i32) -> (i32, i32) {
    %c0_i32 = arith.constant 0 : i32
    %c0_i32_0 = arith.constant 0 : i32
    return %arg0, %c0_i32 : i32, i32
  }
}

</mosaic_0001>

<bundles_post_ra>
// kernel: forward.2
= control target key start
LH: loop header
LB: loop body
LE: loop exit
PB: predicated region body
PF: predicated region fallthrough
CT: control target
= control target key end

     0   :  { %11 = vsyncpa [#allocation3], 0  ;;  %s489_s0 = inlined_call_operand.vmem [shape: f32[16,64], index: 0, kind: input, shape index: {}]   ;;  %s490_s1 = inlined_call_operand.hbm [shape: bf16[64,64], index: 1, kind: input, shape index: {}]   ;;  %s491_s2 = inlined_call_operand.vmem [shape: f32[1,64], index: 2, kind: input, shape index: {}]   ;;  %s492_s3 = inlined_call_operand.hbm [shape: bf16[64,128], index: 3, kind: input, shape index: {}]   ;;  %s493_s4 = inlined_call_operand.hbm [shape: f32[1,128], index: 4, kind: input, shape index: {}]   ;;  %s494_s5 = inlined_call_operand.vmem [shape: f32[16,128], index: 5, kind: input, shape index: {}]   ;;  %s495_s6 = inlined_call_operand.vmem [shape: f32[16,128], index: 6, kind: output, shape index: {}]  }
   0x1   :  { %12 = vsyncpa [#allocation5], 0  ;;  %s381_s21 = smov [#allocation4]   ;;  %s382_s23 = smov [#allocation2]  }
   0x2   :  { %s34_s22 = sshll.u32 %s381_s21, 4  ;;  %s20_s24 = sshll.u32 %s382_s23, 4  ;;  %s35_s22 = int_to_ptr.vmem [resolvable:$true] %s34_s22  ;;  %s423_s24 = int_to_ptr.vmem [resolvable:$true] %s20_s24 }
   0x3   :  { %s311_s27 = scalar_lea.hbm %s492_s3, 512 }
   0x4   :  { %p312_p0 = scmp.ne.s32.totalorder %s492_s3, %s311_s27  ;;  %p315_p1 = scmp.lt.u32.totalorder %s311_s27, %s492_s3 }
   0x6   :  { %p317_p2 = pnand %p315_p1, %p312_p0 }
   0x8   :  { %320 = shalt.err (!%p317_p2)
}
   0x9   :  { %s321_s8 = scalar_lea.vmem %s35_s22, 512  ;;  %p326_p4 = scmp.lt.s32.totalorder %s35_s22, %s35_s22 }
   0xa   :  { %p322_p3 = scmp.ne.s32.totalorder %s35_s22, %s321_s8  ;;  %p327_p5 = scmp.lt.s32.totalorder %s321_s8, %s321_s8 }
   0xc   :  { %p328_p6 = por %p327_p5, %p326_p4 }
   0xe   :  { %p329_p7 = pnand %p328_p6, %p322_p3 }
  0x10   :  { %332 = shalt.err (!%p329_p7)
}
  0x11   :  { %s383_s9 = smov 64   ;;  %s384_s10 = smov 4  }
  0x12   :  { %40 = dma.hbm_to_vmem [thread:$0]  %s492_s3, 512, %s35_s22, [#allocation5], %s383_s9, %s383_s9, %s384_s10  }
  0x13   :  { %s333_s15 = scalar_lea.hbm %s490_s1, 512 }
  0x14   :  { %p334_p8 = scmp.ne.s32.totalorder %s490_s1, %s333_s15  ;;  %p337_p9 = scmp.lt.u32.totalorder %s333_s15, %s490_s1 }
  0x16   :  { %p339_p10 = pnand %p337_p9, %p334_p8 }
  0x18   :  { %342 = shalt.err (!%p339_p10)
}
  0x19   :  { %s343_s20 = scalar_lea.vmem %s423_s24, 512  ;;  %p348_p12 = scmp.lt.s32.totalorder %s423_s24, %s423_s24 }
  0x1a   :  { %p344_p11 = scmp.ne.s32.totalorder %s423_s24, %s343_s20  ;;  %p349_p13 = scmp.lt.s32.totalorder %s343_s20, %s343_s20 }
  0x1c   :  { %p350_p0 = por %p349_p13, %p348_p12 }
  0x1e   :  { %p351_p1 = pnand %p350_p0, %p344_p11 }
  0x20   :  { %354 = shalt.err (!%p351_p1)
}
  0x21   :  { %26 = dma.hbm_to_vmem [thread:$0]  %s490_s1, 512, %s423_s24, [#allocation3], %s383_s9, %s383_s9, %s384_s10  }
  0x22   :  { %s385_s22 = smov [#allocation6]   ;;  %s355_s27 = scalar_lea.hbm %s493_s4, 16 }
  0x23   :  { %s47_s23 = sshll.u32 %s385_s22, 4  ;;  %p356_p2 = scmp.ne.s32.totalorder %s493_s4, %s355_s27  ;;  %s48_s23 = int_to_ptr.vmem [resolvable:$true] %s47_s23 }
  0x24   :  { %p359_p3 = scmp.lt.u32.totalorder %s355_s27, %s493_s4 }
  0x26   :  { %p361_p4 = pnand %p359_p3, %p356_p2 }
  0x28   :  { %364 = shalt.err (!%p361_p4)
}
  0x29   :  { %s365_s8 = scalar_lea.vmem %s48_s23, 16  ;;  %s369_s1 = scalar_lea.vmem %s48_s23, 32 }
  0x2a   :  { %p366_p5 = scmp.ne.s32.totalorder %s48_s23, %s365_s8  ;;  %p370_p6 = scmp.lt.s32.totalorder %s48_s23, %s48_s23 }
  0x2b   :  { %p371_p7 = scmp.lt.s32.totalorder %s369_s1, %s365_s8 }
  0x2d   :  { %p372_p8 = por %p371_p7, %p370_p6 }
  0x2f   :  { %p373_p9 = pnand %p372_p8, %p366_p5 }
  0x31   :  { %376 = shalt.err (!%p373_p9)
}
  0x32   :  { %50 = dma.hbm_to_vmem [thread:$0]  %s493_s4, 16, %s48_s23, [#allocation5]  }
  0x33   :  { %377 = dma.done.wait [#allocation3], 512  }
  0x34   :  { %378 = vsyncadd [#allocation3], 4294966784 }
  0x35   :  { %379 = dma.done.wait [#allocation5], 528  }
  0x36   :  { %380 = vsyncadd [#allocation5], 4294966768  ;;  %v386_v0 = vmov 0.0   ;;  %vm387_vm0 = vmmov 0   ;;  %v303_v1 = vld [vmem:[#allocation2] sm:$0xff]   ;;  %v304_v2 = vld [vmem:[#allocation2 + $0x8] sm:$0xff]  }
  0x37   :  { %272 = vmatprep.subr.bf16.mxu0 %v386_v0  ;;  %280 = vmatprep.mubr.msk.bf16.mxu0 %vm387_vm0, %v386_v0  ;;  %v307_v3 = vld [vmem:[#allocation4] sm:$0xff]   ;;  %v305_v4 = vld [vmem:[#allocation2 + $0x10] sm:$0xff]   ;;  %v308_v5 = vld [vmem:[#allocation4 + $0x8] sm:$0xff]   ;;  %vm105_vm1 = vcmask 523264  }
  0x38   :  { %284 = vmatprep.subr.bf16.mxu1 %v386_v0  ;;  %292 = vmatprep.mubr.msk.bf16.mxu1 %vm387_vm0, %v386_v0  ;;  %v306_v6 = vld [vmem:[#allocation2 + $0x18] sm:$0xff]   ;;  %v63_v7 = vld [vmem:[%s489_s0] sm:$0xff]  ;;  %v64_v8 = vld [vmem:[%s489_s0 + $0x8] sm:$0xff] }
  0x39   :  { %273 = vmatpush3.bf16.msra.mxu0 %v303_v1  ;;  %285 = vmatpush3.bf16.msra.mxu1 %v307_v3  ;;  %v74_v9 = vpack.c.bf16 %v64_v8, %v63_v7  ;;  %v309_v10 = vld [vmem:[#allocation4 + $0x10] sm:$0xff]   ;;  %v310_v11 = vld [vmem:[#allocation4 + $0x18] sm:$0xff]   ;;  %v250_v12 = vld [vmem:[%s491_s2] ss:$0 sm:$0xff] }
  0x3a   :  { %274 = vmatprep.subr.bf16.mxu0 %v386_v0  ;;  %286 = vmatprep.subr.bf16.mxu1 %v386_v0  ;;  %v256_v22 = vld [vmem:[#allocation6] ss:$0 sm:$0xff]  ;;  %v239_v31 = vld [vmem:[%s494_s5 + $0x8] sm:$0xff] }
  0x3b   :  { %v238_v26 = vld [vmem:[%s494_s5] sm:$0xff] }
  0x3d   :  { %275 = vmatpush3.bf16.msra.mxu0 %v304_v2  ;;  %287 = vmatpush3.bf16.msra.mxu1 %v308_v5 }
  0x3e   :  { %276 = vmatprep.subr.bf16.mxu0 %v386_v0  ;;  %288 = vmatprep.subr.bf16.mxu1 %v386_v0 }
  0x41   :  { %277 = vmatpush3.bf16.msra.mxu0 %v305_v4  ;;  %289 = vmatpush3.bf16.msra.mxu1 %v309_v10 }
  0x42   :  { %278 = vmatprep.subr.bf16.mxu0 %v386_v0  ;;  %290 = vmatprep.subr.bf16.mxu1 %v386_v0 }
  0x45   :  { %279 = vmatpush3.bf16.msra.mxu0 %v306_v6  ;;  %291 = vmatpush3.bf16.msra.mxu1 %v310_v11 }
  0x48   :  { %281 = vmatmul.mubr.msk.bf16.vlgmr.msra.gmra.mrb[0].mxu0 %vm105_vm1, %v74_v9 }
 0x11b   :  { %v143_v13 = vpop.f32.mrb[0].mxu0 }
 0x11c   :  { %v144_v14 = vadd.f32 %v250_v12, %v143_v13  ;;  %v282_v15 = vpop.f32.mrb[1].mxu0 }
 0x11d   :  { %v146_v16 = vpop.f32.mrb[2].mxu0 }
 0x11e   :  { %v147_v17 = vadd.f32 %v250_v12, %v146_v16  ;;  %v283_v18 = vpop.f32.mrb[3].mxu0  ;;  %v150_v19 = vmax.f32 %v144_v14, 0.0 }
 0x120   :  { %v151_v20 = vmax.f32 %v147_v17, 0.0 }
 0x122   :  { %v161_v21 = vpack.c.bf16 %v151_v20, %v150_v19 }
 0x124   :  { %293 = vmatmul.mubr.msk.bf16.vlgmr.msra.gmra.mrb[0].mxu1 %vm105_vm1, %v161_v21 }
 0x1f7   :  { %v229_v23 = vpop.f32.mrb[0].mxu1 }
 0x1f8   :  { %v230_v24 = vadd.f32 %v256_v22, %v229_v23  ;;  %v294_v25 = vpop.f32.mrb[1].mxu1 }
 0x1f9   :  { %v232_v27 = vpop.f32.mrb[2].mxu1 }
 0x1fa   :  { %v236_v28 = vmul.f32 11.313708, %v230_v24  ;;  %v233_v29 = vadd.f32 %v256_v22, %v232_v27  ;;  %v295_v30 = vpop.f32.mrb[3].mxu1 }
 0x1fc   :  { %v240_v32 = vadd.f32 %v238_v26, %v236_v28  ;;  %v237_v33 = vmul.f32 11.313708, %v233_v29 }
 0x1fe   :  { %242 = vst [vmem:[%s495_s6] sm:$0xff] %v240_v32  ;;  %v241_v34 = vadd.f32 %v239_v31, %v237_v33 }
 0x200   :  { %243 = vst [vmem:[%s495_s6 + $0x8] sm:$0xff] %v241_v34 }
 0x201   :  { %248 = vsyncpa [#allocation3], 1 }
 0x202   :  { %249 = vsyncpa [#allocation5], 1 }

// kernel: forward.3
= control target key start
LH: loop header
LB: loop body
LE: loop exit
PB: predicated region body
PF: predicated region fallthrough
CT: control target
= control target key end

     0   :  { %s5734_s0 = inlined_call_operand.vmem [shape: f32[16,128], index: 0, kind: input, shape index: {}]   ;;  %s5735_s1 = inlined_call_operand.vmem [shape: f32[16,128], index: 1, kind: input, shape index: {}]   ;;  %s5736_s2 = inlined_call_operand.vmem [shape: f32[16,64], index: 2, kind: input, shape index: {}]   ;;  %s5737_s3 = inlined_call_operand.hbm [shape: f32[16,64], index: 3, kind: input, shape index: {}]   ;;  %s5738_s4 = inlined_call_operand.vmem [shape: f32[64,128], index: 4, kind: input, shape index: {}, may-alias: {4,5}]   ;;  %s5739_s5 = inlined_call_operand.vmem [shape: f32[64,128], index: 5, kind: input, shape index: {}, may-alias: {4,5}]   ;;  %s5740_s6 = inlined_call_operand.vmem [shape: bf16[4,128,384], index: 6, kind: input, shape index: {}]   ;;  %s5741_s7 = inlined_call_operand.hbm [shape: f32[4,1,384], index: 7, kind: input, shape index: {}]   ;;  %s5742_s8 = inlined_call_operand.hbm [shape: bf16[4,128,128], index: 8, kind: input, shape index: {}]   ;;  %s5743_s9 = inlined_call_operand.hbm [shape: f32[4,1,128], index: 9, kind: input, shape index: {}]   ;;  %s5744_s10 = inlined_call_operand.hbm [shape: f32[4,2,128], index: 10, kind: input, shape index: {}]   ;;  %s5745_s11 = inlined_call_operand.vmem [shape: bf16[4,128,128], index: 11, kind: input, shape index: {}]   ;;  %s5746_s12 = inlined_call_operand.hbm [shape: f32[4,1,128], index: 12, kind: input, shape index: {}]   ;;  %s5747_s13 = inlined_call_operand.vmem [shape: bf16[4,128,256], index: 13, kind: input, shape index: {}]   ;;  %s5748_s14 = inlined_call_operand.hbm [shape: f32[4,1,256], index: 14, kind: input, shape index: {}]   ;;  %s5749_s15 = inlined_call_operand.hbm [shape: bf16[4,128,128], index: 15, kind: input, shape index: {}]   ;;  %s5750_s16 = inlined_call_operand.hbm [shape: f32[4,1,128], index: 16, kind: input, shape index: {}]   ;;  %s5751_s17 = inlined_call_operand.hbm [shape: f32[4,2,128], index: 17, kind: input, shape index: {}]   ;;  %s5752_s18 = inlined_call_operand.hbm [shape: bf16[4,128,128], index: 18, kind: input, shape index: {}]   ;;  %s5753_s19 = inlined_call_operand.hbm [shape: f32[4,1,128], index: 19, kind: input, shape index: {}]   ;;  %s5754_s20 = inlined_call_operand.hbm [shape: bf16[4,128,128], index: 20, kind: input, shape index: {}]   ;;  %s5755_s21 = inlined_call_operand.hbm [shape: f32[4,1,128], index: 21, kind: input, shape index: {}]   ;;  %s5756_s22 = inlined_call_operand.hbm [shape: f32[4,2,128], index: 22, kind: input, shape index: {}]   ;;  %s5757_s23 = inlined_call_operand.hbm [shape: bf16[128,128], index: 23, kind: input, shape index: {}]   ;;  %s5758_s24 = inlined_call_operand.hbm [shape: f32[1,128], index: 24, kind: input, shape index: {}]   ;;  %s5759_s25 = inlined_call_operand.vmem [shape: f32[16,128], index: 25, kind: output, shape index: {}]  }
   0x1   :  { %5802 = sst [smem:[#allocation46_spill]] %s5734_s0 }
   0x2   :  { %5803 = sst [smem:[#allocation47_spill]] %s5735_s1 }
   0x3   :  { %5804 = sst [smem:[#allocation48_spill]] %s5736_s2 }
   0x4   :  { %5805 = sst [smem:[#allocation49_spill]] %s5737_s3 }
   0x5   :  { %5806 = sst [smem:[#allocation50_spill]] %s5738_s4 }
   0x6   :  { %5807 = sst [smem:[#allocation51_spill]] %s5739_s5 }
   0x7   :  { %5808 = sst [smem:[#allocation52_spill]] %s5740_s6 }
   0x8   :  { %5809 = sst [smem:[#allocation53_spill]] %s5741_s7 }
   0x9   :  { %5810 = sst [smem:[#allocation54_spill]] %s5742_s8 }
   0xa   :  { %5811 = sst [smem:[#allocation55_spill]] %s5743_s9 }
   0xb   :  { %5812 = sst [smem:[#allocation56_spill]] %s5744_s10 }
   0xc   :  { %5813 = sst [smem:[#allocation57_spill]] %s5745_s11 }
   0xd   :  { %5814 = sst [smem:[#allocation58_spill]] %s5746_s12 }
   0xe   :  { %5815 = sst [smem:[#allocation59_spill]] %s5747_s13 }
   0xf   :  { %5816 = sst [smem:[#allocation60_spill]] %s5748_s14 }
  0x10   :  { %5817 = sst [smem:[#allocation61_spill]] %s5749_s15 }
  0x11   :  { %5818 = sst [smem:[#allocation62_spill]] %s5750_s16 }
  0x12   :  { %5819 = sst [smem:[#allocation63_spill]] %s5751_s17 }
  0x13   :  { %5820 = sst [smem:[#allocation64_spill]] %s5753_s19 }
  0x14   :  { %5821 = sst [smem:[#allocation65_spill]] %s5754_s20 }
  0x15   :  { %5822 = sst [smem:[#allocation66_spill]] %s5755_s21 }
  0x16   :  { %5823 = sst [smem:[#allocation67_spill]] %s5756_s22 }
  0x17   :  { %5824 = sst [smem:[#allocation68_spill]] %s5757_s23 }
  0x18   :  { %5825 = sst [smem:[#allocation69_spill]] %s5758_s24 }
  0x19   :  { %5826 = sst [smem:[#allocation70_spill]] %s5759_s25 }
  0x1a   :  { %30 = vsyncpa [#allocation4], 0 }
  0x1b   :  { %31 = vsyncpa [#allocation6], 0 }
  0x1c   :  { %33 = vsyncpa [#allocation6 + $0x1], 0 }
  0x1d   :  { %34 = vsyncpa [#allocation9], 0 }
  0x1e   :  { %36 = vsyncpa [#allocation9 + $0x1], 0 }
  0x1f   :  { %37 = vsyncpa [#allocation12], 0 }
  0x20   :  { %39 = vsyncpa [#allocation12 + $0x1], 0 }
  0x21   :  { %40 = vsyncpa [#allocation15], 0 }
  0x22   :  { %42 = vsyncpa [#allocation15 + $0x1], 0 }
  0x23   :  { %43 = vsyncpa [#allocation18], 0 }
  0x24   :  { %45 = vsyncpa [#allocation18 + $0x1], 0 }
  0x25   :  { %46 = vsyncpa [#allocation21], 0 }
  0x26   :  { %48 = vsyncpa [#allocation21 + $0x1], 0 }
  0x27   :  { %49 = vsyncpa [#allocation24], 0 }
  0x28   :  { %51 = vsyncpa [#allocation24 + $0x1], 0 }
  0x29   :  { %52 = vsyncpa [#allocation27], 0  ;;  %s4729_s29 = smov 0   ;;  %s4731_s2 = smov 0  }
  0x2a   :  { %s4733_s6 = smov 0   ;;  %s4735_s30 = smov 0  }
  0x2b   :  { %s4737_s7 = smov 0   ;;  %s4739_s3 = smov 0  }
  0x2c LB: > { %5827 = sst [smem:[#allocation38_spill]] %s4553_s2  ;;  %s5769_s26 = sadd.s32 4294967295, %s4569_s3   ;;  %s4569_s3 = sphi %s4739_s3, %s58_s3   ;;  %s4565_s7 = sphi %s4737_s7, %s5899_s7   ;;  %s4561_s30 = sphi %s4735_s30, %s5898_s30   ;;  %s4557_s6 = sphi %s4733_s6, %s5901_s6   ;;  %s4553_s2 = sphi %s4731_s2, %s5900_s2   ;;  %s4549_s29 = sphi %s4729_s29, %s5896_s29  }
  0x2d   : > { %5828 = sst [smem:[#allocation39_spill]] %s4561_s30  ;;  %s67_s1 = sadd.s32 1, %s4565_s7 }
  0x2e   : > { %5829 = sst [smem:[#allocation40_spill]] %s4565_s7  ;;  %p68_p0 = scmp.ge.s32.totalorder %s67_s1, 4 }
  0x2f   : > { %s239_s8 = sadd.s32 1, %s4557_s6  ;;  %p246_p1 = scmp.ne.s32.totalorder %s4557_s6, %s4553_s2 }
  0x30   : > { %p247_p2 = scmp.eq.s32.totalorder %s4569_s3, 0  ;;  %s5903_s1 = smov (%p68_p0, %s67_s1), 0 }
  0x31   : > { %5830 = sst [smem:[#allocation41_spill]] %s5903_s1  ;;  %p252_p4 = scmp.ne.s32.totalorder %s4553_s2, %s4549_s29 }
  0x32   : > { %p4765_p3 = por %p247_p2, %p246_p1  ;;  %s236_s4 = ssub.s32 %s4565_s7, %s5903_s1 }
  0x33   : > { %p4774_p5 = scmp.eq.s32.totalorder %s5769_s26, 0  ;;  %p237_p6 = scmp.eq.s32.totalorder %s236_s4, 0 }
  0x34   : > { %s5831_s27 = scalar_select %p4765_p3, 1, 0 }
  0x35   : > { %s5832_s28 = scalar_select %p4774_p5, 1, 0 }
  0x36   : > { %p3360_p7 = scmp.ge.s32.totalorder %s4569_s3, 1  ;;  %p4781_p8 = por %p4774_p5, %p252_p4 }
  0x37   : > { %5833 = sst [smem:[#allocation42_spill]] %s5832_s28  ;;  %p721_p9 = scmp.lt.s32.totalorder %s4569_s3, 5 }
  0x38   : > { %s5834_s9 = scalar_select %p4781_p8, 1, 0 }
  0x39   : > { %s4787_s5 = scalar_select %p237_p6, %s4557_s6, %s239_s8  }
  0x3a   : > { %5835 = sst [smem:[#allocation43_spill]] %s5834_s9  ;;  %p4789_p10 = pnand %p3360_p7, %p721_p9 }
  0x3b   : > { %5836 = sst [smem:[#allocation44_spill]] %s4787_s5  ;;  %s4571_s29 = smov [#allocation26]  }
  0x3c   : > { %s5837_s0 = scalar_select %p4789_p10, 1, 0 }
  0x3d   : > { %p3801_p11 = pneg %p4789_p10  ;;  %s773_s26 = sshll.u32 %s4571_s29, 4  ;;  %s774_s26 = int_to_ptr.vmem [resolvable:$true] %s773_s26 }
  0x3e   : > { %5838 = sst [smem:[#allocation45_spill]] %s5837_s0  ;;  %s4572_s1 = smov [#allocation3]  }
  0x3f   : > { %p4797_p12 = pnand %p3801_p11, %p4774_p5  ;;  %s754_s25 = sshll.u32 %s4572_s1, 4  ;;  %s755_s25 = int_to_ptr.vmem [resolvable:$true] %s754_s25 }
  0x40   : > { %s5840_s23 = sld [smem:[#allocation68_spill]] }
  0x41   : > { %p4809_p0 = pneg %p4797_p12 }
  0x46   : > { %s4011_s13 = scalar_lea.hbm %s5840_s23, 1024 }
  0x47   : > { %p4012_p13 = scmp.ne.s32.totalorder %s5840_s23, %s4011_s13  ;;  %p4018_p4 = scmp.lt.u32.totalorder %s4011_s13, %s5840_s23 }
  0x49   : > { %p4014_p1 = pnand %p4809_p0, %p4012_p13 }
  0x4b   : > { %p4015_p2 = pneg %p4014_p1 }
  0x4d   : > { %p4020_p6 = pnand %p4018_p4, %p4015_p2 }
  0x4f   : > { %4023 = shalt.err (!%p4020_p6)
}
  0x50   : > { %s4024_s1 = scalar_lea.vmem %s774_s26, 1024  ;;  %p4032_p8 = scmp.lt.s32.totalorder %s774_s26, %s774_s26 }
  0x51   : > { %p4025_p7 = scmp.ne.s32.totalorder %s774_s26, %s4024_s1  ;;  %p4033_p5 = scmp.lt.s32.totalorder %s4024_s1, %s4024_s1 }
  0x53   : > { %p4027_p9 = pnand %p4025_p7, %p4809_p0  ;;  %p4034_p10 = por %p4033_p5, %p4032_p8 }
  0x55   : > { %p4028_p11 = pneg %p4027_p9 }
  0x57   : > { %p4035_p3 = pnand %p4034_p10, %p4028_p11 }
  0x59   : > { %4038 = shalt.err (!%p4035_p3)
}
  0x5a   : > { %s4573_s11 = smov 64   ;;  %s4574_s30 = smov 4  }
  0x5b   : > { %3807 = dma.hbm_to_vmem [thread:$0]  (!%p4797_p12), %s5840_s23, 1024, %s774_s26, [#allocation27], %s4573_s11, %s4573_s11, %s4574_s30  }
  0x5c   : > { %s5842_s8 = sld [smem:[#allocation49_spill]] }
  0x62   : > { %s4039_s28 = scalar_lea.hbm %s5842_s8, 256 }
  0x63   : > { %p4040_p5 = scmp.ne.s32.totalorder %s5842_s8, %s4039_s28  ;;  %p4046_p10 = scmp.lt.u32.totalorder %s4039_s28, %s5842_s8 }
  0x65   : > { %p4042_p3 = pnand %p4040_p5, %p4809_p0 }
  0x67   : > { %p4043_p8 = pneg %p4042_p3 }
  0x69   : > { %p4048_p13 = pnand %p4046_p10, %p4043_p8 }
  0x6b   : > { %4051 = shalt.err (!%p4048_p13)
}
  0x6c   : > { %s4052_s2 = scalar_lea.vmem %s755_s25, 256  ;;  %p4060_p6 = scmp.lt.s32.totalorder %s755_s25, %s755_s25 }
  0x6d   : > { %p4053_p1 = scmp.ne.s32.totalorder %s755_s25, %s4052_s2  ;;  %p4061_p7 = scmp.lt.s32.totalorder %s4052_s2, %s4052_s2 }
  0x6f   : > { %p4055_p2 = pnand %p4053_p1, %p4809_p0  ;;  %p4062_p9 = por %p4061_p7, %p4060_p6 }
  0x71   : > { %p4056_p4 = pneg %p4055_p2 }
  0x73   : > { %p4063_p11 = pnand %p4062_p9, %p4056_p4 }
  0x75   : > { %4066 = shalt.err (!%p4063_p11)
}
  0x76   : > { %s4575_s22 = smov 128   ;;  %s4576_s26 = smov 8  }
  0x77   : > { %3804 = dma.hbm_to_vmem [thread:$0]  (!%p4797_p12), %s5842_s8, 256, %s755_s25, [#allocation4], %s4575_s22, %s4575_s22, %s4576_s26  }
  0x78   : > { %s4577_s0 = smov [#allocation28]   ;;  %s5843_s24 = sld [smem:[#allocation69_spill]] }
  0x79   : > { %s787_s11 = sshll.u32 %s4577_s0, 4  ;;  %s788_s11 = int_to_ptr.vmem [resolvable:$true] %s787_s11 }
  0x7e   : > { %s4067_s9 = scalar_lea.hbm %s5843_s24, 16 }
  0x7f   : > { %p4068_p5 = scmp.ne.s32.totalorder %s5843_s24, %s4067_s9  ;;  %p4074_p10 = scmp.lt.u32.totalorder %s4067_s9, %s5843_s24 }
  0x81   : > { %p4070_p3 = pnand %p4068_p5, %p4809_p0 }
  0x83   : > { %p4071_p8 = pneg %p4070_p3 }
  0x85   : > { %p4076_p13 = pnand %p4074_p10, %p4071_p8 }
  0x87   : > { %4079 = shalt.err (!%p4076_p13)
}
  0x88   : > { %s4080_s25 = scalar_lea.vmem %s788_s11, 16  ;;  %s4087_s22 = scalar_lea.vmem %s788_s11, 32 }
  0x89   : > { %p4081_p1 = scmp.ne.s32.totalorder %s788_s11, %s4080_s25  ;;  %p4088_p6 = scmp.lt.s32.totalorder %s788_s11, %s788_s11 }
  0x8a   : > { %p4089_p7 = scmp.lt.s32.totalorder %s4087_s22, %s4080_s25 }
  0x8b   : > { %p4083_p2 = pnand %p4081_p1, %p4809_p0 }
  0x8c   : > { %p4090_p9 = por %p4089_p7, %p4088_p6 }
  0x8d   : > { %p4084_p4 = pneg %p4083_p2 }
  0x8f   : > { %p4091_p11 = pnand %p4090_p9, %p4084_p4 }
  0x91   : > { %4094 = shalt.err (!%p4091_p11)
}
  0x92   : > { %3810 = dma.hbm_to_vmem [thread:$0]  (!%p4797_p12), %s5843_s24, 16, %s788_s11, [#allocation27]  }
  0x93   : > { %p3366_p5 = scmp.ge.s32.totalorder %s4569_s3, 4 }
  0x94   : > { %s4863_s23 = sand.u32 (!%p3366_p5), 1, %s4569_s3   ;;  %s4866_s29 = sand.u32 (!%p3366_p5), 1, %s4557_s6  }
  0x95   : > { %794 = sbr.rel (%p3366_p5) target bundleno = 514 (0x202), region = 48  ;;  %s5844_s13 = sld [smem:[#allocation53_spill]] (!%p3366_p5) }
  0x96   : > { %s3757_s28 = smul.u32 (!%p3366_p5), 3, %s4866_s29  ;;  %s4878_s1 = sshll.u32 (!%p3366_p5), %s4565_s7, 4 }
  0x97   : > { %s3758_s4 = smul.u32 (!%p3366_p5), 48, %s4565_s7  ;;  %s5786_s2 = scalar_lea.sflag (!%p3366_p5), [#allocation6], %s4863_s23 }
  0x98   : > { %s810_s9 = scalar_lea.vmem (!%p3366_p5), [#allocation5], %s3757_s28  ;;  %p5845_p0 = scmp.ne.s32.totalorder (!%p3366_p5), %s5831_s27, 0 }
  0x99   : > { %s818_s5 = sshll.u32 (!%p3366_p5), %s810_s9, 4  ;;  %s4875_s5 = int_to_ptr.vmem [resolvable:$true] %s818_s5 }
  0x9b   : > { %s4873_s11 = scalar_lea.hbm (!%p3366_p5), %s5844_s13, %s3758_s4  ;;  %s4099_s20 = scalar_lea.hbm (!%p3366_p5), %s5844_s13, 192 }
  0x9c   : > { %s4095_s25 = scalar_lea.hbm %s4873_s11, 48  ;;  %p4100_p10 = scmp.lt.u32.totalorder %s4873_s11, %s5844_s13 }
  0x9d   : > { %p4096_p12 = scmp.ne.s32.totalorder %s4873_s11, %s4095_s25  ;;  %p4101_p13 = scmp.lt.u32.totalorder %s4099_s20, %s4095_s25 }
  0x9e   : > { %p4103_p2 = scmp.lt.u32.totalorder %s4095_s25, %s4873_s11 }
  0x9f   : > { %p4097_p3 = pnand %p4096_p12, %p5845_p0  ;;  %p4102_p1 = por %p4101_p13, %p4100_p10 }
  0xa1   : > { %p4098_p8 = pneg %p4097_p3  ;;  %p4104_p4 = por %p4103_p2, %p4102_p1 }
  0xa3   : > { %p4105_p6 = pnand %p4104_p4, %p4098_p8 }
  0xa5   : > { %4108 = shalt.err (!%p4105_p6)
}
  0xa6   : > { %s4109_s28 = scalar_lea.vmem %s4875_s5, 48  ;;  %s4578_s30 = smov [#allocation5]  }
  0xa7   : > { %p4110_p7 = scmp.ne.s32.totalorder %s4875_s5, %s4109_s28  ;;  %s4113_s9 = sshll.u32 %s4578_s30, 4  ;;  %s4114_s9 = int_to_ptr.vmem [resolvable:$false] %s4113_s9 }
  0xa8   : > { %s4115_s22 = scalar_lea.vmem %s4114_s9, 96  ;;  %p4116_p5 = scmp.lt.s32.totalorder %s4875_s5, %s4114_s9 }
  0xa9   : > { %p4111_p9 = pnand %p4110_p7, %p5845_p0  ;;  %p4117_p12 = scmp.lt.s32.totalorder %s4115_s22, %s4109_s28 }
  0xab   : > { %p4112_p11 = pneg %p4111_p9  ;;  %p4118_p3 = por %p4117_p12, %p4116_p5 }
  0xad   : > { %p4119_p10 = pnand %p4118_p3, %p4112_p11 }
  0xaf   : > { %4122 = shalt.err (!%p4119_p10)
}
  0xb0   : > { %3767 = dma.hbm_to_vmem [thread:$0]  (%p5845_p0), %s4873_s11, 48, %s4875_s5, %s5786_s2  }
  0xb1   : > { %s5846_s20 = sld [smem:[#allocation55_spill]]  ;;  %s849_s0 = scalar_lea.vmem [#allocation8], %s4866_s29 }
  0xb2   : > { %s856_s28 = sshll.u32 %s849_s0, 4  ;;  %s857_s28 = int_to_ptr.vmem [resolvable:$true] %s856_s28 }
  0xb7   : > { %s4908_s4 = scalar_lea.hbm %s5846_s20, %s4878_s1  ;;  %s4127_s5 = scalar_lea.hbm %s5846_s20, 64 }
  0xb8   : > { %s4123_s9 = scalar_lea.hbm %s4908_s4, 16  ;;  %p4128_p2 = scmp.lt.u32.totalorder %s4908_s4, %s5846_s20 }
  0xb9   : > { %p4124_p8 = scmp.ne.s32.totalorder %s4908_s4, %s4123_s9  ;;  %p4129_p4 = scmp.lt.u32.totalorder %s4127_s5, %s4123_s9 }
  0xba   : > { %p4131_p7 = scmp.lt.u32.totalorder %s4123_s9, %s4908_s4 }
  0xbb   : > { %p4125_p13 = pnand %p4124_p8, %p5845_p0  ;;  %p4130_p6 = por %p4129_p4, %p4128_p2 }
  0xbd   : > { %p4126_p1 = pneg %p4125_p13  ;;  %p4132_p9 = por %p4131_p7, %p4130_p6 }
  0xbf   : > { %p4133_p11 = pnand %p4132_p9, %p4126_p1 }
  0xc1   : > { %4136 = shalt.err (!%p4133_p11)
}
  0xc2   : > { %s4137_s0 = scalar_lea.vmem %s857_s28, 16  ;;  %s4579_s2 = smov [#allocation8]  }
  0xc3   : > { %p4138_p5 = scmp.ne.s32.totalorder %s857_s28, %s4137_s0  ;;  %s4141_s30 = sshll.u32 %s4579_s2, 4  ;;  %s4142_s30 = int_to_ptr.vmem [resolvable:$false] %s4141_s30 }
  0xc4   : > { %s4143_s22 = scalar_lea.vmem %s4142_s30, 32  ;;  %p4144_p10 = scmp.lt.s32.totalorder %s857_s28, %s4142_s30 }
  0xc5   : > { %p4139_p12 = pnand %p4138_p5, %p5845_p0  ;;  %p4145_p8 = scmp.lt.s32.totalorder %s4143_s22, %s4137_s0 }
  0xc7   : > { %p4140_p3 = pneg %p4139_p12  ;;  %p4146_p13 = por %p4145_p8, %p4144_p10 }
  0xc9   : > { %p4147_p2 = pnand %p4146_p13, %p4140_p3 }
  0xcb   : > { %4150 = shalt.err (!%p4147_p2)
}
  0xcc   : > { %s5847_s9 = scalar_lea.sflag [#allocation9], %s4863_s23  ;;  %s5848_s12 = sld [smem:[#allocation58_spill]] }
  0xcd   : > { %3769 = dma.hbm_to_vmem [thread:$0]  (%p5845_p0), %s4908_s4, 16, %s857_s28, %s5847_s9  }
  0xce   : > { %s892_s5 = scalar_lea.vmem [#allocation11], %s4866_s29  ;;  %s4939_s26 = sshll.u32 %s4866_s29, 6 }
  0xcf   : > { %s899_s25 = sshll.u32 %s892_s5, 4  ;;  %s4944_s0 = sshll.u32 %s4565_s7, 10  ;;  %s4941_s25 = int_to_ptr.vmem [resolvable:$true] %s899_s25 }
  0xd0   : > { %s5788_s22 = scalar_lea.sflag [#allocation12], %s4863_s23 }
  0xd2   : > { %s4935_s30 = scalar_lea.hbm %s5848_s12, %s4878_s1  ;;  %s4155_s9 = scalar_lea.hbm %s5848_s12, 64 }
  0xd3   : > { %s4151_s8 = scalar_lea.hbm %s4935_s30, 16  ;;  %p4156_p7 = scmp.lt.u32.totalorder %s4935_s30, %s5848_s12 }
  0xd4   : > { %p4152_p1 = scmp.ne.s32.totalorder %s4935_s30, %s4151_s8  ;;  %p4157_p9 = scmp.lt.u32.totalorder %s4155_s9, %s4151_s8 }
  0xd5   : > { %p4159_p5 = scmp.lt.u32.totalorder %s4151_s8, %s4935_s30 }
  0xd6   : > { %p4153_p4 = pnand %p4152_p1, %p5845_p0  ;;  %p4158_p11 = por %p4157_p9, %p4156_p7 }
  0xd8   : > { %p4154_p6 = pneg %p4153_p4  ;;  %p4160_p12 = por %p4159_p5, %p4158_p11 }
  0xda   : > { %p4161_p3 = pnand %p4160_p12, %p4154_p6 }
  0xdc   : > { %4164 = shalt.err (!%p4161_p3)
}
  0xdd   : > { %s4165_s5 = scalar_lea.vmem %s4941_s25, 16  ;;  %s4580_s4 = smov [#allocation11]  }
  0xde   : > { %p4166_p10 = scmp.ne.s32.totalorder %s4941_s25, %s4165_s5  ;;  %s4169_s28 = sshll.u32 %s4580_s4, 4  ;;  %s4170_s28 = int_to_ptr.vmem [resolvable:$false] %s4169_s28 }
  0xdf   : > { %s4171_s2 = scalar_lea.vmem %s4170_s28, 32  ;;  %p4172_p2 = scmp.lt.s32.totalorder %s4941_s25, %s4170_s28 }
  0xe0   : > { %p4167_p8 = pnand %p4166_p10, %p5845_p0  ;;  %p4173_p1 = scmp.lt.s32.totalorder %s4171_s2, %s4165_s5 }
  0xe2   : > { %p4168_p13 = pneg %p4167_p8  ;;  %p4174_p4 = por %p4173_p1, %p4172_p2 }
  0xe4   : > { %p4175_p7 = pnand %p4174_p4, %p4168_p13 }
  0xe6   : > { %4178 = shalt.err (!%p4175_p7)
}
  0xe7   : > { %3771 = dma.hbm_to_vmem [thread:$0]  (%p5845_p0), %s4935_s30, 16, %s4941_s25, %s5788_s22  }
  0xe8   : > { %s5849_s15 = sld [smem:[#allocation61_spill]]  ;;  %s937_s5 = scalar_lea.vmem [#allocation14], %s4939_s26 }
  0xe9   : > { %s944_s4 = sshll.u32 %s937_s5, 4  ;;  %s4980_s28 = sshll.u32 %s4866_s29, 1  ;;  %s4977_s4 = int_to_ptr.vmem [resolvable:$true] %s944_s4 }
  0xea   : > { %s5791_s2 = scalar_lea.sflag [#allocation15], %s4863_s23 }
  0xee   : > { %s4974_s11 = scalar_lea.hbm %s5849_s15, %s4944_s0  ;;  %s4183_s8 = scalar_lea.hbm %s5849_s15, 4096 }
  0xef   : > { %s4179_s12 = scalar_lea.hbm %s4974_s11, 1024  ;;  %p4184_p5 = scmp.lt.u32.totalorder %s4974_s11, %s5849_s15 }
  0xf0   : > { %p4180_p6 = scmp.ne.s32.totalorder %s4974_s11, %s4179_s12  ;;  %p4185_p12 = scmp.lt.u32.totalorder %s4183_s8, %s4179_s12 }
  0xf1   : > { %p4187_p10 = scmp.lt.u32.totalorder %s4179_s12, %s4974_s11 }
  0xf2   : > { %p4181_p9 = pnand %p4180_p6, %p5845_p0  ;;  %p4186_p3 = por %p4185_p12, %p4184_p5 }
  0xf4   : > { %p4182_p11 = pneg %p4181_p9  ;;  %p4188_p8 = por %p4187_p10, %p4186_p3 }
  0xf6   : > { %p4189_p13 = pnand %p4188_p8, %p4182_p11 }
  0xf8   : > { %4192 = shalt.err (!%p4189_p13)
}
  0xf9   : > { %s4193_s5 = scalar_lea.vmem %s4977_s4, 1024  ;;  %s4581_s30 = smov [#allocation14]  }
  0xfa   : > { %p4194_p2 = scmp.ne.s32.totalorder %s4977_s4, %s4193_s5  ;;  %s4197_s25 = sshll.u32 %s4581_s30, 4  ;;  %s4198_s25 = int_to_ptr.vmem [resolvable:$false] %s4197_s25 }
  0xfb   : > { %s4199_s22 = scalar_lea.vmem %s4198_s25, 2048  ;;  %p4200_p7 = scmp.lt.s32.totalorder %s4977_s4, %s4198_s25 }
  0xfc   : > { %p4195_p1 = pnand %p4194_p2, %p5845_p0  ;;  %p4201_p6 = scmp.lt.s32.totalorder %s4199_s22, %s4193_s5 }
  0xfe   : > { %p4196_p4 = pneg %p4195_p1  ;;  %p4202_p9 = por %p4201_p6, %p4200_p7 }
 0x100   : > { %p4203_p5 = pnand %p4202_p9, %p4196_p4 }
 0x102   : > { %4206 = shalt.err (!%p4203_p5)
}
 0x103   : > { %s5792_s12 = smov 64   ;;  %s5794_s8 = smov 4  }
 0x104   : > { %3773 = dma.hbm_to_vmem [thread:$0]  (%p5845_p0), %s4974_s11, 1024, %s4977_s4, %s5791_s2, %s5792_s12, %s5792_s12, %s5794_s8  }
 0x105   : > { %s5010_s9 = sshll.u32 %s4565_s7, 5  ;;  %s5850_s17 = sld [smem:[#allocation63_spill]] }
 0x106   : > { %s975_s22 = scalar_lea.vmem [#allocation17], %s4980_s28  ;;  %s5796_s15 = scalar_lea.sflag [#allocation18], %s4863_s23 }
 0x107   : > { %s982_s13 = sshll.u32 %s975_s22, 4  ;;  %s983_s13 = int_to_ptr.vmem [resolvable:$true] %s982_s13 }
 0x10b   : > { %s5016_s25 = scalar_lea.hbm %s5850_s17, %s5010_s9  ;;  %s4211_s2 = scalar_lea.hbm %s5850_s17, 128 }
 0x10c   : > { %s4207_s20 = scalar_lea.hbm %s5016_s25, 32  ;;  %p4212_p10 = scmp.lt.u32.totalorder %s5016_s25, %s5850_s17 }
 0x10d   : > { %p4208_p11 = scmp.ne.s32.totalorder %s5016_s25, %s4207_s20  ;;  %p4213_p8 = scmp.lt.u32.totalorder %s4211_s2, %s4207_s20 }
 0x10e   : > { %p4215_p2 = scmp.lt.u32.totalorder %s4207_s20, %s5016_s25 }
 0x10f   : > { %p4209_p12 = pnand %p4208_p11, %p5845_p0  ;;  %p4214_p13 = por %p4213_p8, %p4212_p10 }
 0x111   : > { %p4210_p3 = pneg %p4209_p12  ;;  %p4216_p1 = por %p4215_p2, %p4214_p13 }
 0x113   : > { %p4217_p4 = pnand %p4216_p1, %p4210_p3 }
 0x115   : > { %4220 = shalt.err (!%p4217_p4)
}
 0x116   : > { %s4221_s22 = scalar_lea.vmem %s983_s13, 32  ;;  %s4584_s12 = smov [#allocation17]  }
 0x117   : > { %p4222_p7 = scmp.ne.s32.totalorder %s983_s13, %s4221_s22  ;;  %s4225_s8 = sshll.u32 %s4584_s12, 4  ;;  %s4226_s8 = int_to_ptr.vmem [resolvable:$false] %s4225_s8 }
 0x118   : > { %s4227_s11 = scalar_lea.vmem %s4226_s8, 64  ;;  %p4228_p5 = scmp.lt.s32.totalorder %s983_s13, %s4226_s8 }
 0x119   : > { %p4223_p6 = pnand %p4222_p7, %p5845_p0  ;;  %p4229_p11 = scmp.lt.s32.totalorder %s4227_s11, %s4221_s22 }
 0x11b   : > { %p4224_p9 = pneg %p4223_p6  ;;  %p4230_p12 = por %p4229_p11, %p4228_p5 }
 0x11d   : > { %p4231_p8 = pnand %p4230_p12, %p4224_p9 }
 0x11f   : > { %4234 = shalt.err (!%p4231_p8)
}
 0x120   : > { %3775 = dma.hbm_to_vmem [thread:$0]  (%p5845_p0), %s5016_s25, 32, %s983_s13, %s5796_s15  }
 0x121   : > { %s5851_s19 = sld [smem:[#allocation64_spill]]  ;;  %s1013_s8 = scalar_lea.vmem [#allocation20], %s4866_s29 }
 0x122   : > { %s1020_s4 = sshll.u32 %s1013_s8, 4  ;;  %s5797_s5 = scalar_lea.sflag [#allocation21], %s4863_s23  ;;  %s1021_s4 = int_to_ptr.vmem [resolvable:$true] %s1020_s4 }
 0x127   : > { %s5043_s12 = scalar_lea.hbm %s5851_s19, %s4878_s1  ;;  %s4239_s25 = scalar_lea.hbm %s5851_s19, 64 }
 0x128   : > { %s4235_s30 = scalar_lea.hbm %s5043_s12, 16  ;;  %p4240_p2 = scmp.lt.u32.totalorder %s5043_s12, %s5851_s19 }
 0x129   : > { %p4236_p3 = scmp.ne.s32.totalorder %s5043_s12, %s4235_s30  ;;  %p4241_p1 = scmp.lt.u32.totalorder %s4239_s25, %s4235_s30 }
 0x12a   : > { %p4243_p7 = scmp.lt.u32.totalorder %s4235_s30, %s5043_s12 }
 0x12b   : > { %p4237_p10 = pnand %p4236_p3, %p5845_p0  ;;  %p4242_p4 = por %p4241_p1, %p4240_p2 }
 0x12d   : > { %p4238_p13 = pneg %p4237_p10  ;;  %p4244_p6 = por %p4243_p7, %p4242_p4 }
 0x12f   : > { %p4245_p9 = pnand %p4244_p6, %p4238_p13 }
 0x131   : > { %4248 = shalt.err (!%p4245_p9)
}
 0x132   : > { %s4249_s2 = scalar_lea.vmem %s1021_s4, 16  ;;  %s4585_s8 = smov [#allocation20]  }
 0x133   : > { %p4250_p5 = scmp.ne.s32.totalorder %s1021_s4, %s4249_s2  ;;  %s4253_s15 = sshll.u32 %s4585_s8, 4  ;;  %s4254_s15 = int_to_ptr.vmem [resolvable:$false] %s4253_s15 }
 0x134   : > { %s4255_s22 = scalar_lea.vmem %s4254_s15, 32  ;;  %p4256_p8 = scmp.lt.s32.totalorder %s1021_s4, %s4254_s15 }
 0x135   : > { %p4251_p11 = pnand %p4250_p5, %p5845_p0  ;;  %p4257_p3 = scmp.lt.s32.totalorder %s4255_s22, %s4249_s2 }
 0x137   : > { %p4252_p12 = pneg %p4251_p11  ;;  %p4258_p10 = por %p4257_p3, %p4256_p8 }
 0x139   : > { %p4259_p1 = pnand %p4258_p10, %p4252_p12 }
 0x13b   : > { %4262 = shalt.err (!%p4259_p1)
}
 0x13c   : > { %3777 = dma.hbm_to_vmem [thread:$0]  (%p5845_p0), %s5043_s12, 16, %s1021_s4, %s5797_s5  }
 0x13d   : > { %s5852_s21 = sld [smem:[#allocation66_spill]]  ;;  %s1051_s15 = scalar_lea.vmem [#allocation23], %s4866_s29 }
 0x13e   : > { %s1058_s11 = sshll.u32 %s1051_s15, 4  ;;  %s5853_s8 = sld [smem:[#allocation54_spill]]  ;;  %s5073_s11 = int_to_ptr.vmem [resolvable:$true] %s1058_s11 }
 0x13f   : > { %s5798_s17 = scalar_lea.sflag [#allocation24], %s4863_s23 }
 0x143   : > { %s5070_s25 = scalar_lea.hbm %s5852_s21, %s4878_s1  ;;  %s4267_s13 = scalar_lea.hbm %s5852_s21, 64 }
 0x144   : > { %s5079_s22 = scalar_lea.hbm %s5853_s8, %s4944_s0  ;;  %s4263_s12 = scalar_lea.hbm %s5070_s25, 16 }
 0x145   : > { %p4264_p13 = scmp.ne.s32.totalorder %s5070_s25, %s4263_s12  ;;  %p4268_p7 = scmp.lt.u32.totalorder %s5070_s25, %s5852_s21 }
 0x146   : > { %p4269_p6 = scmp.lt.u32.totalorder %s4267_s13, %s4263_s12  ;;  %p4271_p5 = scmp.lt.u32.totalorder %s4263_s12, %s5070_s25 }
 0x147   : > { %p4265_p2 = pnand %p4264_p13, %p5845_p0 }
 0x148   : > { %p4270_p9 = por %p4269_p6, %p4268_p7 }
 0x149   : > { %p4266_p4 = pneg %p4265_p2 }
 0x14a   : > { %p4272_p11 = por %p4271_p5, %p4270_p9 }
 0x14c   : > { %p4273_p12 = pnand %p4272_p11, %p4266_p4 }
 0x14e   : > { %4276 = shalt.err (!%p4273_p12)
}
 0x14f   : > { %s4277_s15 = scalar_lea.vmem %s5073_s11, 16  ;;  %s4586_s20 = smov [#allocation23]  }
 0x150   : > { %p4278_p8 = scmp.ne.s32.totalorder %s5073_s11, %s4277_s15  ;;  %s4281_s2 = sshll.u32 %s4586_s20, 4  ;;  %s4282_s2 = int_to_ptr.vmem [resolvable:$false] %s4281_s2 }
 0x151   : > { %s4283_s19 = scalar_lea.vmem %s4282_s2, 32  ;;  %p4284_p1 = scmp.lt.s32.totalorder %s5073_s11, %s4282_s2 }
 0x152   : > { %p4279_p3 = pnand %p4278_p8, %p5845_p0  ;;  %p4285_p13 = scmp.lt.s32.totalorder %s4283_s19, %s4277_s15 }
 0x154   : > { %p4280_p10 = pneg %p4279_p3  ;;  %p4286_p2 = por %p4285_p13, %p4284_p1 }
 0x156   : > { %p4287_p7 = pnand %p4286_p2, %p4280_p10 }
 0x158   : > { %4290 = shalt.err (!%p4287_p7)
}
 0x159   : > { %3779 = dma.hbm_to_vmem [thread:$0]  (%p5845_p0), %s5070_s25, 16, %s5073_s11, %s5798_s17  }
 0x15a   : > { %s829_s5 = scalar_lea.vmem [#allocation7], %s4939_s26  ;;  %s5854_s10 = sld [smem:[#allocation56_spill]] }
 0x15b   : > { %s836_s12 = sshll.u32 %s829_s5, 4  ;;  %s4291_s15 = scalar_lea.hbm %s5079_s22, 1024  ;;  %s5106_s12 = int_to_ptr.vmem [resolvable:$true] %s836_s12 }
 0x15c   : > { %p4292_p4 = scmp.ne.s32.totalorder %s5079_s22, %s4291_s15  ;;  %s4295_s19 = scalar_lea.hbm %s5853_s8, 4096 }
 0x15d   : > { %p4296_p5 = scmp.lt.u32.totalorder %s5079_s22, %s5853_s8  ;;  %p4297_p11 = scmp.lt.u32.totalorder %s4295_s19, %s4291_s15 }
 0x15e   : > { %p4293_p6 = pnand %p4292_p4, %p5845_p0  ;;  %p4299_p8 = scmp.lt.u32.totalorder %s4291_s15, %s5079_s22 }
 0x15f   : > { %p4298_p12 = por %p4297_p11, %p4296_p5 }
 0x160   : > { %s5112_s13 = scalar_lea.hbm %s5854_s10, %s5010_s9  ;;  %p4294_p9 = pneg %p4293_p6 }
 0x161   : > { %p4300_p3 = por %p4299_p8, %p4298_p12 }
 0x163   : > { %p4301_p10 = pnand %p4300_p3, %p4294_p9 }
 0x165   : > { %4304 = shalt.err (!%p4301_p10)
}
 0x166   : > { %s4305_s11 = scalar_lea.vmem %s5106_s12, 1024  ;;  %s4587_s5 = smov [#allocation7]  }
 0x167   : > { %p4306_p1 = scmp.ne.s32.totalorder %s5106_s12, %s4305_s11  ;;  %s4309_s4 = sshll.u32 %s4587_s5, 4  ;;  %s4310_s4 = int_to_ptr.vmem [resolvable:$false] %s4309_s4 }
 0x168   : > { %s4311_s21 = scalar_lea.vmem %s4310_s4, 2048  ;;  %p4312_p7 = scmp.lt.s32.totalorder %s5106_s12, %s4310_s4 }
 0x169   : > { %p4307_p13 = pnand %p4306_p1, %p5845_p0  ;;  %p4313_p4 = scmp.lt.s32.totalorder %s4311_s21, %s4305_s11 }
 0x16b   : > { %p4308_p2 = pneg %p4307_p13  ;;  %p4314_p6 = por %p4313_p4, %p4312_p7 }
 0x16d   : > { %p4315_p5 = pnand %p4314_p6, %p4308_p2 }
 0x16f   : > { %4318 = shalt.err (!%p4315_p5)
}
 0x170   : > { %s5855_s30 = smov 4   ;;  %s5856_s15 = smov 64  }
 0x171   : > { %s5857_s20 = scalar_lea.sflag [#allocation6], %s4863_s23  ;;  %s867_s2 = scalar_lea.vmem [#allocation10], %s4980_s28 }
 0x172   : > { %3768 = dma.hbm_to_vmem [thread:$0]  (%p5845_p0), %s5079_s22, 1024, %s5106_s12, %s5857_s20, %s5856_s15, %s5856_s15, %s5855_s30  }
 0x173   : > { %s874_s19 = sshll.u32 %s867_s2, 4  ;;  %s5858_s14 = sld [smem:[#allocation60_spill]]  ;;  %s875_s19 = int_to_ptr.vmem [resolvable:$true] %s874_s19 }
 0x174   : > { %s4319_s4 = scalar_lea.hbm %s5112_s13, 32  ;;  %s4323_s8 = scalar_lea.hbm %s5854_s10, 128 }
 0x175   : > { %p4320_p9 = scmp.ne.s32.totalorder %s5112_s13, %s4319_s4  ;;  %p4324_p8 = scmp.lt.u32.totalorder %s5112_s13, %s5854_s10 }
 0x176   : > { %p4325_p3 = scmp.lt.u32.totalorder %s4323_s8, %s4319_s4  ;;  %p4327_p1 = scmp.lt.u32.totalorder %s4319_s4, %s5112_s13 }
 0x177   : > { %p4321_p11 = pnand %p4320_p9, %p5845_p0 }
 0x178   : > { %p4326_p10 = por %p4325_p3, %p4324_p8 }
 0x179   : > { %s5145_s5 = scalar_lea.hbm %s5858_s14, %s5010_s9  ;;  %p4322_p12 = pneg %p4321_p11 }
 0x17a   : > { %p4328_p13 = por %p4327_p1, %p4326_p10 }
 0x17c   : > { %p4329_p2 = pnand %p4328_p13, %p4322_p12 }
 0x17e   : > { %4332 = shalt.err (!%p4329_p2)
}
 0x17f   : > { %s4333_s22 = scalar_lea.vmem %s875_s19, 32  ;;  %s4588_s12 = smov [#allocation10]  }
 0x180   : > { %p4334_p7 = scmp.ne.s32.totalorder %s875_s19, %s4333_s22  ;;  %s4337_s20 = sshll.u32 %s4588_s12, 4  ;;  %s4338_s20 = int_to_ptr.vmem [resolvable:$false] %s4337_s20 }
 0x181   : > { %s4339_s17 = scalar_lea.vmem %s4338_s20, 64  ;;  %p4340_p5 = scmp.lt.s32.totalorder %s875_s19, %s4338_s20 }
 0x182   : > { %p4335_p4 = pnand %p4334_p7, %p5845_p0  ;;  %p4341_p9 = scmp.lt.s32.totalorder %s4339_s17, %s4333_s22 }
 0x184   : > { %p4336_p6 = pneg %p4335_p4  ;;  %p4342_p11 = por %p4341_p9, %p4340_p5 }
 0x186   : > { %p4343_p3 = pnand %p4342_p11, %p4336_p6 }
 0x188   : > { %4346 = shalt.err (!%p4343_p3)
}
 0x189   : > { %s5859_s24 = scalar_lea.sflag [#allocation9], %s4863_s23  ;;  %s918_s7 = scalar_lea.vmem [#allocation13], %s4980_s28 }
 0x18a   : > { %3770 = dma.hbm_to_vmem [thread:$0]  (%p5845_p0), %s5112_s13, 32, %s875_s19, %s5859_s24  }
 0x18b   : > { %s926_s8 = sshll.u32 %s918_s7, 4  ;;  %s5860_s16 = sld [smem:[#allocation62_spill]]  ;;  %s927_s8 = int_to_ptr.vmem [resolvable:$true] %s926_s8 }
 0x18c   : > { %s4347_s4 = scalar_lea.hbm %s5145_s5, 32  ;;  %s4351_s12 = scalar_lea.hbm %s5858_s14, 128 }
 0x18d   : > { %p4348_p12 = scmp.ne.s32.totalorder %s5145_s5, %s4347_s4  ;;  %p4352_p1 = scmp.lt.u32.totalorder %s5145_s5, %s5858_s14 }
 0x18e   : > { %p4353_p13 = scmp.lt.u32.totalorder %s4351_s12, %s4347_s4  ;;  %p4355_p7 = scmp.lt.u32.totalorder %s4347_s4, %s5145_s5 }
 0x18f   : > { %p4349_p8 = pnand %p4348_p12, %p5845_p0 }
 0x190   : > { %p4354_p2 = por %p4353_p13, %p4352_p1 }
 0x191   : > { %s5171_s11 = scalar_lea.hbm %s5860_s16, %s4878_s1  ;;  %p4350_p10 = pneg %p4349_p8 }
 0x192   : > { %p4356_p4 = por %p4355_p7, %p4354_p2 }
 0x194   : > { %p4357_p6 = pnand %p4356_p4, %p4350_p10 }
 0x196   : > { %4360 = shalt.err (!%p4357_p6)
}
 0x197   : > { %s4361_s1 = scalar_lea.vmem %s927_s8, 32  ;;  %s4589_s13 = smov [#allocation13]  }
 0x198   : > { %p4362_p5 = scmp.ne.s32.totalorder %s927_s8, %s4361_s1  ;;  %s4365_s19 = sshll.u32 %s4589_s13, 4  ;;  %s4366_s19 = int_to_ptr.vmem [resolvable:$false] %s4365_s19 }
 0x199   : > { %s4367_s24 = scalar_lea.vmem %s4366_s19, 64  ;;  %p4368_p3 = scmp.lt.s32.totalorder %s927_s8, %s4366_s19 }
 0x19a   : > { %p4363_p9 = pnand %p4362_p5, %p5845_p0  ;;  %p4369_p12 = scmp.lt.s32.totalorder %s4367_s24, %s4361_s1 }
 0x19c   : > { %p4364_p11 = pneg %p4363_p9  ;;  %p4370_p8 = por %p4369_p12, %p4368_p3 }
 0x19e   : > { %p4371_p1 = pnand %p4370_p8, %p4364_p11 }
 0x1a0   : > { %4374 = shalt.err (!%p4371_p1)
}
 0x1a1   : > { %s5861_s7 = scalar_lea.sflag [#allocation12], %s4863_s23  ;;  %s957_s2 = scalar_lea.vmem [#allocation16], %s4866_s29 }
 0x1a2   : > { %3772 = dma.hbm_to_vmem [thread:$0]  (%p5845_p0), %s5145_s5, 32, %s927_s8, %s5861_s7  }
 0x1a3   : > { %s964_s25 = sshll.u32 %s957_s2, 4  ;;  %s5197_s22 = scalar_lea.hbm %s5752_s18, %s4944_s0  ;;  %s965_s25 = int_to_ptr.vmem [resolvable:$true] %s964_s25 }
 0x1a4   : > { %s4375_s12 = scalar_lea.hbm %s5171_s11, 16  ;;  %s4379_s1 = scalar_lea.hbm %s5860_s16, 64 }
 0x1a5   : > { %p4376_p10 = scmp.ne.s32.totalorder %s5171_s11, %s4375_s12  ;;  %p4380_p7 = scmp.lt.u32.totalorder %s5171_s11, %s5860_s16 }
 0x1a6   : > { %p4381_p4 = scmp.lt.u32.totalorder %s4379_s1, %s4375_s12  ;;  %p4383_p5 = scmp.lt.u32.totalorder %s4375_s12, %s5171_s11 }
 0x1a7   : > { %p4377_p13 = pnand %p4376_p10, %p5845_p0 }
 0x1a8   : > { %p4382_p6 = por %p4381_p4, %p4380_p7 }
 0x1a9   : > { %p4378_p2 = pneg %p4377_p13 }
 0x1aa   : > { %p4384_p9 = por %p4383_p5, %p4382_p6 }
 0x1ac   : > { %p4385_p11 = pnand %p4384_p9, %p4378_p2 }
 0x1ae   : > { %4388 = shalt.err (!%p4385_p11)
}
 0x1af   : > { %s4389_s29 = scalar_lea.vmem %s965_s25, 16  ;;  %s4590_s5 = smov [#allocation16]  }
 0x1b0   : > { %p4390_p3 = scmp.ne.s32.totalorder %s965_s25, %s4389_s29  ;;  %s4393_s8 = sshll.u32 %s4590_s5, 4  ;;  %s4394_s8 = int_to_ptr.vmem [resolvable:$false] %s4393_s8 }
 0x1b1   : > { %s4395_s24 = scalar_lea.vmem %s4394_s8, 32  ;;  %p4396_p1 = scmp.lt.s32.totalorder %s965_s25, %s4394_s8 }
 0x1b2   : > { %p4391_p12 = pnand %p4390_p3, %p5845_p0  ;;  %p4397_p10 = scmp.lt.s32.totalorder %s4395_s24, %s4389_s29 }
 0x1b4   : > { %p4392_p8 = pneg %p4391_p12  ;;  %p4398_p13 = por %p4397_p10, %p4396_p1 }
 0x1b6   : > { %p4399_p4 = pnand %p4398_p13, %p4392_p8 }
 0x1b8   : > { %4402 = shalt.err (!%p4399_p4)
}
 0x1b9   : > { %s5862_s7 = scalar_lea.sflag [#allocation15], %s4863_s23  ;;  %s993_s2 = scalar_lea.vmem [#allocation19], %s4939_s26 }
 0x1ba   : > { %3774 = dma.hbm_to_vmem [thread:$0]  (%p5845_p0), %s5171_s11, 16, %s965_s25, %s5862_s7  }
 0x1bb   : > { %s1000_s4 = sshll.u32 %s993_s2, 4  ;;  %s5863_s20 = sld [smem:[#allocation65_spill]]  ;;  %s5219_s4 = int_to_ptr.vmem [resolvable:$true] %s1000_s4 }
 0x1bc   : > { %s4403_s1 = scalar_lea.hbm %s5197_s22, 1024  ;;  %s4407_s29 = scalar_lea.hbm %s5752_s18, 4096 }
 0x1bd   : > { %p4404_p2 = scmp.ne.s32.totalorder %s5197_s22, %s4403_s1  ;;  %p4408_p5 = scmp.lt.u32.totalorder %s5197_s22, %s5752_s18 }
 0x1be   : > { %p4409_p9 = scmp.lt.u32.totalorder %s4407_s29, %s4403_s1  ;;  %p4411_p3 = scmp.lt.u32.totalorder %s4403_s1, %s5197_s22 }
 0x1bf   : > { %p4405_p7 = pnand %p4404_p2, %p5845_p0 }
 0x1c0   : > { %p4410_p11 = por %p4409_p9, %p4408_p5 }
 0x1c1   : > { %s5225_s17 = scalar_lea.hbm %s5863_s20, %s4944_s0  ;;  %p4406_p6 = pneg %p4405_p7 }
 0x1c2   : > { %p4412_p12 = por %p4411_p3, %p4410_p11 }
 0x1c4   : > { %p4413_p8 = pnand %p4412_p12, %p4406_p6 }
 0x1c6   : > { %4416 = shalt.err (!%p4413_p8)
}
 0x1c7   : > { %s4417_s0 = scalar_lea.vmem %s5219_s4, 1024  ;;  %s4591_s25 = smov [#allocation19]  }
 0x1c8   : > { %p4418_p1 = scmp.ne.s32.totalorder %s5219_s4, %s4417_s0  ;;  %s4421_s8 = sshll.u32 %s4591_s25, 4  ;;  %s4422_s8 = int_to_ptr.vmem [resolvable:$false] %s4421_s8 }
 0x1c9   : > { %s4423_s24 = scalar_lea.vmem %s4422_s8, 2048  ;;  %p4424_p4 = scmp.lt.s32.totalorder %s5219_s4, %s4422_s8 }
 0x1ca   : > { %p4419_p10 = pnand %p4418_p1, %p5845_p0  ;;  %p4425_p2 = scmp.lt.s32.totalorder %s4423_s24, %s4417_s0 }
 0x1cc   : > { %p4420_p13 = pneg %p4419_p10  ;;  %p4426_p7 = por %p4425_p2, %p4424_p4 }
 0x1ce   : > { %p4427_p5 = pnand %p4426_p7, %p4420_p13 }
 0x1d0   : > { %4430 = shalt.err (!%p4427_p5)
}
 0x1d1   : > { %s5864_s7 = scalar_lea.sflag [#allocation18], %s4863_s23  ;;  %s1031_s2 = scalar_lea.vmem [#allocation22], %s4939_s26 }
 0x1d2   : > { %3776 = dma.hbm_to_vmem [thread:$0]  (%p5845_p0), %s5197_s22, 1024, %s5219_s4, %s5864_s7, %s5856_s15, %s5856_s15, %s5855_s30  }
 0x1d3   : > { %s1038_s21 = sshll.u32 %s1031_s2, 4  ;;  %s5865_s13 = sld [smem:[#allocation67_spill]]  ;;  %s5254_s21 = int_to_ptr.vmem [resolvable:$true] %s1038_s21 }
 0x1d4   : > { %s4431_s29 = scalar_lea.hbm %s5225_s17, 1024  ;;  %s4435_s0 = scalar_lea.hbm %s5863_s20, 4096 }
 0x1d5   : > { %p4432_p6 = scmp.ne.s32.totalorder %s5225_s17, %s4431_s29  ;;  %p4436_p3 = scmp.lt.u32.totalorder %s5225_s17, %s5863_s20 }
 0x1d6   : > { %p4437_p12 = scmp.lt.u32.totalorder %s4435_s0, %s4431_s29  ;;  %p4439_p1 = scmp.lt.u32.totalorder %s4431_s29, %s5225_s17 }
 0x1d7   : > { %p4433_p9 = pnand %p4432_p6, %p5845_p0 }
 0x1d8   : > { %p4438_p8 = por %p4437_p12, %p4436_p3 }
 0x1d9   : > { %s5260_s19 = scalar_lea.hbm %s5865_s13, %s5010_s9  ;;  %p4434_p11 = pneg %p4433_p9 }
 0x1da   : > { %p4440_p10 = por %p4439_p1, %p4438_p8 }
 0x1dc   : > { %p4441_p13 = pnand %p4440_p10, %p4434_p11 }
 0x1de   : > { %4444 = shalt.err (!%p4441_p13)
}
 0x1df   : > { %s4445_s26 = scalar_lea.vmem %s5254_s21, 1024  ;;  %s4592_s9 = smov [#allocation22]  }
 0x1e0   : > { %p4446_p4 = scmp.ne.s32.totalorder %s5254_s21, %s4445_s26  ;;  %s4449_s4 = sshll.u32 %s4592_s9, 4  ;;  %s4450_s4 = int_to_ptr.vmem [resolvable:$false] %s4449_s4 }
 0x1e1   : > { %s4451_s8 = scalar_lea.vmem %s4450_s4, 2048  ;;  %p4452_p5 = scmp.lt.s32.totalorder %s5254_s21, %s4450_s4 }
 0x1e2   : > { %p4447_p2 = pnand %p4446_p4, %p5845_p0  ;;  %p4453_p6 = scmp.lt.s32.totalorder %s4451_s8, %s4445_s26 }
 0x1e4   : > { %p4448_p7 = pneg %p4447_p2  ;;  %p4454_p9 = por %p4453_p6, %p4452_p5 }
 0x1e6   : > { %p4455_p3 = pnand %p4454_p9, %p4448_p7 }
 0x1e8   : > { %4458 = shalt.err (!%p4455_p3)
}
 0x1e9   : > { %s5866_s24 = scalar_lea.sflag [#allocation21], %s4863_s23  ;;  %s1069_s7 = scalar_lea.vmem [#allocation25], %s4980_s28 }
 0x1ea   : > { %3778 = dma.hbm_to_vmem [thread:$0]  (%p5845_p0), %s5225_s17, 1024, %s5254_s21, %s5866_s24, %s5856_s15, %s5856_s15, %s5855_s30  }
 0x1eb   : > { %s1076_s2 = sshll.u32 %s1069_s7, 4  ;;  %s4459_s12 = scalar_lea.hbm %s5260_s19, 32  ;;  %s1077_s2 = int_to_ptr.vmem [resolvable:$true] %s1076_s2 }
 0x1ec   : > { %p4460_p11 = scmp.ne.s32.totalorder %s5260_s19, %s4459_s12  ;;  %s4463_s5 = scalar_lea.hbm %s5865_s13, 128 }
 0x1ed   : > { %p4464_p1 = scmp.lt.u32.totalorder %s5260_s19, %s5865_s13  ;;  %p4465_p10 = scmp.lt.u32.totalorder %s4463_s5, %s4459_s12 }
 0x1ee   : > { %p4461_p12 = pnand %p4460_p11, %p5845_p0  ;;  %p4467_p4 = scmp.lt.u32.totalorder %s4459_s12, %s5260_s19 }
 0x1ef   : > { %p4466_p13 = por %p4465_p10, %p4464_p1 }
 0x1f0   : > { %p4462_p8 = pneg %p4461_p12 }
 0x1f1   : > { %p4468_p2 = por %p4467_p4, %p4466_p13 }
 0x1f3   : > { %p4469_p7 = pnand %p4468_p2, %p4462_p8 }
 0x1f5   : > { %4472 = shalt.err (!%p4469_p7)
}
 0x1f6   : > { %s4473_s28 = scalar_lea.vmem %s1077_s2, 32  ;;  %s4593_s30 = smov [#allocation25]  }
 0x1f7   : > { %p4474_p5 = scmp.ne.s32.totalorder %s1077_s2, %s4473_s28  ;;  %s4477_s15 = sshll.u32 %s4593_s30, 4  ;;  %s4478_s15 = int_to_ptr.vmem [resolvable:$false] %s4477_s15 }
 0x1f8   : > { %s4479_s17 = scalar_lea.vmem %s4478_s15, 64  ;;  %p4480_p3 = scmp.lt.s32.totalorder %s1077_s2, %s4478_s15 }
 0x1f9   : > { %p4475_p6 = pnand %p4474_p5, %p5845_p0  ;;  %p4481_p11 = scmp.lt.s32.totalorder %s4479_s17, %s4473_s28 }
 0x1fb   : > { %p4476_p9 = pneg %p4475_p6  ;;  %p4482_p12 = por %p4481_p11, %p4480_p3 }
 0x1fd   : > { %p4483_p1 = pnand %p4482_p12, %p4476_p9 }
 0x1ff   : > { %4486 = shalt.err (!%p4483_p1)
}
 0x200   : > { %s5867_s21 = scalar_lea.sflag [#allocation24], %s4863_s23 }
 0x201   : > { %3780 = dma.hbm_to_vmem [thread:$0]  (%p5845_p0), %s5260_s19, 32, %s1077_s2, %s5867_s21  }
 0x202 PF: > { %s5868_s25 = sld [smem:[#allocation45_spill]] }
 0x208   : > { %p5869_p8 = scmp.ne.s32.totalorder %s5868_s25, 0 }
 0x209   : > { %s5870_s22 = sld [smem:[#allocation42_spill]] (!%p5869_p8) }
 0x20a   : > { %1085 = sbr.rel (%p5869_p8) target bundleno = 4329 (0x10e9), region = 120 }
 0x20f   : > { %p5871_p10 = scmp.ne.s32.totalorder (!%p5869_p8), %s5870_s22, 0 }
 0x211   : > { %4512 = dma.done.wait (%p5871_p10), [#allocation4], 256  }
 0x212   : > { %4514 = vsyncadd (%p5871_p10), [#allocation4], 4294967040  ;;  %s5872_s26 = sadd.s32 4294967295, %s4569_s3   ;;  %s5873_s9 = sld [smem:[#allocation38_spill]] }
 0x213   : > { %s5874_s4 = sld [smem:[#allocation43_spill]]  ;;  %s5316_s8 = sand.u32 1, %s5872_s26  }
 0x214   : > { %s1092_s19 = scalar_lea.sflag [#allocation6], %s5316_s8 }
 0x218   : > { %s5319_s27 = sand.u32 1, %s5873_s9  }
 0x219   : > { %s3759_s23 = smul.u32 3, %s5319_s27  ;;  %p5875_p0 = scmp.ne.s32.totalorder %s5874_s4, 0 }
 0x21b   : > { %s5323_s24 = scalar_lea.vmem [#allocation5], %s3759_s23 }
 0x21c   : > { %4516 = dma.done.wait (%p5875_p0), %s1092_s19, 1072  }
 0x21d   : > { %4518 = vsyncadd (%p5875_p0), %s1092_s19, 4294966224  ;;  %s3396_s7 = sshll.u32 %s5319_s27, 6  ;;  %s1110_s12 = scalar_lea.sflag [#allocation9], %s5316_s8 }
 0x21e   : > { %s5330_s2 = scalar_lea.vmem [#allocation7], %s3396_s7 }
 0x21f   : > { %4520 = dma.done.wait (%p5875_p0), %s1110_s12, 48  }
 0x220   : > { %4522 = vsyncadd (%p5875_p0), %s1110_s12, 4294967248  ;;  %s5339_s29 = sshll.u32 %s5319_s27, 1  ;;  %s1127_s11 = scalar_lea.sflag [#allocation12], %s5316_s8 }
 0x221   : > { %4524 = dma.done.wait (%p5875_p0), %s1127_s11, 48  }
 0x222   : > { %4526 = vsyncadd (%p5875_p0), %s1127_s11, 4294967248  ;;  %s1144_s30 = scalar_lea.sflag [#allocation15], %s5316_s8  ;;  %s5350_s15 = scalar_lea.vmem [#allocation14], %s3396_s7 }
 0x223   : > { %4528 = dma.done.wait (%p5875_p0), %s1144_s30, 1040  }
 0x224   : > { %4530 = vsyncadd (%p5875_p0), %s1144_s30, 4294966256  ;;  %s1161_s21 = scalar_lea.sflag [#allocation18], %s5316_s8 }
 0x225   : > { %4532 = dma.done.wait (%p5875_p0), %s1161_s21, 1056  }
 0x226   : > { %4534 = vsyncadd (%p5875_p0), %s1161_s21, 4294966240  ;;  %s5363_s26 = scalar_lea.vmem [#allocation19], %s3396_s7  ;;  %s1179_s9 = scalar_lea.sflag [#allocation21], %s5316_s8 }
 0x227   : > { %4536 = dma.done.wait (%p5875_p0), %s1179_s9, 1040  }
 0x228   : > { %4538 = vsyncadd (%p5875_p0), %s1179_s9, 4294966256  ;;  %s5371_s19 = scalar_lea.vmem [#allocation22], %s3396_s7  ;;  %s1196_s12 = scalar_lea.sflag [#allocation24], %s5316_s8 }
 0x229   : > { %4540 = dma.done.wait (%p5875_p0), %s1196_s12, 48  }
 0x22a   : > { %4542 = vsyncadd (%p5875_p0), %s1196_s12, 4294967248 }
 0x22b   : > { %4544 = dma.done.wait (%p5871_p10), [#allocation27], 1040  }
 0x22c   : > { %4546 = vsyncadd (%p5871_p10), [#allocation27], 4294966256  ;;  %s5876_s21 = sld [smem:[#allocation39_spill]]  ;;  %s5877_s25 = sld [smem:[#allocation57_spill]] }
 0x22d   : > { %s5878_s30 = sld [smem:[#allocation52_spill]]  ;;  %s5879_s1 = sld [smem:[#allocation59_spill]] }
 0x232   : > { %p1379_p13 = scmp.lt.s32.totalorder %s5876_s21, 3  ;;  %p3411_p4 = scmp.ne.s32.totalorder %s5876_s21, 0 }
 0x233   : > { %s5880_s16 = sld [smem:[#allocation46_spill]] (!%p3411_p4) }
 0x234   : > { %s1380_s7 = scalar_select %p1379_p13, %s5876_s21, 3 }
 0x235   : > { %1404 = sbr.rel (%p3411_p4) target bundleno = 572 (0x23c), region = 192 }
 0x236   : > { %s3760_s9 = smul.u32 192, %s1380_s7  ;;  %s3518_s8 = sshll.u32 %s1380_s7, 6 }
 0x237   : > { %s5389_s17 = scalar_lea.vmem %s5877_s25, %s3518_s8  ;;  %s3519_s4 = sshll.u32 %s1380_s7, 7 }
 0x238   : > { %s5394_s5 = scalar_lea.vmem %s5878_s30, %s3760_s9  ;;  %s5399_s10 = scalar_lea.vmem %s5879_s1, %s3519_s4 }
 0x239   : > { %v1405_v0 = vld [vmem:[%s5880_s16] sm:$0xff] (!%p3411_p4)  ;;  %v1406_v1 = vld [vmem:[%s5880_s16 + $0x8] sm:$0xff] (!%p3411_p4) }
 0x23a   : > { %1407 = vst [vmem:[#allocation2] sm:$0xff] (!%p3411_p4), %v1405_v0  ;;  %1408 = vst [vmem:[#allocation2 + $0x8] sm:$0xff] (!%p3411_p4), %v1406_v1 }
 0x23c PF: > { %v3879_v2 = vld [vmem:[%s5394_s5 + $0x4] ss:$12 sps:$4 sm:$0xff]   ;;  %v3881_v3 = vld [vmem:[%s5394_s5] ss:$12 sps:$4 sm:$0xff]   ;;  %v4594_v4 = vmov 0   ;;  %v4595_v22 = vmov 0.0   ;;  %v1448_v31 = vlaneseq }
 0x23d   : > { %1623 = vmatprep.mubr.bf16.mxu0 %v4594_v4  ;;  %1591 = vmatprep.subr.bf16.mxu0 %v3879_v2  ;;  %v3882_v5 = vld [vmem:[%s5394_s5 + $0x1c] ss:$12 sps:$4 sm:$0xff]   ;;  %v3884_v6 = vld [vmem:[%s5394_s5 + $0x18] ss:$12 sps:$4 sm:$0xff]   ;;  %v3885_v7 = vld [vmem:[%s5394_s5 + $0x34] ss:$12 sps:$4 sm:$0xff]  }
 0x23e   : > { %1592 = vmatpush1.bf16.msra.mxu0 %v3881_v3  ;;  %v3887_v8 = vld [vmem:[%s5394_s5 + $0x30] ss:$12 sps:$4 sm:$0xff]   ;;  %v3888_v9 = vld [vmem:[%s5394_s5 + $0x4c] ss:$12 sps:$4 sm:$0xff]   ;;  %v3890_v10 = vld [vmem:[%s5394_s5 + $0x48] ss:$12 sps:$4 sm:$0xff]   ;;  %3593 = vmatprep.subr.bf16.mxu1 %v4595_v22 }
 0x23f   : > { %1593 = vmatprep.subr.bf16.mxu0 %v3882_v5  ;;  %v3891_v11 = vld [vmem:[%s5394_s5 + $0x64] ss:$12 sps:$4 sm:$0xff]   ;;  %v3893_v12 = vld [vmem:[%s5394_s5 + $0x60] ss:$12 sps:$4 sm:$0xff]   ;;  %v3894_v13 = vld [vmem:[%s5394_s5 + $0x7c] ss:$12 sps:$4 sm:$0xff]  }
 0x240   : > { %v3896_v14 = vld [vmem:[%s5394_s5 + $0x78] ss:$12 sps:$4 sm:$0xff]   ;;  %v3897_v15 = vld [vmem:[%s5394_s5 + $0x94] ss:$12 sps:$4 sm:$0xff]   ;;  %v3899_v16 = vld [vmem:[%s5394_s5 + $0x90] ss:$12 sps:$4 sm:$0xff]  }
 0x241   : > { %v3900_v17 = vld [vmem:[%s5394_s5 + $0xac] ss:$12 sps:$4 sm:$0xff]   ;;  %v3902_v18 = vld [vmem:[%s5394_s5 + $0xa8] ss:$12 sps:$4 sm:$0xff]   ;;  %v5425_v19 = vld [vmem:[#allocation2] sm:$0xff]  ;;  %vm4596_vm0 = vmmov 0  }
 0x242   : > { %1594 = vmatpush1.bf16.msra.mxu0 %v3884_v6  ;;  %v5427_v20 = vld [vmem:[#allocation2 + $0x8] sm:$0xff]  ;;  %3609 = vmatprep.mubr.msk.bf16.mxu1 %vm4596_vm0, %v4595_v22  ;;  %v3905_v25 = vld [vmem:[%s5394_s5 + $0x38] ss:$12 sps:$4 sm:$0xff]   ;;  %v3906_v26 = vld [vmem:[%s5394_s5 + $0x50] ss:$12 sps:$4 sm:$0xff]   ;;  %v1449_v32 = vshrl.u32 %v1448_v31, 7 }
 0x243   : > { %1595 = vmatprep.subr.bf16.mxu0 %v3885_v7  ;;  %v1446_v21 = vpack.c.bf16 %v5427_v20, %v5425_v19  ;;  %v3903_v23 = vld [vmem:[%s5394_s5 + $0x8] ss:$12 sps:$4 sm:$0xff]   ;;  %v3904_v24 = vld [vmem:[%s5394_s5 + $0x20] ss:$12 sps:$4 sm:$0xff]   ;;  %v3909_v29 = vld [vmem:[%s5394_s5 + $0x98] ss:$12 sps:$4 sm:$0xff]  }
 0x244   : > { %3594 = vmatpush3.bf16.msra.mxu1 %v3903_v23  ;;  %v3907_v27 = vld [vmem:[%s5394_s5 + $0x68] ss:$12 sps:$4 sm:$0xff]   ;;  %v3908_v28 = vld [vmem:[%s5394_s5 + $0x80] ss:$12 sps:$4 sm:$0xff]   ;;  %v3910_v30 = vld [vmem:[%s5394_s5 + $0xb0] ss:$12 sps:$4 sm:$0xff]  }
 0x245   : > { %3595 = vmatprep.subr.bf16.mxu1 %v4595_v22  ;;  %v5453_v33 = vsub.s32 1, %v1449_v32  ;;  %v1445_v34 = vld [vmem:[%s5323_s24] sm:$0x7]  ;;  %v5456_v35 = vsub.s32 0, %v1449_v32  ;;  %s5881_s1 = sld [smem:[#allocation50_spill]]  ;;  %v1458_v5 = vsub.s32 2, %v1449_v32 }
 0x246   : > { %1596 = vmatpush1.bf16.msra.mxu0 %v3887_v8  ;;  %s5882_s13 = sld [smem:[#allocation48_spill]]  ;;  %vm1755_vm1 = vcmask 523264   ;;  %s5884_s11 = sld [smem:[#allocation47_spill]] }
 0x247   : > { %1597 = vmatprep.subr.bf16.mxu0 %v3888_v9  ;;  %v1455_v36 = vrot.slane %v1445_v34, %v5453_v33  ;;  %v1451_v37 = vrot.slane %v1445_v34, %v5456_v35  ;;  %v1459_v6 = vrot.slane %v1445_v34, %v1458_v5  ;;  %s5885_s9 = sld [smem:[#allocation51_spill]]  ;;  %s5886_s12 = scalar_lea.vmem [#allocation13], %s5339_s29 }
 0x248   : > { %3596 = vmatpush3.bf16.msra.mxu1 %v3904_v24  ;;  %s5888_s7 = scalar_lea.vmem [#allocation11], %s5319_s27  ;;  %s5891_s8 = scalar_lea.vmem [#allocation20], %s5319_s27 }
 0x249   : > { %3597 = vmatprep.subr.bf16.mxu1 %v4595_v22  ;;  %s5892_s4 = scalar_lea.vmem [#allocation23], %s5319_s27 }
 0x24a   : > { %1598 = vmatpush1.bf16.msra.mxu0 %v3890_v10 }
 0x24b   : > { %1599 = vmatprep.subr.bf16.mxu0 %v3891_v11  ;;  %v1677_v41 = vld [vmem:[%s5881_s1] sm:$0xff]  ;;  %v1679_v42 = vld [vmem:[%s5881_s1 + $0x10] sm:$0xff]  ;;  %v1678_v49 = vld [vmem:[%s5881_s1 + $0x8] sm:$0xff] }
 0x24c   : > { %3598 = vmatpush3.bf16.msra.mxu1 %v3905_v25  ;;  %v5469_v45 = vld [vmem:[%s5881_s1 + $0x20] sm:$0xff]  ;;  %v5474_v46 = vld [vmem:[%s5881_s1 + $0x30] sm:$0xff]  ;;  %v1680_v50 = vld [vmem:[%s5881_s1 + $0x18] sm:$0xff]  ;;  %v1769_v3 = vpack.c.bf16 %v1678_v49, %v1677_v41 }
 0x24d   : > { %3599 = vmatprep.subr.bf16.mxu1 %v4595_v22  ;;  %v5485_v51 = vld [vmem:[%s5881_s1 + $0x28] sm:$0xff]  ;;  %v5490_v52 = vld [vmem:[%s5881_s1 + $0x38] sm:$0xff]  ;;  %v1675_v25 = vld [vmem:[%s5882_s13] sm:$0xff] }
 0x24e   : > { %1600 = vmatpush1.bf16.msra.mxu0 %v3893_v12  ;;  %v1771_v23 = vpack.c.bf16 %v5485_v51, %v5469_v45 }
 0x24f   : > { %1601 = vmatprep.subr.bf16.mxu0 %v3894_v13 }
 0x250   : > { %3600 = vmatpush3.bf16.msra.mxu1 %v3906_v26 }
 0x251   : > { %3601 = vmatprep.subr.bf16.mxu1 %v4595_v22 }
 0x252   : > { %1602 = vmatpush1.bf16.msra.mxu0 %v3896_v14 }
 0x253   : > { %1603 = vmatprep.subr.bf16.mxu0 %v3897_v15 }
 0x254   : > { %3602 = vmatpush3.bf16.msra.mxu1 %v3907_v27 }
 0x255   : > { %3603 = vmatprep.subr.bf16.mxu1 %v4595_v22 }
 0x256   : > { %1604 = vmatpush1.bf16.msra.mxu0 %v3899_v16 }
 0x257   : > { %1605 = vmatprep.subr.bf16.mxu0 %v3900_v17  ;;  %v1770_v17 = vpack.c.bf16 %v1680_v50, %v1679_v42 }
 0x258   : > { %3604 = vmatpush3.bf16.msra.mxu1 %v3908_v28 }
 0x259   : > { %3605 = vmatprep.subr.bf16.mxu1 %v4595_v22 }
 0x25a   : > { %1606 = vmatpush1.bf16.msra.mxu0 %v3902_v18 }
 0x25b   : > { %3613 = vmatprep.subr.bf16.mxu0 %v4595_v22 }
 0x25c   : > { %3606 = vmatpush3.bf16.msra.mxu1 %v3909_v29  ;;  %v1676_v29 = vld [vmem:[%s5882_s13 + $0x8] sm:$0xff] }
 0x25d   : > { %1624 = vmatmul.mubr.bf16.vlgmr.msra.gmra.mrb[0].mxu0 %v1446_v21  ;;  %3607 = vmatprep.subr.bf16.mxu1 %v4595_v22 }
 0x25e   : > { %3621 = vmatprep.mubr.msk.bf16.mxu0 %vm4596_vm0, %v4595_v22 }
 0x260   : > { %3608 = vmatpush3.bf16.msra.mxu1 %v3910_v30 }
 0x261   : > { %1776 = vmatprep.subr.bf16.mxu1 %v1769_v3 }
 0x263   : > { %3610 = vmatmul.mubr.bf16.vlgmr.msra.gmra.mrb[0].mxu1 %v1446_v21 }
 0x264   : > { %1808 = vmatprep.mubr.bf16.mxu1 %v4594_v4 }
 0x330   : > { %v1625_v38 = vpop.f32.mrb[0].mxu0 }
 0x331   : > { %v1627_v39 = vpop.f32.mrb[1].mxu0  ;;  %v1626_v44 = vadd.f32 %v1625_v38, %v1451_v37 }
 0x332   : > { %v1628_v40 = vadd.f32 %v1627_v39, %v1455_v36  ;;  %v1629_v43 = vpop.f32.mrb[2].mxu0 }
 0x333   : > { %v1630_v47 = vadd.f32 %v1629_v43, %v1451_v37  ;;  %v1631_v48 = vpop.f32.mrb[3].mxu0  ;;  %v1772_v43 = vpack.c.bf16 %v5490_v52, %v5474_v46 }
 0x334   : > { %v1632_v54 = vadd.f32 %v1631_v48, %v1455_v36  ;;  %v1685_v55 = vmul.f32 %v1677_v41, %v1628_v40  ;;  %v1687_v56 = vmul.f32 %v1679_v42, %v1628_v40  ;;  %v1689_v57 = vmul.f32 %v5469_v45, %v1628_v40 }
 0x335   : > { %v1709_v53 = vpack.c.bf16 %v1630_v47, %v1626_v44  ;;  %v1691_v58 = vmul.f32 %v5474_v46, %v1628_v40 }
 0x336   : > { %v1686_v59 = vmul.f32 %v1678_v49, %v1632_v54  ;;  %v1688_v60 = vmul.f32 %v1680_v50, %v1632_v54  ;;  %v1690_v61 = vmul.f32 %v5485_v51, %v1632_v54  ;;  %v1692_v62 = vmul.f32 %v5490_v52, %v1632_v54  ;;  %v1668_v7 = vpop.f32.mrb[0].mxu1 }
 0x337   : > { %v1669_v8 = vadd.f32 %v1668_v7, %v1459_v6  ;;  %v3611_v9 = vpop.f32.mrb[1].mxu1 }
 0x338   : > { %v1693_v63 = vpack.c.bf16 %v1686_v59, %v1685_v55  ;;  %v1694_v0 = vpack.c.bf16 %v1688_v60, %v1687_v56  ;;  %v1695_v1 = vpack.c.bf16 %v1690_v61, %v1689_v57  ;;  %v1696_v2 = vpack.c.bf16 %v1692_v62, %v1691_v58  ;;  %v1671_v10 = vpop.f32.mrb[2].mxu1  ;;  %v3912_v55 = vld [vmem:[%s5330_s2 + $0x8] sm:$0xff]   ;;  %v3913_v56 = vld [vmem:[%s5330_s2 + $0x10] sm:$0xff]   ;;  %v3914_v57 = vld [vmem:[%s5330_s2 + $0x18] sm:$0xff]  }
 0x339   : > { %v3612_v11 = vpop.f32.mrb[3].mxu1  ;;  %v1697_v12 = vmul.f32 %v1677_v41, %v1669_v8  ;;  %v1699_v13 = vmul.f32 %v1679_v42, %v1669_v8  ;;  %v1672_v14 = vadd.f32 %v1671_v10, %v1459_v6  ;;  %v1701_v38 = vmul.f32 %v5469_v45, %v1669_v8  ;;  %v3915_v58 = vld [vmem:[%s5330_s2 + $0x20] sm:$0xff]   ;;  %v3916_v59 = vld [vmem:[%s5330_s2 + $0x28] sm:$0xff]   ;;  %v3917_v60 = vld [vmem:[%s5330_s2 + $0x30] sm:$0xff]  }
 0x33a   : > { %3614 = vmatpush3.bf16.xpose.msra.mxu0 %v1693_v63  ;;  %v1703_v40 = vmul.f32 %v5474_v46, %v1669_v8  ;;  %v3911_v46 = vld [vmem:[%s5330_s2] sm:$0xff]   ;;  %v3918_v61 = vld [vmem:[%s5330_s2 + $0x38] sm:$0xff]   ;;  %s5883_s2 = scalar_lea.vmem [#allocation8], %s5319_s27 }
 0x33b   : > { %3615 = vmatprep.subr.bf16.mxu0 %v4595_v22  ;;  %v1698_v15 = vmul.f32 %v1678_v49, %v1672_v14  ;;  %v1700_v16 = vmul.f32 %v1680_v50, %v1672_v14  ;;  %v1702_v39 = vmul.f32 %v5485_v51, %v1672_v14  ;;  %v1704_v41 = vmul.f32 %v5490_v52, %v1672_v14  ;;  %v3437_v10 = vld [vmem:[%s5883_s2] ss:$0 sm:$0xff] }
 0x33d   : > { %v1705_v18 = vpack.c.bf16 %v1698_v15, %v1697_v12  ;;  %v1706_v21 = vpack.c.bf16 %v1700_v16, %v1699_v13  ;;  %v1707_v42 = vpack.c.bf16 %v1702_v39, %v1701_v38  ;;  %v1708_v44 = vpack.c.bf16 %v1704_v41, %v1703_v40  ;;  %v3940_v38 = vld [vmem:[%s5399_s10 + $0x70] ss:$8 sps:$4 sm:$0xff]   ;;  %v1411_v39 = vld [vmem:[%s5884_s11] sm:$0xff]  ;;  %v1412_v40 = vld [vmem:[%s5884_s11 + $0x8] sm:$0xff] }
 0x33e   : > { %v2106_v41 = vpack.c.bf16 %v1412_v40, %v1411_v39 }
 0x33f   : > { %1777 = vmatpush1.bf16.msra.mxu1 %v1705_v18 }
 0x340   : > { %1778 = vmatprep.subr.bf16.mxu1 %v1770_v17 }
 0x342   : > { %3616 = vmatpush3.bf16.xpose.msra.mxu0 %v1694_v0 }
 0x343   : > { %3617 = vmatprep.subr.bf16.mxu0 %v4595_v22  ;;  %1779 = vmatpush1.bf16.msra.mxu1 %v1706_v21  ;;  %v3919_v21 = vld [vmem:[%s5399_s10] ss:$8 sps:$4 sm:$0xff]  }
 0x344   : > { %1780 = vmatprep.subr.bf16.mxu1 %v1771_v23  ;;  %v3921_v23 = vld [vmem:[%s5399_s10 + $0x4] ss:$8 sps:$4 sm:$0xff]  }
 0x347   : > { %1781 = vmatpush1.bf16.msra.mxu1 %v1707_v42 }
 0x348   : > { %1782 = vmatprep.subr.bf16.mxu1 %v1772_v43 }
 0x34a   : > { %3618 = vmatpush3.bf16.xpose.msra.mxu0 %v1695_v1 }
 0x34b   : > { %3619 = vmatprep.subr.bf16.mxu0 %v4595_v22  ;;  %1783 = vmatpush1.bf16.msra.mxu1 %v1708_v44 }
 0x34c   : > { %3625 = vmatprep.subr.bf16.mxu1 %v4595_v22 }
 0x352   : > { %3620 = vmatpush3.bf16.xpose.msra.mxu0 %v1696_v2 }
 0x353   : > { %3645 = vmatprep.subr.bf16.mxu0 %v4595_v22 }
 0x359   : > { %3622 = vmatmul.mubr.bf16.vlgmr.msra.gmra.mrb[4].mxu0 %v1709_v53 }
 0x35a   : > { %3661 = vmatprep.mubr.msk.bf16.mxu0 %vm4596_vm0, %v4595_v22 }
 0x42c   : > { %v1744_v24 = vpop.f32.mrb[4].mxu0 }
 0x42d   : > { %v1751_v26 = vmul.f32 0.17677669, %v1744_v24  ;;  %v3623_v27 = vpop.f32.mrb[5].mxu0  ;;  %v3924_v24 = vld [vmem:[%s5399_s10 + $0x14] ss:$8 sps:$4 sm:$0xff]  }
 0x42e   : > { %v1747_v28 = vpop.f32.mrb[6].mxu0  ;;  %v3943_v27 = vld [vmem:[%s5389_s17] sm:$0xff]  }
 0x42f   : > { %v1752_v30 = vmul.f32 0.17677669, %v1747_v28  ;;  %v3624_v31 = vpop.f32.mrb[7].mxu0  ;;  %v1753_v32 = vadd.f32 %v1751_v26, %v1675_v25  ;;  %v3922_v25 = vld [vmem:[%s5399_s10 + $0x10] ss:$8 sps:$4 sm:$0xff]   ;;  %3646 = vmatpush3.bf16.msra.mxu0 %v3943_v27 }
 0x430   : > { %v3927_v26 = vld [vmem:[%s5399_s10 + $0x24] ss:$8 sps:$4 sm:$0xff]   ;;  %3647 = vmatprep.subr.bf16.mxu0 %v4595_v22  ;;  %v3928_v28 = vld [vmem:[%s5399_s10 + $0x30] ss:$8 sps:$4 sm:$0xff]   ;;  %v3936_v31 = vld [vmem:[%s5399_s10 + $0x54] ss:$8 sps:$4 sm:$0xff]  }
 0x431   : > { %v1756_v34 = vsel %vm1755_vm1, %v1753_v32, -inf  ;;  %v1754_v36 = vadd.f32 %v1752_v30, %v1676_v29  ;;  %v3933_v29 = vld [vmem:[%s5399_s10 + $0x44] ss:$8 sps:$4 sm:$0xff]   ;;  %v3931_v30 = vld [vmem:[%s5399_s10 + $0x40] ss:$8 sps:$4 sm:$0xff]  }
 0x432   : > { %1757 = vmax.xlane.f32.xlu0 %v1756_v34  ;;  %v3939_v34 = vld [vmem:[%s5399_s10 + $0x64] ss:$8 sps:$4 sm:$0xff]  }
 0x433   : > { %v1759_v37 = vsel %vm1755_vm1, %v1754_v36, -inf }
 0x436   : > { %1760 = vmax.xlane.f32.xlu0 %v1759_v37  ;;  %v3942_v37 = vld [vmem:[%s5399_s10 + $0x74] ss:$8 sps:$4 sm:$0xff]  }
 0x4bf   : > { %v1758_v47 = vpop.xlane.xlu0 %1757 }
 0x4c0   : > { %v1762_v45 = vsub.f32 %v1753_v32, %v1758_v47  ;;  %v3934_v32 = vld [vmem:[%s5399_s10 + $0x50] ss:$8 sps:$4 sm:$0xff]  }
 0x4c2   : > { %v1764_v48 = vmul.f32 1.442695, %v1762_v45 }
 0x4c3   : > { %v1761_v49 = vpop.xlane.xlu0 %1760 }
 0x4c4   : > { %v1763_v50 = vsub.f32 %v1754_v36, %v1761_v49  ;;  %3975 = vpow2.f32 %v1764_v48  ;;  %v3937_v36 = vld [vmem:[%s5399_s10 + $0x60] ss:$8 sps:$4 sm:$0xff]  }
 0x4c6   : > { %v1766_v51 = vmul.f32 1.442695, %v1763_v50 }
 0x4c8   : > { %3977 = vpow2.f32 %v1766_v51  ;;  %v3945_v51 = vld [vmem:[%s5389_s17 + $0x10] sm:$0xff]  }
 0x4ce   : > { %v3976_v53 = vpop.eup %3975 }
 0x4d2   : > { %v3978_v54 = vpop.eup %3977 }
 0x4d3   : > { %v1768_v52 = vpack.c.bf16 %v3978_v54, %v3976_v53  ;;  %v3946_v53 = vld [vmem:[%s5389_s17 + $0x18] sm:$0xff]   ;;  %v3947_v54 = vld [vmem:[%s5389_s17 + $0x20] sm:$0xff]  }
 0x4d5   : > { %3436 = vmatmul.mubr.msk.bf16.vlgmr.msra.gmra.mrb[4].mxu1 %vm1755_vm1, %v1768_v52  ;;  %v3949_v52 = vld [vmem:[%s5389_s17 + $0x30] sm:$0xff]  }
 0x4d6   : > { %3626 = vmatpush3.bf16.msra.mxu1 %v3911_v46  ;;  %3641 = vmatprep.mubr.msk.bf16.mxu1 %vm4596_vm0, %v4595_v22  ;;  %v3948_v46 = vld [vmem:[%s5389_s17 + $0x28] sm:$0xff]  }
 0x4d7   : > { %3627 = vmatprep.subr.bf16.mxu1 %v4595_v22 }
 0x4da   : > { %3628 = vmatpush3.bf16.msra.mxu1 %v3912_v55  ;;  %v3950_v55 = vld [vmem:[%s5389_s17 + $0x38] sm:$0xff]  }
 0x4db   : > { %3629 = vmatprep.subr.bf16.mxu1 %v4595_v22 }
 0x4de   : > { %3630 = vmatpush3.bf16.msra.mxu1 %v3913_v56  ;;  %v2243_v56 = vld [vmem:[%s5885_s9] sm:$0xff] }
 0x4df   : > { %3631 = vmatprep.subr.bf16.mxu1 %v4595_v22 }
 0x4e2   : > { %3632 = vmatpush3.bf16.msra.mxu1 %v3914_v57  ;;  %v2244_v57 = vld [vmem:[%s5885_s9 + $0x8] sm:$0xff] }
 0x4e3   : > { %3633 = vmatprep.subr.bf16.mxu1 %v4595_v22 }
 0x4e6   : > { %3634 = vmatpush3.bf16.msra.mxu1 %v3915_v58  ;;  %v2334_v58 = vpack.c.bf16 %v2244_v57, %v2243_v56 }
 0x4e7   : > { %3635 = vmatprep.subr.bf16.mxu1 %v4595_v22 }
 0x4ea   : > { %3636 = vmatpush3.bf16.msra.mxu1 %v3916_v59  ;;  %v2105_v59 = vld [vmem:[%s5886_s12] sm:$0x3] }
 0x4eb   : > { %3637 = vmatprep.subr.bf16.mxu1 %v4595_v22 }
 0x4ee   : > { %3638 = vmatpush3.bf16.msra.mxu1 %v3917_v60  ;;  %v2111_v60 = vrot.slane %v2105_v59, %v5456_v35 }
 0x4ef   : > { %3639 = vmatprep.subr.bf16.mxu1 %v4595_v22 }
 0x4f2   : > { %3640 = vmatpush3.bf16.msra.mxu1 %v3918_v61  ;;  %v2115_v61 = vrot.slane %v2105_v59, %v5453_v33 }
 0x4f3   : > { %2198 = vmatprep.subr.bf16.mxu1 %v3921_v23 }
 0x5a8   : > { %v1810_v62 = vpop.f32.mrb[4].mxu1 }
 0x5a9   : > { %v1812_v63 = vpop.f32.mrb[5].mxu1 }
 0x5aa   : > { %v1819_v0 = vmax.f32 %v1812_v63, 1e-30  ;;  %v1814_v1 = vpop.f32.mrb[6].mxu1  ;;  %v2245_v63 = vld [vmem:[%s5885_s9 + $0x10] sm:$0xff] }
 0x5ab   : > { %v1816_v2 = vpop.f32.mrb[7].mxu1 }
 0x5ac   : > { %3979 = vrcp.f32 %v1819_v0  ;;  %v1820_v3 = vmax.f32 %v1816_v2, 1e-30  ;;  %v2247_v0 = vld [vmem:[%s5885_s9 + $0x20] sm:$0xff] }
 0x5ae   : > { %3981 = vrcp.f32 %v1820_v3  ;;  %v2246_v3 = vld [vmem:[%s5885_s9 + $0x18] sm:$0xff] }
 0x5b6   : > { %v3980_v5 = vpop.eup %3979 }
 0x5b7   : > { %v1823_v6 = vmul.f32 %v3980_v5, %v1810_v62 }
 0x5b8   : > { %v3982_v7 = vpop.eup %3981 }
 0x5b9   : > { %v1824_v8 = vmul.f32 %v3982_v7, %v1814_v1  ;;  %v2248_v7 = vld [vmem:[%s5885_s9 + $0x28] sm:$0xff] }
 0x5bb   : > { %v1842_v9 = vpack.c.bf16 %v1824_v8, %v1823_v6  ;;  %v2335_v8 = vpack.c.bf16 %v2246_v3, %v2245_v63 }
 0x5bd   : > { %3642 = vmatmul.mubr.bf16.vlgmr.msra.gmra.mrb[8].mxu1 %v1842_v9  ;;  %v2249_v9 = vld [vmem:[%s5885_s9 + $0x30] sm:$0xff] }
 0x5be   : > { %2230 = vmatprep.mubr.bf16.mxu1 %v4594_v4  ;;  %2199 = vmatpush1.bf16.msra.mxu1 %v3919_v21 }
 0x5bf   : > { %2200 = vmatprep.subr.bf16.mxu1 %v3924_v24 }
 0x5c2   : > { %2201 = vmatpush1.bf16.msra.mxu1 %v3922_v25 }
 0x5c3   : > { %2202 = vmatprep.subr.bf16.mxu1 %v3927_v26 }
 0x690   : > { %v1931_v11 = vpop.f32.mrb[8].mxu1 }
 0x691   : > { %v1932_v12 = vadd.f32 %v3437_v10, %v1931_v11  ;;  %v3643_v13 = vpop.f32.mrb[9].mxu1 }
 0x692   : > { %v1934_v14 = vpop.f32.mrb[10].mxu1 }
 0x693   : > { %v1935_v15 = vadd.f32 %v3437_v10, %v1934_v14  ;;  %v3644_v16 = vpop.f32.mrb[11].mxu1  ;;  %v1938_v17 = vadd.f32 %v1932_v12, %v5425_v19  ;;  %v3925_v19 = vld [vmem:[%s5399_s10 + $0x20] ss:$8 sps:$4 sm:$0xff]  }
 0x694   : > { %2203 = vmatpush1.bf16.msra.mxu1 %v3925_v19 }
 0x695   : > { %1941 = vadd.xlane.f32.xlu1 %v1938_v17  ;;  %v1939_v18 = vadd.f32 %v1935_v15, %v5427_v20  ;;  %v3930_v20 = vld [vmem:[%s5399_s10 + $0x34] ss:$8 sps:$4 sm:$0xff]   ;;  %s5887_s10 = scalar_lea.vmem [#allocation10], %s5339_s29 }
 0x696   : > { %2204 = vmatprep.subr.bf16.mxu1 %v3930_v20  ;;  %v2250_v15 = vld [vmem:[%s5885_s9 + $0x38] sm:$0xff] }
 0x698   : > { %2205 = vmatpush1.bf16.msra.mxu1 %v3928_v28 }
 0x699   : > { %1943 = vadd.xlane.f32.xlu1 %v1939_v18  ;;  %2206 = vmatprep.subr.bf16.mxu1 %v3933_v29 }
 0x69c   : > { %2207 = vmatpush1.bf16.msra.mxu1 %v3931_v30 }
 0x69d   : > { %2208 = vmatprep.subr.bf16.mxu1 %v3936_v31 }
 0x6a0   : > { %2209 = vmatpush1.bf16.msra.mxu1 %v3934_v32 }
 0x6a1   : > { %2210 = vmatprep.subr.bf16.mxu1 %v3939_v34 }
 0x6a4   : > { %2211 = vmatpush1.bf16.msra.mxu1 %v3937_v36 }
 0x6a5   : > { %2212 = vmatprep.subr.bf16.mxu1 %v3942_v37 }
 0x6a8   : > { %2213 = vmatpush1.bf16.msra.mxu1 %v3940_v38 }
 0x6a9   : > { %2341 = vmatprep.subr.bf16.mxu1 %v2334_v58 }
 0x6ab   : > { %2231 = vmatmul.mubr.bf16.vlgmr.msra.gmra.mrb[12].mxu1 %v2106_v41  ;;  %v2336_v41 = vpack.c.bf16 %v2248_v7, %v2247_v0 }
 0x6ac   : > { %2373 = vmatprep.mubr.bf16.mxu1 %v4594_v4  ;;  %v3944_v4 = vld [vmem:[%s5389_s17 + $0x8] sm:$0xff]  }
 0x6ad   : > { %3648 = vmatpush3.bf16.msra.mxu0 %v3944_v4 }
 0x6ae   : > { %3649 = vmatprep.subr.bf16.mxu0 %v4595_v22 }
 0x6b1   : > { %3650 = vmatpush3.bf16.msra.mxu0 %v3945_v51  ;;  %v1940_v51 = vld [vmem:[%s5887_s10] sm:$0x3] }
 0x6b2   : > { %3651 = vmatprep.subr.bf16.mxu0 %v4595_v22 }
 0x6b5   : > { %3652 = vmatpush3.bf16.msra.mxu0 %v3946_v53 }
 0x6b6   : > { %3653 = vmatprep.subr.bf16.mxu0 %v4595_v22 }
 0x6b9   : > { %3654 = vmatpush3.bf16.msra.mxu0 %v3947_v54 }
 0x6ba   : > { %3655 = vmatprep.subr.bf16.mxu0 %v4595_v22 }
 0x6bd   : > { %3656 = vmatpush3.bf16.msra.mxu0 %v3948_v46  ;;  %v1967_v46 = vrot.slane %v1940_v51, %v5456_v35 }
 0x6be   : > { %3657 = vmatprep.subr.bf16.mxu0 %v4595_v22 }
 0x6c1   : > { %3658 = vmatpush3.bf16.msra.mxu0 %v3949_v52 }
 0x6c2   : > { %3659 = vmatprep.subr.bf16.mxu0 %v4595_v22 }
 0x6c5   : > { %3660 = vmatpush3.bf16.msra.mxu0 %v3950_v55 }
 0x6c6   : > { %3665 = vmatprep.subr.bf16.mxu0 %v4595_v22 }
 0x722   : > { %v1942_v42 = vpop.xlane.xlu1 %1941 }
 0x723   : > { %v1946_v43 = vmul.f32 0.0078125, %v1942_v42  ;;  %v2337_v42 = vpack.c.bf16 %v2250_v15, %v2249_v9 }
 0x725   : > { %v5567_v44 = vsub.f32 %v1938_v17, %v1946_v43 }
 0x726   : > { %v1944_v47 = vpop.xlane.xlu1 %1943 }
 0x727   : > { %v1947_v45 = vmul.f32 0.0078125, %v1944_v47  ;;  %v1950_v48 = vmul.f32 %v5567_v44, %v5567_v44 }
 0x729   : > { %v5571_v49 = vsub.f32 %v1939_v18, %v1947_v45  ;;  %1952 = vadd.xlane.f32.xlu0 %v1950_v48 }
 0x72b   : > { %v1951_v50 = vmul.f32 %v5571_v49, %v5571_v49 }
 0x72d   : > { %1954 = vadd.xlane.f32.xlu1 %v1951_v50 }
 0x77e   : > { %v2232_v62 = vpop.f32.mrb[12].mxu1 }
 0x77f   : > { %v2233_v1 = vadd.f32 %v2232_v62, %v2111_v60  ;;  %v2234_v2 = vpop.f32.mrb[13].mxu1 }
 0x780   : > { %v2235_v5 = vadd.f32 %v2234_v2, %v2115_v61  ;;  %v2236_v6 = vpop.f32.mrb[14].mxu1 }
 0x781   : > { %v2251_v10 = vmul.f32 %v2243_v56, %v2233_v1  ;;  %v2253_v11 = vmul.f32 %v2245_v63, %v2233_v1  ;;  %v2255_v12 = vmul.f32 %v2247_v0, %v2233_v1  ;;  %v2237_v13 = vadd.f32 %v2236_v6, %v2111_v60  ;;  %v2238_v14 = vpop.f32.mrb[15].mxu1  ;;  %v2241_v6 = vld [vmem:[#allocation3] sm:$0xff] }
 0x782   : > { %v2263_v16 = vmul.f32 %v2243_v56, %v2235_v5  ;;  %v2265_v17 = vmul.f32 %v2245_v63, %v2235_v5  ;;  %v2267_v18 = vmul.f32 %v2247_v0, %v2235_v5  ;;  %v2239_v21 = vadd.f32 %v2238_v14, %v2115_v61 }
 0x783   : > { %v2252_v23 = vmul.f32 %v2244_v57, %v2237_v13  ;;  %v2254_v24 = vmul.f32 %v2246_v3, %v2237_v13  ;;  %v2256_v25 = vmul.f32 %v2248_v7, %v2237_v13  ;;  %v2257_v26 = vmul.f32 %v2249_v9, %v2233_v1 }
 0x784   : > { %v2264_v27 = vmul.f32 %v2244_v57, %v2239_v21  ;;  %v2266_v19 = vmul.f32 %v2246_v3, %v2239_v21  ;;  %v2268_v20 = vmul.f32 %v2248_v7, %v2239_v21  ;;  %v2258_v28 = vmul.f32 %v2250_v15, %v2237_v13 }
 0x785   : > { %v2259_v29 = vpack.c.bf16 %v2252_v23, %v2251_v10  ;;  %v2260_v30 = vpack.c.bf16 %v2254_v24, %v2253_v11  ;;  %v2261_v31 = vpack.c.bf16 %v2256_v25, %v2255_v12  ;;  %v2269_v32 = vmul.f32 %v2249_v9, %v2235_v5  ;;  %v2242_v10 = vld [vmem:[#allocation3 + $0x8] sm:$0xff] }
 0x786   : > { %v2271_v34 = vpack.c.bf16 %v2264_v27, %v2263_v16  ;;  %v2272_v36 = vpack.c.bf16 %v2266_v19, %v2265_v17  ;;  %v2273_v37 = vpack.c.bf16 %v2268_v20, %v2267_v18  ;;  %v2270_v38 = vmul.f32 %v2250_v15, %v2239_v21  ;;  %v3951_v17 = vld [vmem:[%s5350_s15] sm:$0xff]   ;;  %v3952_v18 = vld [vmem:[%s5350_s15 + $0x8] sm:$0xff]   ;;  %v3953_v21 = vld [vmem:[%s5350_s15 + $0x10] sm:$0xff]  }
 0x787   : > { %v2262_v39 = vpack.c.bf16 %v2258_v28, %v2257_v26  ;;  %v1973_v57 = vrot.slane %v1940_v51, %v5453_v33 }
 0x788   : > { %2342 = vmatpush1.bf16.msra.mxu1 %v2271_v34  ;;  %v2274_v40 = vpack.c.bf16 %v2270_v38, %v2269_v32  ;;  %v3956_v32 = vld [vmem:[%s5350_s15 + $0x28] sm:$0xff]   ;;  %v3957_v34 = vld [vmem:[%s5350_s15 + $0x30] sm:$0xff]  }
 0x789   : > { %2343 = vmatprep.subr.bf16.mxu1 %v2335_v8 }
 0x78c   : > { %2344 = vmatpush1.bf16.msra.mxu1 %v2272_v36  ;;  %v3958_v36 = vld [vmem:[%s5350_s15 + $0x38] sm:$0xff]  }
 0x78d   : > { %2345 = vmatprep.subr.bf16.mxu1 %v2336_v41 }
 0x790   : > { %2346 = vmatpush1.bf16.msra.mxu1 %v2273_v37 }
 0x791   : > { %2347 = vmatprep.subr.bf16.mxu1 %v2337_v42 }
 0x794   : > { %2348 = vmatpush1.bf16.msra.mxu1 %v2274_v40 }
 0x795   : > { %3697 = vmatprep.subr.bf16.mxu1 %v4595_v22 }
 0x7b6   : > { %v1953_v43 = vpop.xlane.xlu0 %1952 }
 0x7b7   : > { %v1956_v47 = vmul.f32 0.0078125, %v1953_v43 }
 0x7b9   : > { %v1958_v45 = vadd.f32 1e-05, %v1956_v47 }
 0x7ba   : > { %v1955_v48 = vpop.xlane.xlu1 %1954 }
 0x7bb   : > { %3983 = vrsqrt.f32 %v1958_v45  ;;  %v1957_v50 = vmul.f32 0.0078125, %v1955_v48 }
 0x7bd   : > { %v1959_v4 = vadd.f32 1e-05, %v1957_v50 }
 0x7bf   : > { %3985 = vrsqrt.f32 %v1959_v4 }
 0x7c5   : > { %v3984_v53 = vpop.eup %3983 }
 0x7c6   : > { %v1962_v54 = vmul.f32 %v3984_v53, %v5567_v44  ;;  %v3446_v44 = vld [vmem:[%s5888_s7] ss:$0 sm:$0xff] }
 0x7c8   : > { %v1968_v56 = vmul.f32 %v1967_v46, %v1962_v54 }
 0x7c9   : > { %v3986_v52 = vpop.eup %3985 }
 0x7ca   : > { %v1963_v55 = vmul.f32 %v3986_v52, %v5571_v49  ;;  %v5624_v59 = vadd.f32 %v1973_v57, %v1968_v56 }
 0x7cc   : > { %v1969_v58 = vmul.f32 %v1967_v46, %v1963_v55 }
 0x7ce   : > { %v5626_v60 = vadd.f32 %v1973_v57, %v1969_v58  ;;  %v3959_v58 = vld [vmem:[%s5363_s26] sm:$0xff]  }
 0x7d0   : > { %v1993_v61 = vpack.c.bf16 %v5626_v60, %v5624_v59 }
 0x7d2   : > { %3662 = vmatmul.mubr.bf16.vlgmr.msra.gmra.mrb[8].mxu0 %v1993_v61  ;;  %v3960_v61 = vld [vmem:[%s5363_s26 + $0x8] sm:$0xff]  }
 0x7d3   : > { %3666 = vmatpush3.bf16.xpose.msra.mxu0 %v2259_v29  ;;  %3673 = vmatprep.mubr.msk.bf16.mxu0 %vm4596_vm0, %v4595_v22 }
 0x7d4   : > { %3667 = vmatprep.subr.bf16.mxu0 %v4595_v22 }
 0x7db   : > { %3668 = vmatpush3.bf16.xpose.msra.mxu0 %v2260_v30  ;;  %v3954_v30 = vld [vmem:[%s5350_s15 + $0x18] sm:$0xff]  }
 0x7dc   : > { %3669 = vmatprep.subr.bf16.mxu0 %v4595_v22 }
 0x7e3   : > { %3670 = vmatpush3.bf16.xpose.msra.mxu0 %v2261_v31  ;;  %v3955_v31 = vld [vmem:[%s5350_s15 + $0x20] sm:$0xff]   ;;  %s5889_s15 = scalar_lea.vmem [#allocation16], %s5319_s27  ;;  %s5893_s27 = scalar_lea.vmem [#allocation25], %s5339_s29 }
 0x7e4   : > { %3671 = vmatprep.subr.bf16.mxu0 %v4595_v22  ;;  %v3472_v4 = vld [vmem:[%s5889_s15] ss:$0 sm:$0xff] }
 0x7eb   : > { %3672 = vmatpush3.bf16.xpose.msra.mxu0 %v2262_v39 }
 0x7ec   : > { %3677 = vmatprep.subr.bf16.mxu0 %v4595_v22 }
 0x8a5   : > { %v2082_v49 = vpop.f32.mrb[8].mxu0 }
 0x8a6   : > { %v3663_v62 = vpop.f32.mrb[9].mxu0  ;;  %v2083_v0 = vadd.f32 %v3446_v44, %v2082_v49 }
 0x8a7   : > { %v2085_v63 = vpop.f32.mrb[10].mxu0 }
 0x8a8   : > { %v2086_v1 = vadd.f32 %v3446_v44, %v2085_v63  ;;  %v3664_v2 = vpop.f32.mrb[11].mxu0 }
 0x8a9   : > { %v3961_v2 = vld [vmem:[%s5363_s26 + $0x10] sm:$0xff]  }
 0x8aa   : > { %v2275_v3 = vpack.c.bf16 %v2086_v1, %v2083_v0 }
 0x8ac   : > { %3674 = vmatmul.mubr.bf16.vlgmr.msra.gmra.mrb[12].mxu0 %v2275_v3  ;;  %v3962_v3 = vld [vmem:[%s5363_s26 + $0x18] sm:$0xff]  }
 0x8ad   : > { %3693 = vmatprep.mubr.msk.bf16.mxu0 %vm4596_vm0, %v4595_v22  ;;  %3678 = vmatpush3.bf16.msra.mxu0 %v3951_v17 }
 0x8ae   : > { %3679 = vmatprep.subr.bf16.mxu0 %v4595_v22 }
 0x8b1   : > { %3680 = vmatpush3.bf16.msra.mxu0 %v3952_v18 }
 0x8b2   : > { %3681 = vmatprep.subr.bf16.mxu0 %v4595_v22 }
 0x8b5   : > { %3682 = vmatpush3.bf16.msra.mxu0 %v3953_v21 }
 0x8b6   : > { %3683 = vmatprep.subr.bf16.mxu0 %v4595_v22 }
 0x8b9   : > { %3684 = vmatpush3.bf16.msra.mxu0 %v3954_v30 }
 0x8ba   : > { %3685 = vmatprep.subr.bf16.mxu0 %v4595_v22 }
 0x8bd   : > { %3686 = vmatpush3.bf16.msra.mxu0 %v3955_v31 }
 0x8be   : > { %3687 = vmatprep.subr.bf16.mxu0 %v4595_v22 }
 0x8c1   : > { %3688 = vmatpush3.bf16.msra.mxu0 %v3956_v32 }
 0x8c2   : > { %3689 = vmatprep.subr.bf16.mxu0 %v4595_v22 }
 0x8c5   : > { %3690 = vmatpush3.bf16.msra.mxu0 %v3957_v34 }
 0x8c6   : > { %3691 = vmatprep.subr.bf16.mxu0 %v4595_v22 }
 0x8c9   : > { %3692 = vmatpush3.bf16.msra.mxu0 %v3958_v36  ;;  %v3973_v36 = vld [vmem:[%s5371_s19 + $0x30] sm:$0xff]  }
 0x8ca   : > { %3717 = vmatprep.subr.bf16.mxu0 %v4595_v22 }
 0x97f   : > { %v2310_v5 = vpop.f32.mrb[12].mxu0 }
 0x980   : > { %v2317_v7 = vmul.f32 0.17677669, %v2310_v5  ;;  %v3675_v8 = vpop.f32.mrb[13].mxu0  ;;  %v3963_v5 = vld [vmem:[%s5363_s26 + $0x20] sm:$0xff]  }
 0x981   : > { %v2313_v9 = vpop.f32.mrb[14].mxu0  ;;  %v3966_v8 = vld [vmem:[%s5363_s26 + $0x38] sm:$0xff]  }
 0x982   : > { %v2318_v11 = vmul.f32 0.17677669, %v2313_v9  ;;  %v3676_v12 = vpop.f32.mrb[15].mxu0  ;;  %v2319_v13 = vadd.f32 %v2317_v7, %v2241_v6  ;;  %v3964_v6 = vld [vmem:[%s5363_s26 + $0x28] sm:$0xff]   ;;  %v3965_v7 = vld [vmem:[%s5363_s26 + $0x30] sm:$0xff]   ;;  %s5890_s26 = scalar_lea.vmem [#allocation17], %s5339_s29 }
 0x983   : > { %v3967_v9 = vld [vmem:[%s5371_s19] sm:$0xff]   ;;  %v3970_v12 = vld [vmem:[%s5371_s19 + $0x18] sm:$0xff]  }
 0x984   : > { %v2321_v14 = vsel %vm1755_vm1, %v2319_v13, -inf  ;;  %v2320_v15 = vadd.f32 %v2318_v11, %v2242_v10  ;;  %v3968_v10 = vld [vmem:[%s5371_s19 + $0x8] sm:$0xff]   ;;  %v3969_v11 = vld [vmem:[%s5371_s19 + $0x10] sm:$0xff]  }
 0x985   : > { %2322 = vmax.xlane.f32.xlu0 %v2321_v14  ;;  %v3972_v14 = vld [vmem:[%s5371_s19 + $0x28] sm:$0xff]  }
 0x986   : > { %v2324_v16 = vsel %vm1755_vm1, %v2320_v15, -inf }
 0x987   : > { %2325 = vmax.xlane.f32.xlu1 %v2324_v16 }
 0xa12   : > { %v2323_v23 = vpop.xlane.xlu0 %2322 }
 0xa13   : > { %v2327_v24 = vsub.f32 %v2319_v13, %v2323_v23  ;;  %v3971_v13 = vld [vmem:[%s5371_s19 + $0x20] sm:$0xff]  }
 0xa14   : > { %v2326_v25 = vpop.xlane.xlu1 %2325 }
 0xa15   : > { %v2329_v26 = vmul.f32 1.442695, %v2327_v24  ;;  %v2328_v27 = vsub.f32 %v2320_v15, %v2326_v25  ;;  %v2505_v24 = vld [vmem:[%s5890_s26] sm:$0x3] }
 0xa16   : > { %v2531_v25 = vrot.slane %v2505_v24, %v5456_v35 }
 0xa17   : > { %v2331_v19 = vmul.f32 1.442695, %v2328_v27  ;;  %3987 = vpow2.f32 %v2329_v26 }
 0xa19   : > { %3989 = vpow2.f32 %v2331_v19 }
 0xa21   : > { %v3988_v20 = vpop.eup %3987 }
 0xa23   : > { %v3990_v28 = vpop.eup %3989 }
 0xa24   : > { %v2333_v29 = vpack.c.bf16 %v3990_v28, %v3988_v20 }
 0xa26   : > { %3471 = vmatmul.mubr.msk.bf16.vlgmr.msra.gmra.mrb[16].mxu1 %vm1755_vm1, %v2333_v29  ;;  %v2537_v29 = vrot.slane %v2505_v24, %v5453_v33 }
 0xa27   : > { %3713 = vmatprep.mubr.msk.bf16.mxu1 %vm4596_vm0, %v4595_v22  ;;  %3698 = vmatpush3.bf16.msra.mxu1 %v3959_v58 }
 0xa28   : > { %3699 = vmatprep.subr.bf16.mxu1 %v4595_v22 }
 0xa2b   : > { %3700 = vmatpush3.bf16.msra.mxu1 %v3960_v61 }
 0xa2c   : > { %3701 = vmatprep.subr.bf16.mxu1 %v4595_v22 }
 0xa2f   : > { %3702 = vmatpush3.bf16.msra.mxu1 %v3961_v2 }
 0xa30   : > { %3703 = vmatprep.subr.bf16.mxu1 %v4595_v22 }
 0xa33   : > { %3704 = vmatpush3.bf16.msra.mxu1 %v3962_v3 }
 0xa34   : > { %3705 = vmatprep.subr.bf16.mxu1 %v4595_v22 }
 0xa37   : > { %3706 = vmatpush3.bf16.msra.mxu1 %v3963_v5 }
 0xa38   : > { %3707 = vmatprep.subr.bf16.mxu1 %v4595_v22 }
 0xa3b   : > { %3708 = vmatpush3.bf16.msra.mxu1 %v3964_v6  ;;  %v2770_v6 = vld [vmem:[%s5893_s27] sm:$0x3] }
 0xa3c   : > { %3709 = vmatprep.subr.bf16.mxu1 %v4595_v22 }
 0xa3f   : > { %3710 = vmatpush3.bf16.msra.mxu1 %v3965_v7  ;;  %v2796_v7 = vrot.slane %v2770_v6, %v5456_v35 }
 0xa40   : > { %3711 = vmatprep.subr.bf16.mxu1 %v4595_v22 }
 0xa43   : > { %3712 = vmatpush3.bf16.msra.mxu1 %v3966_v8 }
 0xaf9   : > { %v2375_v37 = vpop.f32.mrb[16].mxu1 }
 0xafa   : > { %v2377_v38 = vpop.f32.mrb[17].mxu1 }
 0xafb   : > { %v2384_v39 = vmax.f32 %v2377_v38, 1e-30  ;;  %v2379_v40 = vpop.f32.mrb[18].mxu1  ;;  %v3481_v38 = vld [vmem:[%s5891_s8] ss:$0 sm:$0xff] }
 0xafc   : > { %v2381_v41 = vpop.f32.mrb[19].mxu1 }
 0xafd   : > { %3991 = vrcp.f32 %v2384_v39  ;;  %v2385_v42 = vmax.f32 %v2381_v41, 1e-30 }
 0xaff   : > { %3993 = vrcp.f32 %v2385_v42 }
 0xb07   : > { %v3992_v43 = vpop.eup %3991 }
 0xb08   : > { %v2388_v47 = vmul.f32 %v3992_v43, %v2375_v37  ;;  %v3974_v37 = vld [vmem:[%s5371_s19 + $0x38] sm:$0xff]   ;;  %s5894_s19 = sld [smem:[#allocation39_spill]] }
 0xb09   : > { %v3994_v45 = vpop.eup %3993 }
 0xb0a   : > { %v2389_v48 = vmul.f32 %v3994_v45, %v2379_v40 }
 0xb0c   : > { %v2407_v50 = vpack.c.bf16 %v2389_v48, %v2388_v47 }
 0xb0e   : > { %3694 = vmatmul.mubr.bf16.vlgmr.msra.gmra.mrb[16].mxu0 %v2407_v50  ;;  %p3499_p2 = scmp.ne.s32.totalorder %s5894_s19, 3 }
 0xb0f   : > { %3733 = vmatprep.mubr.msk.bf16.mxu0 %vm4596_vm0, %v4595_v22  ;;  %3718 = vmatpush3.bf16.msra.mxu0 %v3967_v9  ;;  %v2802_v9 = vrot.slane %v2770_v6, %v5453_v33  ;;  %v4004_v35 = vld [vmem:[#allocation26 + $0x8] sm:$0xff] (!%p3499_p2)   ;;  %vm4598_vm2 = vmmov (!%p3499_p2), 0   ;;  %v4005_v33 = vld [vmem:[#allocation26 + $0x10] sm:$0xff] (!%p3499_p2)   ;;  %s5895_s17 = sld [smem:[#allocation70_spill]] (!%p3499_p2) }
 0xb10   : > { %3719 = vmatprep.subr.bf16.mxu0 %v4595_v22  ;;  %v4008_v24 = vld [vmem:[#allocation26 + $0x28] sm:$0xff] (!%p3499_p2)  }
 0xb13   : > { %3720 = vmatpush3.bf16.msra.mxu0 %v3968_v10 }
 0xb14   : > { %3721 = vmatprep.subr.bf16.mxu0 %v4595_v22 }
 0xb17   : > { %3722 = vmatpush3.bf16.msra.mxu0 %v3969_v11 }
 0xb18   : > { %3723 = vmatprep.subr.bf16.mxu0 %v4595_v22 }
 0xb1b   : > { %3724 = vmatpush3.bf16.msra.mxu0 %v3970_v12 }
 0xb1c   : > { %3725 = vmatprep.subr.bf16.mxu0 %v4595_v22 }
 0xb1f   : > { %3726 = vmatpush3.bf16.msra.mxu0 %v3971_v13 }
 0xb20   : > { %3727 = vmatprep.subr.bf16.mxu0 %v4595_v22 }
 0xb23   : > { %3728 = vmatpush3.bf16.msra.mxu0 %v3972_v14 }
 0xb24   : > { %3729 = vmatprep.subr.bf16.mxu0 %v4595_v22 }
 0xb27   : > { %3730 = vmatpush3.bf16.msra.mxu0 %v3973_v36 }
 0xb28   : > { %3731 = vmatprep.subr.bf16.mxu0 %v4595_v22 }
 0xb2b   : > { %3732 = vmatpush3.bf16.msra.mxu0 %v3974_v37 }
 0xbe1   : > { %v2496_v51 = vpop.f32.mrb[16].mxu0 }
 0xbe2   : > { %v2497_v53 = vadd.f32 %v3472_v4, %v2496_v51  ;;  %v3695_v54 = vpop.f32.mrb[17].mxu0 }
 0xbe3   : > { %v2499_v46 = vpop.f32.mrb[18].mxu0 }
 0xbe4   : > { %v2500_v52 = vadd.f32 %v3472_v4, %v2499_v46  ;;  %v3696_v55 = vpop.f32.mrb[19].mxu0  ;;  %v2503_v56 = vadd.f32 %v2497_v53, %v5624_v59  ;;  %v3490_v4 = vld [vmem:[%s5892_s4] ss:$0 sm:$0xff] }
 0xbe6   : > { %2506 = vadd.xlane.f32.xlu0 %v2503_v56  ;;  %v2504_v57 = vadd.f32 %v2500_v52, %v5626_v60 }
 0xbe8   : > { %2508 = vadd.xlane.f32.xlu1 %v2504_v57 }
 0xc73   : > { %v2507_v44 = vpop.xlane.xlu0 %2506 }
 0xc74   : > { %v2510_v49 = vmul.f32 0.0078125, %v2507_v44 }
 0xc75   : > { %v2509_v62 = vpop.xlane.xlu1 %2508 }
 0xc76   : > { %v2512_v63 = vsub.f32 %v2503_v56, %v2510_v49  ;;  %v2511_v59 = vmul.f32 0.0078125, %v2509_v62 }
 0xc78   : > { %v2513_v0 = vsub.f32 %v2504_v57, %v2511_v59  ;;  %v2514_v60 = vmul.f32 %v2512_v63, %v2512_v63 }
 0xc7a   : > { %2516 = vadd.xlane.f32.xlu0 %v2514_v60  ;;  %v2515_v1 = vmul.f32 %v2513_v0, %v2513_v0 }
 0xc7c   : > { %2518 = vadd.xlane.f32.xlu1 %v2515_v1 }
 0xd07   : > { %v2517_v15 = vpop.xlane.xlu0 %2516 }
 0xd08   : > { %v2520_v16 = vmul.f32 0.0078125, %v2517_v15 }
 0xd09   : > { %v2519_v17 = vpop.xlane.xlu1 %2518 }
 0xd0a   : > { %v2522_v18 = vadd.f32 1e-05, %v2520_v16  ;;  %v2521_v21 = vmul.f32 0.0078125, %v2519_v17  ;;  %v4003_v17 = vld [vmem:[#allocation26] sm:$0xff] (!%p3499_p2)  }
 0xd0c   : > { %3995 = vrsqrt.f32 %v2522_v18  ;;  %v2523_v23 = vadd.f32 1e-05, %v2521_v21  ;;  %v4597_v18 = vmov (!%p3499_p2), 0.0   ;;  %v4006_v21 = vld [vmem:[#allocation26 + $0x18] sm:$0xff] (!%p3499_p2)  }
 0xd0d   : > { %3737 = vmatprep.subr.bf16.mxu0 (!%p3499_p2), %v4597_v18 }
 0xd0e   : > { %3997 = vrsqrt.f32 %v2523_v23  ;;  %v4007_v23 = vld [vmem:[#allocation26 + $0x20] sm:$0xff] (!%p3499_p2)  }
 0xd16   : > { %v3996_v26 = vpop.eup %3995 }
 0xd17   : > { %v2526_v27 = vmul.f32 %v3996_v26, %v2512_v63  ;;  %v4010_v26 = vld [vmem:[#allocation26 + $0x38] sm:$0xff] (!%p3499_p2)  }
 0xd18   : > { %v3998_v19 = vpop.eup %3997 }
 0xd19   : > { %v2527_v20 = vmul.f32 %v3998_v19, %v2513_v0  ;;  %v2532_v28 = vmul.f32 %v2531_v25, %v2526_v27  ;;  %v3500_v19 = vld [vmem:[#allocation28] ss:$0 sm:$0xff] (!%p3499_p2) }
 0xd1b   : > { %v2533_v30 = vmul.f32 %v2531_v25, %v2527_v20  ;;  %v2538_v31 = vadd.f32 %v2537_v29, %v2532_v28  ;;  %v4009_v25 = vld [vmem:[#allocation26 + $0x30] sm:$0xff] (!%p3499_p2)  }
 0xd1d   : > { %v2539_v32 = vadd.f32 %v2537_v29, %v2533_v30 }
 0xd1f   : > { %v2557_v34 = vpack.c.bf16 %v2539_v32, %v2538_v31 }
 0xd21   : > { %3714 = vmatmul.mubr.bf16.vlgmr.msra.gmra.mrb[20].mxu1 %v2557_v34 }
 0xdf4   : > { %v2646_v39 = vpop.f32.mrb[20].mxu1 }
 0xdf5   : > { %v2647_v40 = vadd.f32 %v3481_v38, %v2646_v39  ;;  %v3715_v41 = vpop.f32.mrb[21].mxu1 }
 0xdf6   : > { %v2649_v42 = vpop.f32.mrb[22].mxu1 }
 0xdf7   : > { %v2650_v43 = vadd.f32 %v3481_v38, %v2649_v42  ;;  %v3716_v47 = vpop.f32.mrb[23].mxu1  ;;  %v2653_v45 = vmax.f32 %v2647_v40, 0.0 }
 0xdf9   : > { %v2654_v48 = vmax.f32 %v2650_v43, 0.0 }
 0xdfb   : > { %v2672_v50 = vpack.c.bf16 %v2654_v48, %v2653_v45 }
 0xdfd   : > { %3734 = vmatmul.mubr.bf16.vlgmr.msra.gmra.mrb[20].mxu0 %v2672_v50 }
 0xdfe   : > { %3738 = vmatpush3.bf16.msra.mxu0 (!%p3499_p2), %v4003_v17  ;;  %3753 = vmatprep.mubr.msk.bf16.mxu0 (!%p3499_p2), %vm4598_vm2, %v4597_v18 }
 0xdff   : > { %3739 = vmatprep.subr.bf16.mxu0 (!%p3499_p2), %v4597_v18 }
 0xe02   : > { %3740 = vmatpush3.bf16.msra.mxu0 (!%p3499_p2), %v4004_v35 }
 0xe03   : > { %3741 = vmatprep.subr.bf16.mxu0 (!%p3499_p2), %v4597_v18 }
 0xe06   : > { %3742 = vmatpush3.bf16.msra.mxu0 (!%p3499_p2), %v4005_v33 }
 0xe07   : > { %3743 = vmatprep.subr.bf16.mxu0 (!%p3499_p2), %v4597_v18 }
 0xe0a   : > { %3744 = vmatpush3.bf16.msra.mxu0 (!%p3499_p2), %v4006_v21 }
 0xe0b   : > { %3745 = vmatprep.subr.bf16.mxu0 (!%p3499_p2), %v4597_v18 }
 0xe0e   : > { %3746 = vmatpush3.bf16.msra.mxu0 (!%p3499_p2), %v4007_v23 }
 0xe0f   : > { %3747 = vmatprep.subr.bf16.mxu0 (!%p3499_p2), %v4597_v18 }
 0xe12   : > { %3748 = vmatpush3.bf16.msra.mxu0 (!%p3499_p2), %v4008_v24 }
 0xe13   : > { %3749 = vmatprep.subr.bf16.mxu0 (!%p3499_p2), %v4597_v18 }
 0xe16   : > { %3750 = vmatpush3.bf16.msra.mxu0 (!%p3499_p2), %v4009_v25 }
 0xe17   : > { %3751 = vmatprep.subr.bf16.mxu0 (!%p3499_p2), %v4597_v18 }
 0xe1a   : > { %3752 = vmatpush3.bf16.msra.mxu0 (!%p3499_p2), %v4010_v26 }
 0xed0   : > { %v2761_v51 = vpop.f32.mrb[20].mxu0 }
 0xed1   : > { %v2762_v53 = vadd.f32 %v3490_v4, %v2761_v51  ;;  %v3735_v54 = vpop.f32.mrb[21].mxu0 }
 0xed2   : > { %v2764_v22 = vpop.f32.mrb[22].mxu0 }
 0xed3   : > { %v2765_v46 = vadd.f32 %v3490_v4, %v2764_v22  ;;  %v3736_v52 = vpop.f32.mrb[23].mxu0  ;;  %v2768_v55 = vadd.f32 %v2762_v53, %v2538_v31 }
 0xed5   : > { %2771 = vadd.xlane.f32.xlu0 %v2768_v55  ;;  %v2769_v56 = vadd.f32 %v2765_v46, %v2539_v32 }
 0xed7   : > { %2773 = vadd.xlane.f32.xlu1 %v2769_v56 }
 0xf62   : > { %v2772_v57 = vpop.xlane.xlu0 %2771 }
 0xf63   : > { %v2775_v58 = vmul.f32 0.0078125, %v2772_v57 }
 0xf64   : > { %v2774_v61 = vpop.xlane.xlu1 %2773 }
 0xf65   : > { %v2777_v44 = vsub.f32 %v2768_v55, %v2775_v58  ;;  %v2776_v49 = vmul.f32 0.0078125, %v2774_v61 }
 0xf67   : > { %v2778_v62 = vsub.f32 %v2769_v56, %v2776_v49  ;;  %v2779_v63 = vmul.f32 %v2777_v44, %v2777_v44 }
 0xf69   : > { %2781 = vadd.xlane.f32.xlu0 %v2779_v63  ;;  %v2780_v59 = vmul.f32 %v2778_v62, %v2778_v62 }
 0xf6b   : > { %2783 = vadd.xlane.f32.xlu1 %v2780_v59 }
 0xff6   : > { %v2782_v0 = vpop.xlane.xlu0 %2781 }
 0xff7   : > { %v2785_v60 = vmul.f32 0.0078125, %v2782_v0 }
 0xff8   : > { %v2784_v1 = vpop.xlane.xlu1 %2783 }
 0xff9   : > { %v2787_v2 = vadd.f32 1e-05, %v2785_v60  ;;  %v2786_v3 = vmul.f32 0.0078125, %v2784_v1 }
 0xffb   : > { %3999 = vrsqrt.f32 %v2787_v2  ;;  %v2788_v5 = vadd.f32 1e-05, %v2786_v3 }
 0xffd   : > { %4001 = vrsqrt.f32 %v2788_v5 }
0x1005   : > { %v4000_v8 = vpop.eup %3999 }
0x1006   : > { %v2791_v10 = vmul.f32 %v4000_v8, %v2777_v44 }
0x1007   : > { %v4002_v11 = vpop.eup %4001 }
0x1008   : > { %v2797_v12 = vmul.f32 %v2796_v7, %v2791_v10  ;;  %v2792_v13 = vmul.f32 %v4002_v11, %v2778_v62  ;;  %2810 = sbr.rel (%p3499_p2) target bundleno = 4329 (0x10e9), region = 196 }
0x100a   : > { %v2803_v14 = vadd.f32 %v2802_v9, %v2797_v12  ;;  %v2798_v15 = vmul.f32 %v2796_v7, %v2792_v13 }
0x100c   : > { %2805 = vst [vmem:[#allocation2] sm:$0xff] %v2803_v14  ;;  %v2804_v16 = vadd.f32 %v2802_v9, %v2798_v15 }
0x100e   : > { %2806 = vst [vmem:[#allocation2 + $0x8] sm:$0xff] %v2804_v16  ;;  %v2828_v27 = vpack.c.bf16 (!%p3499_p2), %v2804_v16, %v2803_v14 }
0x1010   : > { %3754 = vmatmul.mubr.bf16.vlgmr.msra.gmra.mrb[0].mxu0 %v2828_v27 }
0x10e3   : > { %v2917_v20 = vpop.f32.mrb[0].mxu0 }
0x10e4   : > { %v2918_v28 = vadd.f32 %v3500_v19, %v2917_v20  ;;  %v3755_v29 = vpop.f32.mrb[1].mxu0 }
0x10e5   : > { %v2920_v30 = vpop.f32.mrb[2].mxu0 }
0x10e6   : > { %2924 = vst [vmem:[%s5895_s17] sm:$0xff] %v2918_v28  ;;  %v2921_v31 = vadd.f32 %v3500_v19, %v2920_v30  ;;  %v3756_v32 = vpop.f32.mrb[3].mxu0 }
0x10e8   : > { %2925 = vst [vmem:[%s5895_s17 + $0x8] sm:$0xff] %v2921_v31 }
0x10e9 PF: > { %s58_s3 = sadd.s32 1, %s4569_s3   ;;  %s5896_s29 = sld [smem:[#allocation38_spill]] }
0x10ea   : > { %p55_p7 = scmp.ge.s32.totalorder %s58_s3, 6   ;;  %s5897_s23 = sld [smem:[#allocation44_spill]] }
0x10eb   : > { %s5898_s30 = sld [smem:[#allocation40_spill]]  ;;  %s5899_s7 = sld [smem:[#allocation41_spill]] }
0x10ec   : > { %s5900_s2 = smov %s4557_s6  ;;  %57 = sbr.rel (!%p55_p7) target bundleno = 44 (0x2c), region = 351 }
0x10f0   : > { %s5901_s6 = smov %s5897_s23 }
0x10f3   :  { %2948 = vsyncpa [#allocation4], 1 }
0x10f4   :  { %2950 = vsyncpa [#allocation4 + $0x1], 1 }
0x10f5   :  { %2951 = vsyncpa [#allocation6], 1 }
0x10f6   :  { %2953 = vsyncpa [#allocation6 + $0x1], 1 }
0x10f7   :  { %2954 = vsyncpa [#allocation9], 1 }
0x10f8   :  { %2956 = vsyncpa [#allocation9 + $0x1], 1 }
0x10f9   :  { %2957 = vsyncpa [#allocation12], 1 }
0x10fa   :  { %2959 = vsyncpa [#allocation12 + $0x1], 1 }
0x10fb   :  { %2960 = vsyncpa [#allocation15], 1 }
0x10fc   :  { %2962 = vsyncpa [#allocation15 + $0x1], 1 }
0x10fd   :  { %2963 = vsyncpa [#allocation18], 1 }
0x10fe   :  { %2965 = vsyncpa [#allocation18 + $0x1], 1 }
0x10ff   :  { %2966 = vsyncpa [#allocation21], 1 }
0x1100   :  { %2968 = vsyncpa [#allocation21 + $0x1], 1 }
0x1101   :  { %2969 = vsyncpa [#allocation24], 1 }
0x1102   :  { %2971 = vsyncpa [#allocation24 + $0x1], 1 }
0x1103   :  { %2972 = vsyncpa [#allocation27], 1 }

</bundles_post_ra>
